<compile_context>
chip_gen: v6e
topology: v6e:2x2x1
jax: 0.10.0
libtpu: 0.0.40
codegen_flags: <defaults>
</compile_context>

<pallas_src>
import functools
import math

import jax
import jax.numpy as jnp
from jax.experimental import pallas as pl
from jax.experimental.pallas import tpu as pltpu


# ----------------------------- in-kernel helpers ----------------------------

def _erf_f32(x):
    # Abramowitz & Stegun 7.1.26 rational approximation, |err| < 1.5e-7 (~f32 eps),
    # i.e. numerically exact erf in float32 -> exact (non-tanh) F.gelu.
    p = 0.3275911
    a1, a2, a3, a4, a5 = (0.254829592, -0.284496736, 1.421413741,
                          -1.453152027, 1.061405429)
    ax = jnp.abs(x)
    t = 1.0 / (1.0 + p * ax)
    poly = ((((a5 * t + a4) * t + a3) * t + a2) * t + a1) * t
    y = 1.0 - poly * jnp.exp(-ax * ax)
    return jnp.where(x >= 0, y, -y)


def _gelu_exact(x):
    return 0.5 * x * (1.0 + _erf_f32(x * 0.7071067811865476))


def _layer_norm(v, g, b, eps):
    mu = jnp.mean(v, axis=-1, keepdims=True)
    vc = v - mu
    var = jnp.mean(vc * vc, axis=-1, keepdims=True)      # biased var, like torch LN
    return vc * jax.lax.rsqrt(var + eps) * g + b


# ------------------------------- Pallas kernels ------------------------------

def _embed_kernel(x_ref, w_ref, b_ref, pos_ref, o_ref):
    # to_embedding matmul + bias + positional embedding, fused (one HBM pass).
    o_ref[0] = (jnp.dot(x_ref[0], w_ref[...], preferred_element_type=jnp.float32)
                + b_ref[...] + pos_ref[...])


def _encoder_layer_kernel(
    x_ref,
    sp_bias_ref, tm_bias_ref,
    s_ln_g_ref, s_ln_b_ref, s_qkv_ref, s_pw_ref, s_pb_ref,
    t_ln_g_ref, t_ln_b_ref, t_qkv_ref, t_pw_ref, t_pb_ref,
    lin_w_ref, lin_b_ref,
    f_ln_g_ref, f_ln_b_ref, f_w1_ref, f_b1_ref, f_w2_ref, f_b2_ref,
    o_ref,
    *, heads, ln_eps):
    """One full TransformerEncoder layer for one batch element, VMEM-resident."""
    x = x_ref[0]                                   # (L, d)
    d = x.shape[-1]
    hd = d // heads
    scale = float(hd) ** (-0.5)

    def attn_branch(ln_g, ln_b, qkv_ref, proj_w, proj_b, bias):
        # PreNorm -> per-head attention over the whole sequence with a block-diagonal
        # group mask (mathematically identical to the grouped space/time attention)
        # -> output projection. DropPath / dropouts are identity at inference.
        xn = _layer_norm(x, ln_g, ln_b, ln_eps)
        out = None
        for h in range(heads):                      # small static head count (nhead // 2)
            q = jnp.dot(xn, qkv_ref[0, h], preferred_element_type=jnp.float32) * scale
            k = jnp.dot(xn, qkv_ref[1, h], preferred_element_type=jnp.float32)
            v = jnp.dot(xn, qkv_ref[2, h], preferred_element_type=jnp.float32)
            s = jax.lax.dot_general(q, k, (((1,), (1,)), ((), ())),
                                    preferred_element_type=jnp.float32)   # (L, L)
            s = s + bias                                                   # group mask
            s = s - jnp.max(s, axis=-1, keepdims=True)
            p = jnp.exp(s)
            p = p * pl.reciprocal(jnp.sum(p, axis=-1, keepdims=True), approx=True)
            oh = jnp.dot(p, v, preferred_element_type=jnp.float32)        # (L, hd)
            # "concat heads -> proj" == sum_h oh @ proj_w[h*hd:(h+1)*hd, :]
            contrib = jnp.dot(oh, proj_w[h * hd:(h + 1) * hd, :],
                              preferred_element_type=jnp.float32)         # (L, d)
            out = contrib if out is None else out + contrib
        return out + proj_b

    o_s = attn_branch(s_ln_g_ref[...], s_ln_b_ref[...], s_qkv_ref,
                      s_pw_ref[...], s_pb_ref[...], sp_bias_ref[...])
    o_t = attn_branch(t_ln_g_ref[...], t_ln_b_ref[...], t_qkv_ref,
                      t_pw_ref[...], t_pb_ref[...], tm_bias_ref[...])

    # torch.cat([xs, xt], dim=2) @ lin_w + lin_b  ==  split-weight accumulation; + residual x.
    lw = lin_w_ref[...]
    out_att = (jnp.dot(o_s, lw[:d, :], preferred_element_type=jnp.float32)
               + jnp.dot(o_t, lw[d:, :], preferred_element_type=jnp.float32)
               + lin_b_ref[...] + x)

    # FeedForward (matches torch): src = norm1(out_att);
    # out_mlp = (src + linear2(gelu(linear1(src)))) + out_att   (double residual is in the spec)
    src = _layer_norm(out_att, f_ln_g_ref[...], f_ln_b_ref[...], ln_eps)
    h1 = _gelu_exact(jnp.dot(src, f_w1_ref[...], preferred_element_type=jnp.float32)
                     + f_b1_ref[...])
    src2 = jnp.dot(h1, f_w2_ref[...], preferred_element_type=jnp.float32) + f_b2_ref[...]
    o_ref[0] = src + src2 + out_att


def _final_kernel(x_ref, g_ref, b_ref, o_ref, *, eps):
    # Final LayerNorm (eps=1e-6 per ST_AttnPT) fused with the mean over the T*V sequence.
    xn = _layer_norm(x_ref[0], g_ref[...], b_ref[...], eps)   # (L, d)
    o_ref[0] = jnp.mean(xn, axis=0, keepdims=True)            # (1, d)


# ------------------------------ kernel wrappers ------------------------------

def _const_spec(a):
    """Full-array block replicated at every grid step (weights / masks)."""
    nd = a.ndim

    def imap(i):
        return (0,) * nd

    return pl.BlockSpec(a.shape, imap)


def embed_with_pos(x, w, b, pos):
    B, L, C = x.shape
    d = w.shape[1]
    return pl.pallas_call(
        _embed_kernel,
        out_shape=jax.ShapeDtypeStruct((B, L, d), jnp.float32),
        grid=(B,),
        in_specs=[pl.BlockSpec((1, L, C), lambda i: (i, 0, 0)),
                  _const_spec(w), _const_spec(b), _const_spec(pos)],
        out_specs=pl.BlockSpec((1, L, d), lambda i: (i, 0, 0)),
        compiler_params=pltpu.CompilerParams(dimension_semantics=("parallel",)),
    )(x, w, b, pos)


def _split_qkv(w, heads):
    """(d, 3d) transposed torch qkv weight -> (3, heads, d, head_dim) per-head slabs."""
    d = w.shape[0]
    hd = d // heads
    return w.reshape(d, 3, heads, hd).transpose(1, 2, 0, 3)


def transformer_layer(x, p, sp_bias, tm_bias, heads):
    B, L, d = x.shape
    ps, pt = p["attn_space"], p["attn_time"]
    consts = [
        sp_bias, tm_bias,
        ps["ln_g"], ps["ln_b"], _split_qkv(ps["qkv_w"], heads), ps["proj_w"], ps["proj_b"],
        pt["ln_g"], pt["ln_b"], _split_qkv(pt["qkv_w"], heads), pt["proj_w"], pt["proj_b"],
        p["lin_w"], p["lin_b"],
        p["ffn_ln_g"], p["ffn_ln_b"], p["ffn_w1"], p["ffn_b1"], p["ffn_w2"], p["ffn_b2"],
    ]
    in_specs = [pl.BlockSpec((1, L, d), lambda i: (i, 0, 0))]
    in_specs += [_const_spec(a) for a in consts]
    return pl.pallas_call(
        functools.partial(_encoder_layer_kernel, heads=heads, ln_eps=1e-5),
        out_shape=jax.ShapeDtypeStruct((B, L, d), jnp.float32),
        grid=(B,),
        in_specs=in_specs,
        out_specs=pl.BlockSpec((1, L, d), lambda i: (i, 0, 0)),
        compiler_params=pltpu.CompilerParams(dimension_semantics=("parallel",)),
    )(x, *consts)


def final_norm_mean(x, g, b, eps):
    B, L, d = x.shape
    out = pl.pallas_call(
        functools.partial(_final_kernel, eps=eps),
        out_shape=jax.ShapeDtypeStruct((B, 1, d), jnp.float32),
        grid=(B,),
        in_specs=[pl.BlockSpec((1, L, d), lambda i: (i, 0, 0)),
                  _const_spec(g), _const_spec(b)],
        out_specs=pl.BlockSpec((1, 1, d), lambda i: (i, 0, 0)),
        compiler_params=pltpu.CompilerParams(dimension_semantics=("parallel",)),
    )(x, g, b)
    return out[:, 0, :]


# ------------------------------ model forward -------------------------------

def _group_bias_masks(T, V):
    """Additive (L, L) biases implementing grouped space/time attention.

    Row order after the ST_AttnPT flatten is (t, n): row = t*V + n.
    space attention: attend within same t;  time attention: attend within same n.
    """
    idx = jnp.arange(T * V, dtype=jnp.int32)
    t = idx // V
    v = idx % V
    neg = jnp.float32(-1e30)
    sp = jnp.where(t[:, None] == t[None, :], jnp.float32(0.0), neg).astype(jnp.float32)
    tm = jnp.where(v[:, None] == v[None, :], jnp.float32(0.0), neg).astype(jnp.float32)
    return sp, tm


def st_attnpt_forward(x, params, cfg):
    N, M, T, V, C = x.shape
    d = cfg["dim"]
    # Replicates torch: permute(0,1,3,4,2) -> view -> permute(0,1,4,3,2) -> view(N*M, T*V, C)
    x = jnp.transpose(x, (0, 1, 3, 4, 2))             # (N, M, V, C, T)
    x = jnp.transpose(x, (0, 1, 4, 3, 2))             # (N, M, T, C, V)
    x = x.reshape(N * M, T * V, C)                    # same row-major view as torch

    x = embed_with_pos(x, params["embed_w"], params["embed_b"], params["pos"])

    sp_bias, tm_bias = _group_bias_masks(T, V)
    heads = cfg["num_heads"] // 2                     # heads per space/time branch
    for p in params["layers"]:
        x = transformer_layer(x, p, sp_bias, tm_bias, heads)

    # x.view(N, M, T, V, -1).mean([2, 3]) == mean over the full T*V sequence after final LN.
    x = final_norm_mean(x, params["norm_g"], params["norm_b"], eps=1e-6)
    return x.reshape(N, M, d)


# ------------------------------ parameter init -------------------------------

def _xavier_uniform(key, shape):
    fan_in, fan_out = shape
    limit = math.sqrt(6.0 / (fan_in + fan_out))
    return jax.random.uniform(key, shape, jnp.float32, -limit, limit)


def init_params(key, cfg):
    C, d = cfg["in_channels"], cfg["dim"]
    ffn, depth, L = cfg["ffn_dim"], cfg["depth"], cfg["num_patches"]
    keys = jax.random.split(key, 2 + depth)

    def attn_params(kk):
        k0, k1 = jax.random.split(kk, 2)
        return {
            "ln_g": jnp.ones((1, d), jnp.float32),
            "ln_b": jnp.zeros((1, d), jnp.float32),
            "qkv_w": _xavier_uniform(k0, (d, 3 * d)),          # bias=False in torch
            "proj_w": _xavier_uniform(k1, (d, d)),
            "proj_b": jnp.zeros((1, d), jnp.float32),
        }

    layers = []
    for li in range(depth):
        k = jax.random.split(keys[2 + li], 5)
        layers.append({
            "attn_space": attn_params(k[0]),
            "attn_time": attn_params(k[1]),
            "lin_w": _xavier_uniform(k[2], (2 * d, d)),
            "lin_b": jnp.zeros((1, d), jnp.float32),
            "ffn_ln_g": jnp.ones((1, d), jnp.float32),
            "ffn_ln_b": jnp.zeros((1, d), jnp.float32),
            "ffn_w1": _xavier_uniform(k[3], (d, ffn)),
            "ffn_b1": jnp.zeros((1, ffn), jnp.float32),
            "ffn_w2": _xavier_uniform(k[4], (ffn, d)),
            "ffn_b2": jnp.zeros((1, d), jnp.float32),
        })

    return {
        "embed_w": _xavier_uniform(keys[0], (C, d)),
        "embed_b": jnp.zeros((1, d), jnp.float32),
        "pos": 0.02 * jax.random.normal(keys[1], (L, d), jnp.float32),
        "norm_g": jnp.ones((1, d), jnp.float32),
        "norm_b": jnp.zeros((1, d), jnp.float32),
        "layers": layers,
    }


# ------------------------------------ main -----------------------------------

if __name__ == "__main__":
    # Small config consistent with ST_AttnPT.__init__ conventions.
    cfg = dict(in_channels=8, hidden_dim=8, num_heads=4, depth=2, mlp_ratio=2,
               num_space=8, num_time=8)
    cfg["dim"] = cfg["hidden_dim"] * cfg["num_heads"]      # 32
    cfg["ffn_dim"] = cfg["dim"] * cfg["mlp_ratio"]         # 64
    cfg["num_patches"] = cfg["num_time"] * cfg["num_space"]

    key = jax.random.PRNGKey(0)
    kx, kp = jax.random.split(key)
    N, M, T, V, C = 2, 1, cfg["num_time"], cfg["num_space"], cfg["in_channels"]
    x = jax.random.normal(kx, (N, M, T, V, C), jnp.float32)
    params = init_params(kp, cfg)

    fwd = jax.jit(functools.partial(st_attnpt_forward, cfg=cfg))
    out = fwd(x, params)
    out = jax.block_until_ready(out)

    assert out.shape == (N, M, cfg["dim"]), out.shape
    assert bool(jnp.all(jnp.isfinite(out)))
    print("KERNEL_OK")
</pallas_src>

<mosaic_0001>
module attributes {stable_mosaic.version = 11 : i64} {
  func.func @_embed_kernel(%arg0: i32, %arg1: memref<1x64x8xf32, #tpu.memory_space<vmem>>, %arg2: memref<8x32xf32, #tpu.memory_space<vmem>>, %arg3: memref<1x32xf32, #tpu.memory_space<vmem>>, %arg4: memref<64x32xf32, #tpu.memory_space<vmem>>, %arg5: memref<1x64x32xf32, #tpu.memory_space<vmem>>) attributes {dimension_semantics = [#tpu.dimension_semantics<parallel>], iteration_bounds = array<i64: 2>, scalar_prefetch = 0 : i64, scratch_operands = 0 : i64, tpu.core_type = #tpu.core_type<tc>, window_params = [{transform_indices = @transform_0, window_bounds = array<i64: 1, 64, 8>}, {pipeline_mode = #tpu.pipeline_mode<synchronous>, transform_indices = @transform_1, window_bounds = array<i64: 8, 32>}, {pipeline_mode = #tpu.pipeline_mode<synchronous>, transform_indices = @transform_2, window_bounds = array<i64: 1, 32>}, {pipeline_mode = #tpu.pipeline_mode<synchronous>, transform_indices = @transform_3, window_bounds = array<i64: 64, 32>}, {transform_indices = @transform_4, window_bounds = array<i64: 1, 64, 32>}]} {
    %c0 = arith.constant 0 : index
    %c0_0 = arith.constant 0 : index
    %c0_1 = arith.constant 0 : index
    %0 = vector.load %arg1[%c0, %c0_0, %c0_1] : memref<1x64x8xf32, #tpu.memory_space<vmem>>, vector<1x64x8xf32>
    %1 = vector.shape_cast %0 : vector<1x64x8xf32> to vector<64x8xf32>
    %c0_2 = arith.constant 0 : index
    %c0_3 = arith.constant 0 : index
    %2 = vector.load %arg2[%c0_2, %c0_3] : memref<8x32xf32, #tpu.memory_space<vmem>>, vector<8x32xf32>
    %cst = arith.constant dense<0.000000e+00> : vector<64x32xf32>
    %3 = tpu.matmul %1, %2, %cst {dimension_numbers = #tpu.dot_dimension_numbers<[1], [0], [0], [1], [0, 0, 1, 1], [], []>} : vector<64x8xf32>, vector<8x32xf32>, vector<64x32xf32> -> vector<64x32xf32>
    %c0_4 = arith.constant 0 : index
    %c0_5 = arith.constant 0 : index
    %4 = vector.load %arg3[%c0_4, %c0_5] : memref<1x32xf32, #tpu.memory_space<vmem>>, vector<1x32xf32>
    %5 = vector.broadcast %4 : vector<1x32xf32> to vector<64x32xf32>
    %6 = arith.addf %3, %5 : vector<64x32xf32>
    %c0_6 = arith.constant 0 : index
    %c0_7 = arith.constant 0 : index
    %7 = vector.load %arg4[%c0_6, %c0_7] : memref<64x32xf32, #tpu.memory_space<vmem>>, vector<64x32xf32>
    %8 = arith.addf %6, %7 : vector<64x32xf32>
    %c0_8 = arith.constant 0 : index
    %c0_9 = arith.constant 0 : index
    %c0_10 = arith.constant 0 : index
    %9 = vector.load %arg5[%c0_8, %c0_9, %c0_10] : memref<1x64x32xf32, #tpu.memory_space<vmem>>, vector<1x64x32xf32>
    %10 = vector.shape_cast %9 : vector<1x64x32xf32> to vector<64x32xf32>
    %11 = vector.shape_cast %8 : vector<64x32xf32> to vector<1x64x32xf32>
    tpu.vector_store %arg5[%c0_8, %c0_9, %c0_10], %11 {strides = array<i32>} : memref<1x64x32xf32, #tpu.memory_space<vmem>>, vector<1x64x32xf32>,
    return
  }
  func.func @transform_0(%arg0: i32) -> (i32, i32, i32) {
    %c0_i32 = arith.constant 0 : i32
    %c0_i32_0 = arith.constant 0 : i32
    %c0_i32_1 = arith.constant 0 : i32
    return %arg0, %c0_i32, %c0_i32_0 : i32, i32, i32
  }
  func.func @transform_1(%arg0: i32) -> (i32, i32) {
    %c0_i32 = arith.constant 0 : i32
    %c0_i32_0 = arith.constant 0 : i32
    %c0_i32_1 = arith.constant 0 : i32
    return %c0_i32, %c0_i32_0 : i32, i32
  }
  func.func @transform_2(%arg0: i32) -> (i32, i32) {
    %c0_i32 = arith.constant 0 : i32
    %c0_i32_0 = arith.constant 0 : i32
    %c0_i32_1 = arith.constant 0 : i32
    return %c0_i32, %c0_i32_0 : i32, i32
  }
  func.func @transform_3(%arg0: i32) -> (i32, i32) {
    %c0_i32 = arith.constant 0 : i32
    %c0_i32_0 = arith.constant 0 : i32
    %c0_i32_1 = arith.constant 0 : i32
    return %c0_i32, %c0_i32_0 : i32, i32
  }
  func.func @transform_4(%arg0: i32) -> (i32, i32, i32) {
    %c0_i32 = arith.constant 0 : i32
    %c0_i32_0 = arith.constant 0 : i32
    %c0_i32_1 = arith.constant 0 : i32
    return %arg0, %c0_i32, %c0_i32_0 : i32, i32, i32
  }
}

module attributes {stable_mosaic.version = 11 : i64} {
  func.func @_final_kernel(%arg0: i32, %arg1: memref<1x64x32xf32, #tpu.memory_space<vmem>>, %arg2: memref<1x32xf32, #tpu.memory_space<vmem>>, %arg3: memref<1x32xf32, #tpu.memory_space<vmem>>, %arg4: memref<1x1x32xf32, #tpu.memory_space<vmem>>) attributes {dimension_semantics = [#tpu.dimension_semantics<parallel>], iteration_bounds = array<i64: 2>, scalar_prefetch = 0 : i64, scratch_operands = 0 : i64, tpu.core_type = #tpu.core_type<tc>, window_params = [{transform_indices = @transform_0, window_bounds = array<i64: 1, 64, 32>}, {pipeline_mode = #tpu.pipeline_mode<synchronous>, transform_indices = @transform_1, window_bounds = array<i64: 1, 32>}, {pipeline_mode = #tpu.pipeline_mode<synchronous>, transform_indices = @transform_2, window_bounds = array<i64: 1, 32>}, {transform_indices = @transform_3, window_bounds = array<i64: 1, 1, 32>}]} {
    %c0 = arith.constant 0 : index
    %c0_0 = arith.constant 0 : index
    %c0_1 = arith.constant 0 : index
    %0 = vector.load %arg1[%c0, %c0_0, %c0_1] : memref<1x64x32xf32, #tpu.memory_space<vmem>>, vector<1x64x32xf32>
    %1 = vector.shape_cast %0 : vector<1x64x32xf32> to vector<64x32xf32>
    %c0_2 = arith.constant 0 : index
    %c0_3 = arith.constant 0 : index
    %2 = vector.load %arg2[%c0_2, %c0_3] : memref<1x32xf32, #tpu.memory_space<vmem>>, vector<1x32xf32>
    %c0_4 = arith.constant 0 : index
    %c0_5 = arith.constant 0 : index
    %3 = vector.load %arg3[%c0_4, %c0_5] : memref<1x32xf32, #tpu.memory_space<vmem>>, vector<1x32xf32>
    %cst = arith.constant dense<0.000000e+00> : vector<64xf32>
    %4 = vector.multi_reduction <add>, %1, %cst [1] : vector<64x32xf32> to vector<64xf32>
    %5 = vector.shape_cast %4 : vector<64xf32> to vector<64x1xf32>
    %cst_6 = arith.constant 3.200000e+01 : f32
    %6 = vector.broadcast %cst_6 : f32 to vector<64x1xf32>
    %7 = arith.divf %5, %6 : vector<64x1xf32>
    %8 = vector.broadcast %7 : vector<64x1xf32> to vector<64x32xf32>
    %9 = arith.subf %1, %8 : vector<64x32xf32>
    %10 = arith.mulf %9, %9 : vector<64x32xf32>
    %cst_7 = arith.constant dense<0.000000e+00> : vector<64xf32>
    %11 = vector.multi_reduction <add>, %10, %cst_7 [1] : vector<64x32xf32> to vector<64xf32>
    %12 = vector.shape_cast %11 : vector<64xf32> to vector<64x1xf32>
    %cst_8 = arith.constant 3.200000e+01 : f32
    %13 = vector.broadcast %cst_8 : f32 to vector<64x1xf32>
    %14 = arith.divf %12, %13 : vector<64x1xf32>
    %cst_9 = arith.constant 9.99999997E-7 : f32
    %15 = vector.broadcast %cst_9 : f32 to vector<64x1xf32>
    %16 = arith.addf %14, %15 : vector<64x1xf32>
    %17 = math.rsqrt %16 : vector<64x1xf32>
    %18 = vector.broadcast %17 : vector<64x1xf32> to vector<64x32xf32>
    %19 = arith.mulf %9, %18 : vector<64x32xf32>
    %20 = vector.broadcast %2 : vector<1x32xf32> to vector<64x32xf32>
    %21 = arith.mulf %19, %20 : vector<64x32xf32>
    %22 = vector.broadcast %3 : vector<1x32xf32> to vector<64x32xf32>
    %23 = arith.addf %21, %22 : vector<64x32xf32>
    %cst_10 = arith.constant dense<0.000000e+00> : vector<32xf32>
    %24 = vector.multi_reduction <add>, %23, %cst_10 [0] : vector<64x32xf32> to vector<32xf32>
    %25 = vector.shape_cast %24 : vector<32xf32> to vector<1x32xf32>
    %cst_11 = arith.constant 6.400000e+01 : f32
    %26 = vector.broadcast %cst_11 : f32 to vector<1x32xf32>
    %27 = arith.divf %25, %26 : vector<1x32xf32>
    %c0_12 = arith.constant 0 : index
    %c0_13 = arith.constant 0 : index
    %c0_14 = arith.constant 0 : index
    %28 = vector.load %arg4[%c0_12, %c0_13, %c0_14] : memref<1x1x32xf32, #tpu.memory_space<vmem>>, vector<1x1x32xf32>
    %29 = vector.shape_cast %28 : vector<1x1x32xf32> to vector<1x32xf32>
    %30 = vector.shape_cast %27 : vector<1x32xf32> to vector<1x1x32xf32>
    tpu.vector_store %arg4[%c0_12, %c0_13, %c0_14], %30 {strides = array<i32>} : memref<1x1x32xf32, #tpu.memory_space<vmem>>, vector<1x1x32xf32>,
    return
  }
  func.func @transform_0(%arg0: i32) -> (i32, i32, i32) {
    %c0_i32 = arith.constant 0 : i32
    %c0_i32_0 = arith.constant 0 : i32
    %c0_i32_1 = arith.constant 0 : i32
    return %arg0, %c0_i32, %c0_i32_0 : i32, i32, i32
  }
  func.func @transform_1(%arg0: i32) -> (i32, i32) {
    %c0_i32 = arith.constant 0 : i32
    %c0_i32_0 = arith.constant 0 : i32
    %c0_i32_1 = arith.constant 0 : i32
    return %c0_i32, %c0_i32_0 : i32, i32
  }
  func.func @transform_2(%arg0: i32) -> (i32, i32) {
    %c0_i32 = arith.constant 0 : i32
    %c0_i32_0 = arith.constant 0 : i32
    %c0_i32_1 = arith.constant 0 : i32
    return %c0_i32, %c0_i32_0 : i32, i32
  }
  func.func @transform_3(%arg0: i32) -> (i32, i32, i32) {
    %c0_i32 = arith.constant 0 : i32
    %c0_i32_0 = arith.constant 0 : i32
    %c0_i32_1 = arith.constant 0 : i32
    return %arg0, %c0_i32, %c0_i32_0 : i32, i32, i32
  }
}

module attributes {stable_mosaic.version = 11 : i64} {
  func.func @_encoder_layer_kernel(%arg0: i32, %arg1: memref<1x64x32xf32, #tpu.memory_space<vmem>>, %arg2: memref<64x64xf32, #tpu.memory_space<vmem>>, %arg3: memref<64x64xf32, #tpu.memory_space<vmem>>, %arg4: memref<1x32xf32, #tpu.memory_space<vmem>>, %arg5: memref<1x32xf32, #tpu.memory_space<vmem>>, %arg6: memref<3x2x32x16xf32, #tpu.memory_space<vmem>>, %arg7: memref<32x32xf32, #tpu.memory_space<vmem>>, %arg8: memref<1x32xf32, #tpu.memory_space<vmem>>, %arg9: memref<1x32xf32, #tpu.memory_space<vmem>>, %arg10: memref<1x32xf32, #tpu.memory_space<vmem>>, %arg11: memref<3x2x32x16xf32, #tpu.memory_space<vmem>>, %arg12: memref<32x32xf32, #tpu.memory_space<vmem>>, %arg13: memref<1x32xf32, #tpu.memory_space<vmem>>, %arg14: memref<64x32xf32, #tpu.memory_space<vmem>>, %arg15: memref<1x32xf32, #tpu.memory_space<vmem>>, %arg16: memref<1x32xf32, #tpu.memory_space<vmem>>, %arg17: memref<1x32xf32, #tpu.memory_space<vmem>>, %arg18: memref<32x64xf32, #tpu.memory_space<vmem>>, %arg19: memref<1x64xf32, #tpu.memory_space<vmem>>, %arg20: memref<64x32xf32, #tpu.memory_space<vmem>>, %arg21: memref<1x32xf32, #tpu.memory_space<vmem>>, %arg22: memref<1x64x32xf32, #tpu.memory_space<vmem>>) attributes {dimension_semantics = [#tpu.dimension_semantics<parallel>], iteration_bounds = array<i64: 2>, scalar_prefetch = 0 : i64, scratch_operands = 0 : i64, tpu.core_type = #tpu.core_type<tc>, window_params = [{transform_indices = @transform_0, window_bounds = array<i64: 1, 64, 32>}, {pipeline_mode = #tpu.pipeline_mode<synchronous>, transform_indices = @transform_1, window_bounds = array<i64: 64, 64>}, {pipeline_mode = #tpu.pipeline_mode<synchronous>, transform_indices = @transform_2, window_bounds = array<i64: 64, 64>}, {pipeline_mode = #tpu.pipeline_mode<synchronous>, transform_indices = @transform_3, window_bounds = array<i64: 1, 32>}, {pipeline_mode = #tpu.pipeline_mode<synchronous>, transform_indices = @transform_4, window_bounds = array<i64: 1, 32>}, {pipeline_mode = #tpu.pipeline_mode<synchronous>, transform_indices = @transform_5, window_bounds = array<i64: 3, 2, 32, 16>}, {pipeline_mode = #tpu.pipeline_mode<synchronous>, transform_indices = @transform_6, window_bounds = array<i64: 32, 32>}, {pipeline_mode = #tpu.pipeline_mode<synchronous>, transform_indices = @transform_7, window_bounds = array<i64: 1, 32>}, {pipeline_mode = #tpu.pipeline_mode<synchronous>, transform_indices = @transform_8, window_bounds = array<i64: 1, 32>}, {pipeline_mode = #tpu.pipeline_mode<synchronous>, transform_indices = @transform_9, window_bounds = array<i64: 1, 32>}, {pipeline_mode = #tpu.pipeline_mode<synchronous>, transform_indices = @transform_10, window_bounds = array<i64: 3, 2, 32, 16>}, {pipeline_mode = #tpu.pipeline_mode<synchronous>, transform_indices = @transform_11, window_bounds = array<i64: 32, 32>}, {pipeline_mode = #tpu.pipeline_mode<synchronous>, transform_indices = @transform_12, window_bounds = array<i64: 1, 32>}, {pipeline_mode = #tpu.pipeline_mode<synchronous>, transform_indices = @transform_13, window_bounds = array<i64: 64, 32>}, {pipeline_mode = #tpu.pipeline_mode<synchronous>, transform_indices = @transform_14, window_bounds = array<i64: 1, 32>}, {pipeline_mode = #tpu.pipeline_mode<synchronous>, transform_indices = @transform_15, window_bounds = array<i64: 1, 32>}, {pipeline_mode = #tpu.pipeline_mode<synchronous>, transform_indices = @transform_16, window_bounds = array<i64: 1, 32>}, {pipeline_mode = #tpu.pipeline_mode<synchronous>, transform_indices = @transform_17, window_bounds = array<i64: 32, 64>}, {pipeline_mode = #tpu.pipeline_mode<synchronous>, transform_indices = @transform_18, window_bounds = array<i64: 1, 64>}, {pipeline_mode = #tpu.pipeline_mode<synchronous>, transform_indices = @transform_19, window_bounds = array<i64: 64, 32>}, {pipeline_mode = #tpu.pipeline_mode<synchronous>, transform_indices = @transform_20, window_bounds = array<i64: 1, 32>}, {transform_indices = @transform_21, window_bounds = array<i64: 1, 64, 32>}]} {
    %c0 = arith.constant 0 : index
    %c0_0 = arith.constant 0 : index
    %c0_1 = arith.constant 0 : index
    %0 = vector.load %arg1[%c0, %c0_0, %c0_1] : memref<1x64x32xf32, #tpu.memory_space<vmem>>, vector<1x64x32xf32>
    %1 = vector.shape_cast %0 : vector<1x64x32xf32> to vector<64x32xf32>
    %c0_2 = arith.constant 0 : index
    %c0_3 = arith.constant 0 : index
    %2 = vector.load %arg4[%c0_2, %c0_3] : memref<1x32xf32, #tpu.memory_space<vmem>>, vector<1x32xf32>
    %c0_4 = arith.constant 0 : index
    %c0_5 = arith.constant 0 : index
    %3 = vector.load %arg5[%c0_4, %c0_5] : memref<1x32xf32, #tpu.memory_space<vmem>>, vector<1x32xf32>
    %c0_6 = arith.constant 0 : index
    %c0_7 = arith.constant 0 : index
    %4 = vector.load %arg7[%c0_6, %c0_7] : memref<32x32xf32, #tpu.memory_space<vmem>>, vector<32x32xf32>
    %c0_8 = arith.constant 0 : index
    %c0_9 = arith.constant 0 : index
    %5 = vector.load %arg8[%c0_8, %c0_9] : memref<1x32xf32, #tpu.memory_space<vmem>>, vector<1x32xf32>
    %c0_10 = arith.constant 0 : index
    %c0_11 = arith.constant 0 : index
    %6 = vector.load %arg2[%c0_10, %c0_11] : memref<64x64xf32, #tpu.memory_space<vmem>>, vector<64x64xf32>
    %cst = arith.constant dense<0.000000e+00> : vector<64xf32>
    %7 = vector.multi_reduction <add>, %1, %cst [1] : vector<64x32xf32> to vector<64xf32>
    %8 = vector.shape_cast %7 : vector<64xf32> to vector<64x1xf32>
    %cst_12 = arith.constant 3.200000e+01 : f32
    %9 = vector.broadcast %cst_12 : f32 to vector<64x1xf32>
    %10 = arith.divf %8, %9 : vector<64x1xf32>
    %11 = vector.broadcast %10 : vector<64x1xf32> to vector<64x32xf32>
    %12 = arith.subf %1, %11 : vector<64x32xf32>
    %13 = arith.mulf %12, %12 : vector<64x32xf32>
    %cst_13 = arith.constant dense<0.000000e+00> : vector<64xf32>
    %14 = vector.multi_reduction <add>, %13, %cst_13 [1] : vector<64x32xf32> to vector<64xf32>
    %15 = vector.shape_cast %14 : vector<64xf32> to vector<64x1xf32>
    %cst_14 = arith.constant 3.200000e+01 : f32
    %16 = vector.broadcast %cst_14 : f32 to vector<64x1xf32>
    %17 = arith.divf %15, %16 : vector<64x1xf32>
    %cst_15 = arith.constant 9.99999974E-6 : f32
    %18 = vector.broadcast %cst_15 : f32 to vector<64x1xf32>
    %19 = arith.addf %17, %18 : vector<64x1xf32>
    %20 = math.rsqrt %19 : vector<64x1xf32>
    %21 = vector.broadcast %20 : vector<64x1xf32> to vector<64x32xf32>
    %22 = arith.mulf %12, %21 : vector<64x32xf32>
    %23 = vector.broadcast %2 : vector<1x32xf32> to vector<64x32xf32>
    %24 = arith.mulf %22, %23 : vector<64x32xf32>
    %25 = vector.broadcast %3 : vector<1x32xf32> to vector<64x32xf32>
    %26 = arith.addf %24, %25 : vector<64x32xf32>
    %c0_16 = arith.constant 0 : index
    %c0_17 = arith.constant 0 : index
    %c0_18 = arith.constant 0 : index
    %c0_19 = arith.constant 0 : index
    %27 = vector.load %arg6[%c0_16, %c0_17, %c0_18, %c0_19] : memref<3x2x32x16xf32, #tpu.memory_space<vmem>>, vector<1x1x32x16xf32>
    %28 = vector.shape_cast %27 : vector<1x1x32x16xf32> to vector<32x16xf32>
    %cst_20 = arith.constant dense<0.000000e+00> : vector<64x16xf32>
    %29 = tpu.matmul %26, %28, %cst_20 {dimension_numbers = #tpu.dot_dimension_numbers<[1], [0], [0], [1], [0, 0, 1, 1], [], []>} : vector<64x32xf32>, vector<32x16xf32>, vector<64x16xf32> -> vector<64x16xf32>
    %cst_21 = arith.constant 2.500000e-01 : f32
    %30 = vector.broadcast %cst_21 : f32 to vector<64x16xf32>
    %31 = arith.mulf %29, %30 : vector<64x16xf32>
    %c1 = arith.constant 1 : index
    %c0_22 = arith.constant 0 : index
    %c0_23 = arith.constant 0 : index
    %c0_24 = arith.constant 0 : index
    %32 = vector.load %arg6[%c1, %c0_22, %c0_23, %c0_24] : memref<3x2x32x16xf32, #tpu.memory_space<vmem>>, vector<1x1x32x16xf32>
    %33 = vector.shape_cast %32 : vector<1x1x32x16xf32> to vector<32x16xf32>
    %cst_25 = arith.constant dense<0.000000e+00> : vector<64x16xf32>
    %34 = tpu.matmul %26, %33, %cst_25 {dimension_numbers = #tpu.dot_dimension_numbers<[1], [0], [0], [1], [0, 0, 1, 1], [], []>} : vector<64x32xf32>, vector<32x16xf32>, vector<64x16xf32> -> vector<64x16xf32>
    %c2 = arith.constant 2 : index
    %c0_26 = arith.constant 0 : index
    %c0_27 = arith.constant 0 : index
    %c0_28 = arith.constant 0 : index
    %35 = vector.load %arg6[%c2, %c0_26, %c0_27, %c0_28] : memref<3x2x32x16xf32, #tpu.memory_space<vmem>>, vector<1x1x32x16xf32>
    %36 = vector.shape_cast %35 : vector<1x1x32x16xf32> to vector<32x16xf32>
    %cst_29 = arith.constant dense<0.000000e+00> : vector<64x16xf32>
    %37 = tpu.matmul %26, %36, %cst_29 {dimension_numbers = #tpu.dot_dimension_numbers<[1], [0], [0], [1], [0, 0, 1, 1], [], []>} : vector<64x32xf32>, vector<32x16xf32>, vector<64x16xf32> -> vector<64x16xf32>
    %cst_30 = arith.constant dense<0.000000e+00> : vector<64x64xf32>
    %38 = tpu.matmul %31, %34, %cst_30 {dimension_numbers = #tpu.dot_dimension_numbers<[1], [1], [0], [0], [0, 0, 1, 0], [], []>} : vector<64x16xf32>, vector<64x16xf32>, vector<64x64xf32> -> vector<64x64xf32>
    %39 = arith.addf %38, %6 : vector<64x64xf32>
    %cst_31 = arith.constant dense<0xFF800000> : vector<64xf32>
    %40 = vector.multi_reduction <maximumf>, %39, %cst_31 [1] : vector<64x64xf32> to vector<64xf32>
    %41 = vector.shape_cast %40 : vector<64xf32> to vector<64x1xf32>
    %42 = vector.broadcast %41 : vector<64x1xf32> to vector<64x64xf32>
    %43 = arith.subf %39, %42 : vector<64x64xf32>
    %44 = math.exp %43 : vector<64x64xf32>
    %cst_32 = arith.constant dense<0.000000e+00> : vector<64xf32>
    %45 = vector.multi_reduction <add>, %44, %cst_32 [1] : vector<64x64xf32> to vector<64xf32>
    %46 = vector.shape_cast %45 : vector<64xf32> to vector<64x1xf32>
    %47 = tpu.reciprocal %46 {approx = true} : vector<64x1xf32> -> vector<64x1xf32>
    %48 = vector.broadcast %47 : vector<64x1xf32> to vector<64x64xf32>
    %49 = arith.mulf %44, %48 : vector<64x64xf32>
    %cst_33 = arith.constant dense<0.000000e+00> : vector<64x16xf32>
    %50 = tpu.matmul %49, %37, %cst_33 {dimension_numbers = #tpu.dot_dimension_numbers<[1], [0], [0], [1], [0, 0, 1, 1], [], []>} : vector<64x64xf32>, vector<64x16xf32>, vector<64x16xf32> -> vector<64x16xf32>
    %51 = vector.extract_strided_slice %4 {offsets = [0, 0], sizes = [16, 32], strides = [1, 1]} : vector<32x32xf32> to vector<16x32xf32>
    %cst_34 = arith.constant dense<0.000000e+00> : vector<64x32xf32>
    %52 = tpu.matmul %50, %51, %cst_34 {dimension_numbers = #tpu.dot_dimension_numbers<[1], [0], [0], [1], [0, 0, 1, 1], [], []>} : vector<64x16xf32>, vector<16x32xf32>, vector<64x32xf32> -> vector<64x32xf32>
    %c0_35 = arith.constant 0 : index
    %c1_36 = arith.constant 1 : index
    %c0_37 = arith.constant 0 : index
    %c0_38 = arith.constant 0 : index
    %53 = vector.load %arg6[%c0_35, %c1_36, %c0_37, %c0_38] : memref<3x2x32x16xf32, #tpu.memory_space<vmem>>, vector<1x1x32x16xf32>
    %54 = vector.shape_cast %53 : vector<1x1x32x16xf32> to vector<32x16xf32>
    %cst_39 = arith.constant dense<0.000000e+00> : vector<64x16xf32>
    %55 = tpu.matmul %26, %54, %cst_39 {dimension_numbers = #tpu.dot_dimension_numbers<[1], [0], [0], [1], [0, 0, 1, 1], [], []>} : vector<64x32xf32>, vector<32x16xf32>, vector<64x16xf32> -> vector<64x16xf32>
    %cst_40 = arith.constant 2.500000e-01 : f32
    %56 = vector.broadcast %cst_40 : f32 to vector<64x16xf32>
    %57 = arith.mulf %55, %56 : vector<64x16xf32>
    %c1_41 = arith.constant 1 : index
    %c1_42 = arith.constant 1 : index
    %c0_43 = arith.constant 0 : index
    %c0_44 = arith.constant 0 : index
    %58 = vector.load %arg6[%c1_41, %c1_42, %c0_43, %c0_44] : memref<3x2x32x16xf32, #tpu.memory_space<vmem>>, vector<1x1x32x16xf32>
    %59 = vector.shape_cast %58 : vector<1x1x32x16xf32> to vector<32x16xf32>
    %cst_45 = arith.constant dense<0.000000e+00> : vector<64x16xf32>
    %60 = tpu.matmul %26, %59, %cst_45 {dimension_numbers = #tpu.dot_dimension_numbers<[1], [0], [0], [1], [0, 0, 1, 1], [], []>} : vector<64x32xf32>, vector<32x16xf32>, vector<64x16xf32> -> vector<64x16xf32>
    %c2_46 = arith.constant 2 : index
    %c1_47 = arith.constant 1 : index
    %c0_48 = arith.constant 0 : index
    %c0_49 = arith.constant 0 : index
    %61 = vector.load %arg6[%c2_46, %c1_47, %c0_48, %c0_49] : memref<3x2x32x16xf32, #tpu.memory_space<vmem>>, vector<1x1x32x16xf32>
    %62 = vector.shape_cast %61 : vector<1x1x32x16xf32> to vector<32x16xf32>
    %cst_50 = arith.constant dense<0.000000e+00> : vector<64x16xf32>
    %63 = tpu.matmul %26, %62, %cst_50 {dimension_numbers = #tpu.dot_dimension_numbers<[1], [0], [0], [1], [0, 0, 1, 1], [], []>} : vector<64x32xf32>, vector<32x16xf32>, vector<64x16xf32> -> vector<64x16xf32>
    %cst_51 = arith.constant dense<0.000000e+00> : vector<64x64xf32>
    %64 = tpu.matmul %57, %60, %cst_51 {dimension_numbers = #tpu.dot_dimension_numbers<[1], [1], [0], [0], [0, 0, 1, 0], [], []>} : vector<64x16xf32>, vector<64x16xf32>, vector<64x64xf32> -> vector<64x64xf32>
    %65 = arith.addf %64, %6 : vector<64x64xf32>
    %cst_52 = arith.constant dense<0xFF800000> : vector<64xf32>
    %66 = vector.multi_reduction <maximumf>, %65, %cst_52 [1] : vector<64x64xf32> to vector<64xf32>
    %67 = vector.shape_cast %66 : vector<64xf32> to vector<64x1xf32>
    %68 = vector.broadcast %67 : vector<64x1xf32> to vector<64x64xf32>
    %69 = arith.subf %65, %68 : vector<64x64xf32>
    %70 = math.exp %69 : vector<64x64xf32>
    %cst_53 = arith.constant dense<0.000000e+00> : vector<64xf32>
    %71 = vector.multi_reduction <add>, %70, %cst_53 [1] : vector<64x64xf32> to vector<64xf32>
    %72 = vector.shape_cast %71 : vector<64xf32> to vector<64x1xf32>
    %73 = tpu.reciprocal %72 {approx = true} : vector<64x1xf32> -> vector<64x1xf32>
    %74 = vector.broadcast %73 : vector<64x1xf32> to vector<64x64xf32>
    %75 = arith.mulf %70, %74 : vector<64x64xf32>
    %cst_54 = arith.constant dense<0.000000e+00> : vector<64x16xf32>
    %76 = tpu.matmul %75, %63, %cst_54 {dimension_numbers = #tpu.dot_dimension_numbers<[1], [0], [0], [1], [0, 0, 1, 1], [], []>} : vector<64x64xf32>, vector<64x16xf32>, vector<64x16xf32> -> vector<64x16xf32>
    %77 = vector.extract_strided_slice %4 {offsets = [16, 0], sizes = [16, 32], strides = [1, 1]} : vector<32x32xf32> to vector<16x32xf32>
    %cst_55 = arith.constant dense<0.000000e+00> : vector<64x32xf32>
    %78 = tpu.matmul %76, %77, %cst_55 {dimension_numbers = #tpu.dot_dimension_numbers<[1], [0], [0], [1], [0, 0, 1, 1], [], []>} : vector<64x16xf32>, vector<16x32xf32>, vector<64x32xf32> -> vector<64x32xf32>
    %79 = arith.addf %52, %78 : vector<64x32xf32>
    %80 = vector.broadcast %5 : vector<1x32xf32> to vector<64x32xf32>
    %81 = arith.addf %79, %80 : vector<64x32xf32>
    %c0_56 = arith.constant 0 : index
    %c0_57 = arith.constant 0 : index
    %82 = vector.load %arg9[%c0_56, %c0_57] : memref<1x32xf32, #tpu.memory_space<vmem>>, vector<1x32xf32>
    %c0_58 = arith.constant 0 : index
    %c0_59 = arith.constant 0 : index
    %83 = vector.load %arg10[%c0_58, %c0_59] : memref<1x32xf32, #tpu.memory_space<vmem>>, vector<1x32xf32>
    %c0_60 = arith.constant 0 : index
    %c0_61 = arith.constant 0 : index
    %84 = vector.load %arg12[%c0_60, %c0_61] : memref<32x32xf32, #tpu.memory_space<vmem>>, vector<32x32xf32>
    %c0_62 = arith.constant 0 : index
    %c0_63 = arith.constant 0 : index
    %85 = vector.load %arg13[%c0_62, %c0_63] : memref<1x32xf32, #tpu.memory_space<vmem>>, vector<1x32xf32>
    %c0_64 = arith.constant 0 : index
    %c0_65 = arith.constant 0 : index
    %86 = vector.load %arg3[%c0_64, %c0_65] : memref<64x64xf32, #tpu.memory_space<vmem>>, vector<64x64xf32>
    %cst_66 = arith.constant dense<0.000000e+00> : vector<64xf32>
    %87 = vector.multi_reduction <add>, %1, %cst_66 [1] : vector<64x32xf32> to vector<64xf32>
    %88 = vector.shape_cast %87 : vector<64xf32> to vector<64x1xf32>
    %cst_67 = arith.constant 3.200000e+01 : f32
    %89 = vector.broadcast %cst_67 : f32 to vector<64x1xf32>
    %90 = arith.divf %88, %89 : vector<64x1xf32>
    %91 = vector.broadcast %90 : vector<64x1xf32> to vector<64x32xf32>
    %92 = arith.subf %1, %91 : vector<64x32xf32>
    %93 = arith.mulf %92, %92 : vector<64x32xf32>
    %cst_68 = arith.constant dense<0.000000e+00> : vector<64xf32>
    %94 = vector.multi_reduction <add>, %93, %cst_68 [1] : vector<64x32xf32> to vector<64xf32>
    %95 = vector.shape_cast %94 : vector<64xf32> to vector<64x1xf32>
    %cst_69 = arith.constant 3.200000e+01 : f32
    %96 = vector.broadcast %cst_69 : f32 to vector<64x1xf32>
    %97 = arith.divf %95, %96 : vector<64x1xf32>
    %cst_70 = arith.constant 9.99999974E-6 : f32
    %98 = vector.broadcast %cst_70 : f32 to vector<64x1xf32>
    %99 = arith.addf %97, %98 : vector<64x1xf32>
    %100 = math.rsqrt %99 : vector<64x1xf32>
    %101 = vector.broadcast %100 : vector<64x1xf32> to vector<64x32xf32>
    %102 = arith.mulf %92, %101 : vector<64x32xf32>
    %103 = vector.broadcast %82 : vector<1x32xf32> to vector<64x32xf32>
    %104 = arith.mulf %102, %103 : vector<64x32xf32>
    %105 = vector.broadcast %83 : vector<1x32xf32> to vector<64x32xf32>
    %106 = arith.addf %104, %105 : vector<64x32xf32>
    %c0_71 = arith.constant 0 : index
    %c0_72 = arith.constant 0 : index
    %c0_73 = arith.constant 0 : index
    %c0_74 = arith.constant 0 : index
    %107 = vector.load %arg11[%c0_71, %c0_72, %c0_73, %c0_74] : memref<3x2x32x16xf32, #tpu.memory_space<vmem>>, vector<1x1x32x16xf32>
    %108 = vector.shape_cast %107 : vector<1x1x32x16xf32> to vector<32x16xf32>
    %cst_75 = arith.constant dense<0.000000e+00> : vector<64x16xf32>
    %109 = tpu.matmul %106, %108, %cst_75 {dimension_numbers = #tpu.dot_dimension_numbers<[1], [0], [0], [1], [0, 0, 1, 1], [], []>} : vector<64x32xf32>, vector<32x16xf32>, vector<64x16xf32> -> vector<64x16xf32>
    %cst_76 = arith.constant 2.500000e-01 : f32
    %110 = vector.broadcast %cst_76 : f32 to vector<64x16xf32>
    %111 = arith.mulf %109, %110 : vector<64x16xf32>
    %c1_77 = arith.constant 1 : index
    %c0_78 = arith.constant 0 : index
    %c0_79 = arith.constant 0 : index
    %c0_80 = arith.constant 0 : index
    %112 = vector.load %arg11[%c1_77, %c0_78, %c0_79, %c0_80] : memref<3x2x32x16xf32, #tpu.memory_space<vmem>>, vector<1x1x32x16xf32>
    %113 = vector.shape_cast %112 : vector<1x1x32x16xf32> to vector<32x16xf32>
    %cst_81 = arith.constant dense<0.000000e+00> : vector<64x16xf32>
    %114 = tpu.matmul %106, %113, %cst_81 {dimension_numbers = #tpu.dot_dimension_numbers<[1], [0], [0], [1], [0, 0, 1, 1], [], []>} : vector<64x32xf32>, vector<32x16xf32>, vector<64x16xf32> -> vector<64x16xf32>
    %c2_82 = arith.constant 2 : index
    %c0_83 = arith.constant 0 : index
    %c0_84 = arith.constant 0 : index
    %c0_85 = arith.constant 0 : index
    %115 = vector.load %arg11[%c2_82, %c0_83, %c0_84, %c0_85] : memref<3x2x32x16xf32, #tpu.memory_space<vmem>>, vector<1x1x32x16xf32>
    %116 = vector.shape_cast %115 : vector<1x1x32x16xf32> to vector<32x16xf32>
    %cst_86 = arith.constant dense<0.000000e+00> : vector<64x16xf32>
    %117 = tpu.matmul %106, %116, %cst_86 {dimension_numbers = #tpu.dot_dimension_numbers<[1], [0], [0], [1], [0, 0, 1, 1], [], []>} : vector<64x32xf32>, vector<32x16xf32>, vector<64x16xf32> -> vector<64x16xf32>
    %cst_87 = arith.constant dense<0.000000e+00> : vector<64x64xf32>
    %118 = tpu.matmul %111, %114, %cst_87 {dimension_numbers = #tpu.dot_dimension_numbers<[1], [1], [0], [0], [0, 0, 1, 0], [], []>} : vector<64x16xf32>, vector<64x16xf32>, vector<64x64xf32> -> vector<64x64xf32>
    %119 = arith.addf %118, %86 : vector<64x64xf32>
    %cst_88 = arith.constant dense<0xFF800000> : vector<64xf32>
    %120 = vector.multi_reduction <maximumf>, %119, %cst_88 [1] : vector<64x64xf32> to vector<64xf32>
    %121 = vector.shape_cast %120 : vector<64xf32> to vector<64x1xf32>
    %122 = vector.broadcast %121 : vector<64x1xf32> to vector<64x64xf32>
    %123 = arith.subf %119, %122 : vector<64x64xf32>
    %124 = math.exp %123 : vector<64x64xf32>
    %cst_89 = arith.constant dense<0.000000e+00> : vector<64xf32>
    %125 = vector.multi_reduction <add>, %124, %cst_89 [1] : vector<64x64xf32> to vector<64xf32>
    %126 = vector.shape_cast %125 : vector<64xf32> to vector<64x1xf32>
    %127 = tpu.reciprocal %126 {approx = true} : vector<64x1xf32> -> vector<64x1xf32>
    %128 = vector.broadcast %127 : vector<64x1xf32> to vector<64x64xf32>
    %129 = arith.mulf %124, %128 : vector<64x64xf32>
    %cst_90 = arith.constant dense<0.000000e+00> : vector<64x16xf32>
    %130 = tpu.matmul %129, %117, %cst_90 {dimension_numbers = #tpu.dot_dimension_numbers<[1], [0], [0], [1], [0, 0, 1, 1], [], []>} : vector<64x64xf32>, vector<64x16xf32>, vector<64x16xf32> -> vector<64x16xf32>
    %131 = vector.extract_strided_slice %84 {offsets = [0, 0], sizes = [16, 32], strides = [1, 1]} : vector<32x32xf32> to vector<16x32xf32>
    %cst_91 = arith.constant dense<0.000000e+00> : vector<64x32xf32>
    %132 = tpu.matmul %130, %131, %cst_91 {dimension_numbers = #tpu.dot_dimension_numbers<[1], [0], [0], [1], [0, 0, 1, 1], [], []>} : vector<64x16xf32>, vector<16x32xf32>, vector<64x32xf32> -> vector<64x32xf32>
    %c0_92 = arith.constant 0 : index
    %c1_93 = arith.constant 1 : index
    %c0_94 = arith.constant 0 : index
    %c0_95 = arith.constant 0 : index
    %133 = vector.load %arg11[%c0_92, %c1_93, %c0_94, %c0_95] : memref<3x2x32x16xf32, #tpu.memory_space<vmem>>, vector<1x1x32x16xf32>
    %134 = vector.shape_cast %133 : vector<1x1x32x16xf32> to vector<32x16xf32>
    %cst_96 = arith.constant dense<0.000000e+00> : vector<64x16xf32>
    %135 = tpu.matmul %106, %134, %cst_96 {dimension_numbers = #tpu.dot_dimension_numbers<[1], [0], [0], [1], [0, 0, 1, 1], [], []>} : vector<64x32xf32>, vector<32x16xf32>, vector<64x16xf32> -> vector<64x16xf32>
    %cst_97 = arith.constant 2.500000e-01 : f32
    %136 = vector.broadcast %cst_97 : f32 to vector<64x16xf32>
    %137 = arith.mulf %135, %136 : vector<64x16xf32>
    %c1_98 = arith.constant 1 : index
    %c1_99 = arith.constant 1 : index
    %c0_100 = arith.constant 0 : index
    %c0_101 = arith.constant 0 : index
    %138 = vector.load %arg11[%c1_98, %c1_99, %c0_100, %c0_101] : memref<3x2x32x16xf32, #tpu.memory_space<vmem>>, vector<1x1x32x16xf32>
    %139 = vector.shape_cast %138 : vector<1x1x32x16xf32> to vector<32x16xf32>
    %cst_102 = arith.constant dense<0.000000e+00> : vector<64x16xf32>
    %140 = tpu.matmul %106, %139, %cst_102 {dimension_numbers = #tpu.dot_dimension_numbers<[1], [0], [0], [1], [0, 0, 1, 1], [], []>} : vector<64x32xf32>, vector<32x16xf32>, vector<64x16xf32> -> vector<64x16xf32>
    %c2_103 = arith.constant 2 : index
    %c1_104 = arith.constant 1 : index
    %c0_105 = arith.constant 0 : index
    %c0_106 = arith.constant 0 : index
    %141 = vector.load %arg11[%c2_103, %c1_104, %c0_105, %c0_106] : memref<3x2x32x16xf32, #tpu.memory_space<vmem>>, vector<1x1x32x16xf32>
    %142 = vector.shape_cast %141 : vector<1x1x32x16xf32> to vector<32x16xf32>
    %cst_107 = arith.constant dense<0.000000e+00> : vector<64x16xf32>
    %143 = tpu.matmul %106, %142, %cst_107 {dimension_numbers = #tpu.dot_dimension_numbers<[1], [0], [0], [1], [0, 0, 1, 1], [], []>} : vector<64x32xf32>, vector<32x16xf32>, vector<64x16xf32> -> vector<64x16xf32>
    %cst_108 = arith.constant dense<0.000000e+00> : vector<64x64xf32>
    %144 = tpu.matmul %137, %140, %cst_108 {dimension_numbers = #tpu.dot_dimension_numbers<[1], [1], [0], [0], [0, 0, 1, 0], [], []>} : vector<64x16xf32>, vector<64x16xf32>, vector<64x64xf32> -> vector<64x64xf32>
    %145 = arith.addf %144, %86 : vector<64x64xf32>
    %cst_109 = arith.constant dense<0xFF800000> : vector<64xf32>
    %146 = vector.multi_reduction <maximumf>, %145, %cst_109 [1] : vector<64x64xf32> to vector<64xf32>
    %147 = vector.shape_cast %146 : vector<64xf32> to vector<64x1xf32>
    %148 = vector.broadcast %147 : vector<64x1xf32> to vector<64x64xf32>
    %149 = arith.subf %145, %148 : vector<64x64xf32>
    %150 = math.exp %149 : vector<64x64xf32>
    %cst_110 = arith.constant dense<0.000000e+00> : vector<64xf32>
    %151 = vector.multi_reduction <add>, %150, %cst_110 [1] : vector<64x64xf32> to vector<64xf32>
    %152 = vector.shape_cast %151 : vector<64xf32> to vector<64x1xf32>
    %153 = tpu.reciprocal %152 {approx = true} : vector<64x1xf32> -> vector<64x1xf32>
    %154 = vector.broadcast %153 : vector<64x1xf32> to vector<64x64xf32>
    %155 = arith.mulf %150, %154 : vector<64x64xf32>
    %cst_111 = arith.constant dense<0.000000e+00> : vector<64x16xf32>
    %156 = tpu.matmul %155, %143, %cst_111 {dimension_numbers = #tpu.dot_dimension_numbers<[1], [0], [0], [1], [0, 0, 1, 1], [], []>} : vector<64x64xf32>, vector<64x16xf32>, vector<64x16xf32> -> vector<64x16xf32>
    %157 = vector.extract_strided_slice %84 {offsets = [16, 0], sizes = [16, 32], strides = [1, 1]} : vector<32x32xf32> to vector<16x32xf32>
    %cst_112 = arith.constant dense<0.000000e+00> : vector<64x32xf32>
    %158 = tpu.matmul %156, %157, %cst_112 {dimension_numbers = #tpu.dot_dimension_numbers<[1], [0], [0], [1], [0, 0, 1, 1], [], []>} : vector<64x16xf32>, vector<16x32xf32>, vector<64x32xf32> -> vector<64x32xf32>
    %159 = arith.addf %132, %158 : vector<64x32xf32>
    %160 = vector.broadcast %85 : vector<1x32xf32> to vector<64x32xf32>
    %161 = arith.addf %159, %160 : vector<64x32xf32>
    %c0_113 = arith.constant 0 : index
    %c0_114 = arith.constant 0 : index
    %162 = vector.load %arg14[%c0_113, %c0_114] : memref<64x32xf32, #tpu.memory_space<vmem>>, vector<64x32xf32>
    %163 = vector.extract_strided_slice %162 {offsets = [0, 0], sizes = [32, 32], strides = [1, 1]} : vector<64x32xf32> to vector<32x32xf32>
    %cst_115 = arith.constant dense<0.000000e+00> : vector<64x32xf32>
    %164 = tpu.matmul %81, %163, %cst_115 {dimension_numbers = #tpu.dot_dimension_numbers<[1], [0], [0], [1], [0, 0, 1, 1], [], []>} : vector<64x32xf32>, vector<32x32xf32>, vector<64x32xf32> -> vector<64x32xf32>
    %165 = vector.extract_strided_slice %162 {offsets = [32, 0], sizes = [32, 32], strides = [1, 1]} : vector<64x32xf32> to vector<32x32xf32>
    %cst_116 = arith.constant dense<0.000000e+00> : vector<64x32xf32>
    %166 = tpu.matmul %161, %165, %cst_116 {dimension_numbers = #tpu.dot_dimension_numbers<[1], [0], [0], [1], [0, 0, 1, 1], [], []>} : vector<64x32xf32>, vector<32x32xf32>, vector<64x32xf32> -> vector<64x32xf32>
    %167 = arith.addf %164, %166 : vector<64x32xf32>
    %c0_117 = arith.constant 0 : index
    %c0_118 = arith.constant 0 : index
    %168 = vector.load %arg15[%c0_117, %c0_118] : memref<1x32xf32, #tpu.memory_space<vmem>>, vector<1x32xf32>
    %169 = vector.broadcast %168 : vector<1x32xf32> to vector<64x32xf32>
    %170 = arith.addf %167, %169 : vector<64x32xf32>
    %171 = arith.addf %170, %1 : vector<64x32xf32>
    %c0_119 = arith.constant 0 : index
    %c0_120 = arith.constant 0 : index
    %172 = vector.load %arg16[%c0_119, %c0_120] : memref<1x32xf32, #tpu.memory_space<vmem>>, vector<1x32xf32>
    %c0_121 = arith.constant 0 : index
    %c0_122 = arith.constant 0 : index
    %173 = vector.load %arg17[%c0_121, %c0_122] : memref<1x32xf32, #tpu.memory_space<vmem>>, vector<1x32xf32>
    %cst_123 = arith.constant dense<0.000000e+00> : vector<64xf32>
    %174 = vector.multi_reduction <add>, %171, %cst_123 [1] : vector<64x32xf32> to vector<64xf32>
    %175 = vector.shape_cast %174 : vector<64xf32> to vector<64x1xf32>
    %cst_124 = arith.constant 3.200000e+01 : f32
    %176 = vector.broadcast %cst_124 : f32 to vector<64x1xf32>
    %177 = arith.divf %175, %176 : vector<64x1xf32>
    %178 = vector.broadcast %177 : vector<64x1xf32> to vector<64x32xf32>
    %179 = arith.subf %171, %178 : vector<64x32xf32>
    %180 = arith.mulf %179, %179 : vector<64x32xf32>
    %cst_125 = arith.constant dense<0.000000e+00> : vector<64xf32>
    %181 = vector.multi_reduction <add>, %180, %cst_125 [1] : vector<64x32xf32> to vector<64xf32>
    %182 = vector.shape_cast %181 : vector<64xf32> to vector<64x1xf32>
    %cst_126 = arith.constant 3.200000e+01 : f32
    %183 = vector.broadcast %cst_126 : f32 to vector<64x1xf32>
    %184 = arith.divf %182, %183 : vector<64x1xf32>
    %cst_127 = arith.constant 9.99999974E-6 : f32
    %185 = vector.broadcast %cst_127 : f32 to vector<64x1xf32>
    %186 = arith.addf %184, %185 : vector<64x1xf32>
    %187 = math.rsqrt %186 : vector<64x1xf32>
    %188 = vector.broadcast %187 : vector<64x1xf32> to vector<64x32xf32>
    %189 = arith.mulf %179, %188 : vector<64x32xf32>
    %190 = vector.broadcast %172 : vector<1x32xf32> to vector<64x32xf32>
    %191 = arith.mulf %189, %190 : vector<64x32xf32>
    %192 = vector.broadcast %173 : vector<1x32xf32> to vector<64x32xf32>
    %193 = arith.addf %191, %192 : vector<64x32xf32>
    %c0_128 = arith.constant 0 : index
    %c0_129 = arith.constant 0 : index
    %194 = vector.load %arg18[%c0_128, %c0_129] : memref<32x64xf32, #tpu.memory_space<vmem>>, vector<32x64xf32>
    %cst_130 = arith.constant dense<0.000000e+00> : vector<64x64xf32>
    %195 = tpu.matmul %193, %194, %cst_130 {dimension_numbers = #tpu.dot_dimension_numbers<[1], [0], [0], [1], [0, 0, 1, 1], [], []>} : vector<64x32xf32>, vector<32x64xf32>, vector<64x64xf32> -> vector<64x64xf32>
    %c0_131 = arith.constant 0 : index
    %c0_132 = arith.constant 0 : index
    %196 = vector.load %arg19[%c0_131, %c0_132] : memref<1x64xf32, #tpu.memory_space<vmem>>, vector<1x64xf32>
    %197 = vector.broadcast %196 : vector<1x64xf32> to vector<64x64xf32>
    %198 = arith.addf %195, %197 : vector<64x64xf32>
    %cst_133 = arith.constant 5.000000e-01 : f32
    %199 = vector.broadcast %cst_133 : f32 to vector<64x64xf32>
    %200 = arith.mulf %199, %198 : vector<64x64xf32>
    %cst_134 = arith.constant 0.707106769 : f32
    %201 = vector.broadcast %cst_134 : f32 to vector<64x64xf32>
    %202 = arith.mulf %198, %201 : vector<64x64xf32>
    %203 = math.absf %202 : vector<64x64xf32>
    %cst_135 = arith.constant 0.327591091 : f32
    %204 = vector.broadcast %cst_135 : f32 to vector<64x64xf32>
    %205 = arith.mulf %204, %203 : vector<64x64xf32>
    %cst_136 = arith.constant 1.000000e+00 : f32
    %206 = vector.broadcast %cst_136 : f32 to vector<64x64xf32>
    %207 = arith.addf %206, %205 : vector<64x64xf32>
    %cst_137 = arith.constant 1.000000e+00 : f32
    %208 = vector.broadcast %cst_137 : f32 to vector<64x64xf32>
    %209 = arith.divf %208, %207 : vector<64x64xf32>
    %cst_138 = arith.constant 1.06140542 : f32
    %210 = vector.broadcast %cst_138 : f32 to vector<64x64xf32>
    %211 = arith.mulf %210, %209 : vector<64x64xf32>
    %cst_139 = arith.constant -1.45315206 : f32
    %212 = vector.broadcast %cst_139 : f32 to vector<64x64xf32>
    %213 = arith.addf %211, %212 : vector<64x64xf32>
    %214 = arith.mulf %213, %209 : vector<64x64xf32>
    %cst_140 = arith.constant 1.42141378 : f32
    %215 = vector.broadcast %cst_140 : f32 to vector<64x64xf32>
    %216 = arith.addf %214, %215 : vector<64x64xf32>
    %217 = arith.mulf %216, %209 : vector<64x64xf32>
    %cst_141 = arith.constant -0.284496725 : f32
    %218 = vector.broadcast %cst_141 : f32 to vector<64x64xf32>
    %219 = arith.addf %217, %218 : vector<64x64xf32>
    %220 = arith.mulf %219, %209 : vector<64x64xf32>
    %cst_142 = arith.constant 0.254829586 : f32
    %221 = vector.broadcast %cst_142 : f32 to vector<64x64xf32>
    %222 = arith.addf %220, %221 : vector<64x64xf32>
    %223 = arith.mulf %222, %209 : vector<64x64xf32>
    %cst_143 = arith.constant 0.000000e+00 : f32
    %224 = vector.broadcast %cst_143 : f32 to vector<64x64xf32>
    %225 = arith.subf %224, %203 : vector<64x64xf32>
    %226 = arith.mulf %225, %203 : vector<64x64xf32>
    %227 = math.exp %226 : vector<64x64xf32>
    %228 = arith.mulf %223, %227 : vector<64x64xf32>
    %cst_144 = arith.constant 1.000000e+00 : f32
    %229 = vector.broadcast %cst_144 : f32 to vector<64x64xf32>
    %230 = arith.subf %229, %228 : vector<64x64xf32>
    %cst_145 = arith.constant 0.000000e+00 : f32
    %231 = vector.broadcast %cst_145 : f32 to vector<64x64xf32>
    %232 = arith.cmpf oge, %202, %231 : vector<64x64xf32>
    %cst_146 = arith.constant 0.000000e+00 : f32
    %233 = vector.broadcast %cst_146 : f32 to vector<64x64xf32>
    %234 = arith.subf %233, %230 : vector<64x64xf32>
    %235 = arith.select %232, %230, %234 : vector<64x64xi1>, vector<64x64xf32>
    %cst_147 = arith.constant 1.000000e+00 : f32
    %236 = vector.broadcast %cst_147 : f32 to vector<64x64xf32>
    %237 = arith.addf %236, %235 : vector<64x64xf32>
    %238 = arith.mulf %200, %237 : vector<64x64xf32>
    %c0_148 = arith.constant 0 : index
    %c0_149 = arith.constant 0 : index
    %239 = vector.load %arg20[%c0_148, %c0_149] : memref<64x32xf32, #tpu.memory_space<vmem>>, vector<64x32xf32>
    %cst_150 = arith.constant dense<0.000000e+00> : vector<64x32xf32>
    %240 = tpu.matmul %238, %239, %cst_150 {dimension_numbers = #tpu.dot_dimension_numbers<[1], [0], [0], [1], [0, 0, 1, 1], [], []>} : vector<64x64xf32>, vector<64x32xf32>, vector<64x32xf32> -> vector<64x32xf32>
    %c0_151 = arith.constant 0 : index
    %c0_152 = arith.constant 0 : index
    %241 = vector.load %arg21[%c0_151, %c0_152] : memref<1x32xf32, #tpu.memory_space<vmem>>, vector<1x32xf32>
    %242 = vector.broadcast %241 : vector<1x32xf32> to vector<64x32xf32>
    %243 = arith.addf %240, %242 : vector<64x32xf32>
    %244 = arith.addf %193, %243 : vector<64x32xf32>
    %245 = arith.addf %244, %171 : vector<64x32xf32>
    %c0_153 = arith.constant 0 : index
    %c0_154 = arith.constant 0 : index
    %c0_155 = arith.constant 0 : index
    %246 = vector.load %arg22[%c0_153, %c0_154, %c0_155] : memref<1x64x32xf32, #tpu.memory_space<vmem>>, vector<1x64x32xf32>
    %247 = vector.shape_cast %246 : vector<1x64x32xf32> to vector<64x32xf32>
    %248 = vector.shape_cast %245 : vector<64x32xf32> to vector<1x64x32xf32>
    tpu.vector_store %arg22[%c0_153, %c0_154, %c0_155], %248 {strides = array<i32>} : memref<1x64x32xf32, #tpu.memory_space<vmem>>, vector<1x64x32xf32>,
    return
  }
  func.func @transform_0(%arg0: i32) -> (i32, i32, i32) {
    %c0_i32 = arith.constant 0 : i32
    %c0_i32_0 = arith.constant 0 : i32
    %c0_i32_1 = arith.constant 0 : i32
    return %arg0, %c0_i32, %c0_i32_0 : i32, i32, i32
  }
  func.func @transform_1(%arg0: i32) -> (i32, i32) {
    %c0_i32 = arith.constant 0 : i32
    %c0_i32_0 = arith.constant 0 : i32
    %c0_i32_1 = arith.constant 0 : i32
    return %c0_i32, %c0_i32_0 : i32, i32
  }
  func.func @transform_2(%arg0: i32) -> (i32, i32) {
    %c0_i32 = arith.constant 0 : i32
    %c0_i32_0 = arith.constant 0 : i32
    %c0_i32_1 = arith.constant 0 : i32
    return %c0_i32, %c0_i32_0 : i32, i32
  }
  func.func @transform_3(%arg0: i32) -> (i32, i32) {
    %c0_i32 = arith.constant 0 : i32
    %c0_i32_0 = arith.constant 0 : i32
    %c0_i32_1 = arith.constant 0 : i32
    return %c0_i32, %c0_i32_0 : i32, i32
  }
  func.func @transform_4(%arg0: i32) -> (i32, i32) {
    %c0_i32 = arith.constant 0 : i32
    %c0_i32_0 = arith.constant 0 : i32
    %c0_i32_1 = arith.constant 0 : i32
    return %c0_i32, %c0_i32_0 : i32, i32
  }
  func.func @transform_5(%arg0: i32) -> (i32, i32, i32, i32) {
    %c0_i32 = arith.constant 0 : i32
    %c0_i32_0 = arith.constant 0 : i32
    %c0_i32_1 = arith.constant 0 : i32
    %c0_i32_2 = arith.constant 0 : i32
    %c0_i32_3 = arith.constant 0 : i32
    return %c0_i32, %c0_i32_0, %c0_i32_1, %c0_i32_2 : i32, i32, i32, i32
  }
  func.func @transform_6(%arg0: i32) -> (i32, i32) {
    %c0_i32 = arith.constant 0 : i32
    %c0_i32_0 = arith.constant 0 : i32
    %c0_i32_1 = arith.constant 0 : i32
    return %c0_i32, %c0_i32_0 : i32, i32
  }
  func.func @transform_7(%arg0: i32) -> (i32, i32) {
    %c0_i32 = arith.constant 0 : i32
    %c0_i32_0 = arith.constant 0 : i32
    %c0_i32_1 = arith.constant 0 : i32
    return %c0_i32, %c0_i32_0 : i32, i32
  }
  func.func @transform_8(%arg0: i32) -> (i32, i32) {
    %c0_i32 = arith.constant 0 : i32
    %c0_i32_0 = arith.constant 0 : i32
    %c0_i32_1 = arith.constant 0 : i32
    return %c0_i32, %c0_i32_0 : i32, i32
  }
  func.func @transform_9(%arg0: i32) -> (i32, i32) {
    %c0_i32 = arith.constant 0 : i32
    %c0_i32_0 = arith.constant 0 : i32
    %c0_i32_1 = arith.constant 0 : i32
    return %c0_i32, %c0_i32_0 : i32, i32
  }
  func.func @transform_10(%arg0: i32) -> (i32, i32, i32, i32) {
    %c0_i32 = arith.constant 0 : i32
    %c0_i32_0 = arith.constant 0 : i32
    %c0_i32_1 = arith.constant 0 : i32
    %c0_i32_2 = arith.constant 0 : i32
    %c0_i32_3 = arith.constant 0 : i32
    return %c0_i32, %c0_i32_0, %c0_i32_1, %c0_i32_2 : i32, i32, i32, i32
  }
  func.func @transform_11(%arg0: i32) -> (i32, i32) {
    %c0_i32 = arith.constant 0 : i32
    %c0_i32_0 = arith.constant 0 : i32
    %c0_i32_1 = arith.constant 0 : i32
    return %c0_i32, %c0_i32_0 : i32, i32
  }
  func.func @transform_12(%arg0: i32) -> (i32, i32) {
    %c0_i32 = arith.constant 0 : i32
    %c0_i32_0 = arith.constant 0 : i32
    %c0_i32_1 = arith.constant 0 : i32
    return %c0_i32, %c0_i32_0 : i32, i32
  }
  func.func @transform_13(%arg0: i32) -> (i32, i32) {
    %c0_i32 = arith.constant 0 : i32
    %c0_i32_0 = arith.constant 0 : i32
    %c0_i32_1 = arith.constant 0 : i32
    return %c0_i32, %c0_i32_0 : i32, i32
  }
  func.func @transform_14(%arg0: i32) -> (i32, i32) {
    %c0_i32 = arith.constant 0 : i32
    %c0_i32_0 = arith.constant 0 : i32
    %c0_i32_1 = arith.constant 0 : i32
    return %c0_i32, %c0_i32_0 : i32, i32
  }
  func.func @transform_15(%arg0: i32) -> (i32, i32) {
    %c0_i32 = arith.constant 0 : i32
    %c0_i32_0 = arith.constant 0 : i32
    %c0_i32_1 = arith.constant 0 : i32
    return %c0_i32, %c0_i32_0 : i32, i32
  }
  func.func @transform_16(%arg0: i32) -> (i32, i32) {
    %c0_i32 = arith.constant 0 : i32
    %c0_i32_0 = arith.constant 0 : i32
    %c0_i32_1 = arith.constant 0 : i32
    return %c0_i32, %c0_i32_0 : i32, i32
  }
  func.func @transform_17(%arg0: i32) -> (i32, i32) {
    %c0_i32 = arith.constant 0 : i32
    %c0_i32_0 = arith.constant 0 : i32
    %c0_i32_1 = arith.constant 0 : i32
    return %c0_i32, %c0_i32_0 : i32, i32
  }
  func.func @transform_18(%arg0: i32) -> (i32, i32) {
    %c0_i32 = arith.constant 0 : i32
    %c0_i32_0 = arith.constant 0 : i32
    %c0_i32_1 = arith.constant 0 : i32
    return %c0_i32, %c0_i32_0 : i32, i32
  }
  func.func @transform_19(%arg0: i32) -> (i32, i32) {
    %c0_i32 = arith.constant 0 : i32
    %c0_i32_0 = arith.constant 0 : i32
    %c0_i32_1 = arith.constant 0 : i32
    return %c0_i32, %c0_i32_0 : i32, i32
  }
  func.func @transform_20(%arg0: i32) -> (i32, i32) {
    %c0_i32 = arith.constant 0 : i32
    %c0_i32_0 = arith.constant 0 : i32
    %c0_i32_1 = arith.constant 0 : i32
    return %c0_i32, %c0_i32_0 : i32, i32
  }
  func.func @transform_21(%arg0: i32) -> (i32, i32, i32) {
    %c0_i32 = arith.constant 0 : i32
    %c0_i32_0 = arith.constant 0 : i32
    %c0_i32_1 = arith.constant 0 : i32
    return %arg0, %c0_i32, %c0_i32_0 : i32, i32, i32
  }
}

</mosaic_0001>

<bundles_post_ra>
// kernel: st_attnpt_forward.4
= control target key start
LH: loop header
LB: loop body
LE: loop exit
PB: predicated region body
PF: predicated region fallthrough
CT: control target
= control target key end

     0   :  { %s512_s15 = smov 0   ;;  %s585_s0 = inlined_call_operand.vmem [shape: f32[2,64,8], index: 0, kind: input, shape index: {}]   ;;  %s586_s1 = inlined_call_operand.vmem [shape: f32[8,32], index: 1, kind: input, shape index: {}]   ;;  %s587_s2 = inlined_call_operand.vmem [shape: f32[1,32], index: 2, kind: input, shape index: {}]   ;;  %s588_s3 = inlined_call_operand.vmem [shape: f32[64,32], index: 3, kind: input, shape index: {}]   ;;  %s589_s4 = inlined_call_operand.vmem [shape: f32[2,64,32], index: 4, kind: output, shape index: {}]  }
   0x1 LB: > { %s424_s16 = sadd.s32 4294967295, %s485_s15   ;;  %p428_p0 = scmp.ge.s32.totalorder %s485_s15, 1  ;;  %s485_s15 = sphi %s512_s15, %s14_s15  }
   0x2   : > { %p162_p1 = scmp.lt.s32.totalorder %s485_s15, 3 }
   0x4   : > { %p163_p2 = pnand %p428_p0, %p162_p1 }
   0x5   : > { %p188_p3 = scmp.lt.s32.totalorder (!%p163_p2), %s424_s16, 1 }
   0x6   : > { %166 = sbr.rel (%p163_p2) target bundleno = 221 (0xdd), region = 36 }
   0xb   : > { %v206_v0 = vld [vmem:[%s586_s1] sm:$0xff]  ;;  %s591_s16 = smov (!%p188_p3, %s424_s16), 1  ;;  %vm214_vm0 = vcmask 64512   ;;  %v345_v11 = vld [vmem:[%s588_s3 + $0x8] sm:$0xff]  ;;  %vm360_vm1 = vcmask 261120   ;;  %v347_v25 = vld [vmem:[%s588_s3 + $0x18] sm:$0xff] }
   0xc   : > { %455 = vmatprep.subr.mxu0 %v206_v0  ;;  %469 = vmatprep.subr.mxu1 %v206_v0  ;;  %s444_s19 = sshll.u32 %s591_s16, 6  ;;  %v433_v9 = vld [vmem:[%s587_s2] ss:$0 sm:$0xff]  ;;  %v349_v13 = vld [vmem:[%s588_s3 + $0x28] sm:$0xff]  ;;  %v351_v27 = vld [vmem:[%s588_s3 + $0x38] sm:$0xff] }
   0xd   : > { %456 = vmatpush3.msra.mxu0 %v206_v0  ;;  %470 = vmatpush3.msra.mxu1 %v206_v0  ;;  %s192_s22 = scalar_lea.vmem %s585_s0, %s444_s19  ;;  %s546_s5 = scalar_lea.vmem %s589_s4, %s444_s19  ;;  %v344_v17 = vld [vmem:[%s588_s3] sm:$0xff]  ;;  %v346_v33 = vld [vmem:[%s588_s3 + $0x10] sm:$0xff] }
   0xe   : > { %v198_v1 = vld [vmem:[%s192_s22] sm:$0xff]  ;;  %v199_v3 = vld [vmem:[%s192_s22 + $0x8] sm:$0xff]  ;;  %v200_v5 = vld [vmem:[%s192_s22 + $0x10] sm:$0xff] }
   0xf   : > { %v202_v2 = vld [vmem:[%s192_s22 + $0x20] sm:$0xff]  ;;  %457 = vmatprep.mubr.msk.f32.mxu0 %vm214_vm0, %v198_v1  ;;  %v203_v4 = vld [vmem:[%s192_s22 + $0x28] sm:$0xff]  ;;  %v204_v6 = vld [vmem:[%s192_s22 + $0x30] sm:$0xff] }
  0x10   : > { %463 = vmatprep.mubr.msk.f32.mxu1 %vm214_vm0, %v202_v2  ;;  %458 = vmatmul.mubr.msk.f32.vlgmr.msra.gmra.mxu0 %vm214_vm0, %v199_v3  ;;  %v201_v7 = vld [vmem:[%s192_s22 + $0x18] sm:$0xff]  ;;  %v348_v19 = vld [vmem:[%s588_s3 + $0x20] sm:$0xff]  ;;  %v350_v35 = vld [vmem:[%s588_s3 + $0x30] sm:$0xff] }
  0x11   : > { %464 = vmatmul.mubr.msk.f32.vlgmr.msra.gmra.mxu1 %vm214_vm0, %v203_v4  ;;  %460 = vmatprep.mubr.msk.f32.mxu0 %vm214_vm0, %v200_v5  ;;  %v205_v8 = vld [vmem:[%s192_s22 + $0x38] sm:$0xff] }
  0x12   : > { %466 = vmatprep.mubr.msk.f32.mxu1 %vm214_vm0, %v204_v6 }
  0x14   : > { %461 = vmatmul.mubr.msk.f32.gmra.mxu0 %vm214_vm0, %v201_v7 }
  0x15   : > { %467 = vmatmul.mubr.msk.f32.gmra.mxu1 %vm214_vm0, %v205_v8 }
  0xd0   : > { %v459_v10 = vpop.f32.mrf.mxu0 }
  0xd1   : > { %v465_v12 = vpop.f32.mrf.mxu1  ;;  %v311_v14 = vadd.f32 %v459_v10, %v433_v9 }
  0xd2   : > { %v331_v15 = vadd.f32 %v465_v12, %v433_v9  ;;  %v305_v16 = vpop.f32.mrf.mxu0 }
  0xd3   : > { %v325_v18 = vpop.f32.mrf.mxu1  ;;  %v353_v20 = vadd.f32 %v345_v11, %v311_v14  ;;  %v306_v22 = vadd.f32 %v433_v9, %v305_v16 }
  0xd4   : > { %v357_v21 = vadd.f32 %v349_v13, %v331_v15  ;;  %v326_v23 = vadd.f32 %v433_v9, %v325_v18  ;;  %v462_v24 = vpop.f32.mrf.mxu0 }
  0xd5   : > { %v468_v26 = vpop.f32.mrf.mxu1  ;;  %362 = vst.msk [vmem:[%s546_s5 + $0x8] sm:$0xff] %vm360_vm1, %v353_v20  ;;  %v352_v28 = vadd.f32 %v344_v17, %v306_v22  ;;  %v321_v30 = vadd.f32 %v462_v24, %v433_v9 }
  0xd6   : > { %366 = vst.msk [vmem:[%s546_s5 + $0x28] sm:$0xff] %vm360_vm1, %v357_v21  ;;  %v356_v29 = vadd.f32 %v348_v19, %v326_v23  ;;  %v341_v31 = vadd.f32 %v468_v26, %v433_v9  ;;  %v315_v32 = vpop.f32.mrf.mxu0 }
  0xd7   : > { %v335_v34 = vpop.f32.mrf.mxu1  ;;  %361 = vst.msk [vmem:[%s546_s5] sm:$0xff] %vm360_vm1, %v352_v28  ;;  %v355_v36 = vadd.f32 %v347_v25, %v321_v30  ;;  %v316_v38 = vadd.f32 %v433_v9, %v315_v32 }
  0xd8   : > { %365 = vst.msk [vmem:[%s546_s5 + $0x20] sm:$0xff] %vm360_vm1, %v356_v29  ;;  %v359_v37 = vadd.f32 %v351_v27, %v341_v31  ;;  %v336_v39 = vadd.f32 %v433_v9, %v335_v34 }
  0xd9   : > { %364 = vst.msk [vmem:[%s546_s5 + $0x18] sm:$0xff] %vm360_vm1, %v355_v36  ;;  %v354_v40 = vadd.f32 %v346_v33, %v316_v38 }
  0xda   : > { %368 = vst.msk [vmem:[%s546_s5 + $0x38] sm:$0xff] %vm360_vm1, %v359_v37  ;;  %v358_v41 = vadd.f32 %v350_v35, %v336_v39 }
  0xdb   : > { %363 = vst.msk [vmem:[%s546_s5 + $0x10] sm:$0xff] %vm360_vm1, %v354_v40 }
  0xdc   : > { %367 = vst.msk [vmem:[%s546_s5 + $0x30] sm:$0xff] %vm360_vm1, %v358_v41 }
  0xdd PF: > { %s14_s15 = sadd.s32 1, %s485_s15  }
  0xde   : > { %p11_p4 = scmp.ge.s32.totalorder %s14_s15, 4  }
  0xe0   :  { %13 = sbr.rel (!%p11_p4) target bundleno = 1 (0x1), region = 66 }

// kernel: st_attnpt_forward.7
= control target key start
LH: loop header
LB: loop body
LE: loop exit
PB: predicated region body
PF: predicated region fallthrough
CT: control target
= control target key end

     0   :  { %8 = vsyncpa [#allocation3], 0  ;;  %s712_s0 = inlined_call_operand.vmem [shape: f32[2,64,32], index: 0, kind: input, shape index: {}]   ;;  %s713_s1 = inlined_call_operand.vmem [shape: f32[1,32], index: 1, kind: input, shape index: {}]   ;;  %s714_s2 = inlined_call_operand.vmem [shape: f32[1,32], index: 2, kind: input, shape index: {}]   ;;  %s715_s3 = inlined_call_operand.hbm [shape: f32[2,1,32], index: 3, kind: output, shape index: {}]  }
   0x1   :  { %10 = vsyncpa [#allocation3 + $0x1], 0  ;;  %s555_s12 = smov 0   ;;  %s557_s13 = smov 0  }
   0x2   :  { %s559_s14 = smov 0   ;;  %s561_s15 = smov 0  }
   0x3 LB: > { %s576_s16 = sadd.s32 4294967295, %s532_s15   ;;  %s405_s17 = sadd.s32 4294967294, %s532_s15   ;;  %s532_s15 = sphi %s561_s15, %s721_s15   ;;  %s528_s14 = sphi %s559_s14, %s720_s14   ;;  %s524_s13 = sphi %s557_s13, %s719_s13   ;;  %s520_s12 = sphi %s555_s12, %s718_s12  }
   0x4   : > { %s580_s18 = sadd.s32 1, %s532_s15   ;;  %s91_s19 = sadd.s32 1, %s528_s14 }
   0x5   : > { %s88_s20 = ssub.s32 %s532_s15, %s580_s18  ;;  %p101_p0 = scmp.ne.s32.totalorder %s528_s14, %s524_s13 }
   0x6   : > { %p89_p1 = scmp.eq.s32.totalorder %s88_s20, 0  ;;  %p102_p2 = scmp.eq.s32.totalorder %s576_s16, 1 }
   0x7   : > { %p107_p3 = scmp.ne.s32.totalorder %s524_s13, %s520_s12  ;;  %p108_p4 = scmp.eq.s32.totalorder %s405_s17, 1 }
   0x8   : > { %s591_s21 = scalar_select %p89_p1, %s528_s14, %s91_s19  }
   0x9   : > { %p593_p5 = por %p102_p2, %p101_p0  ;;  %p597_p6 = por %p108_p4, %p107_p3 }
   0xa   : > { %p408_p7 = scmp.ge.s32.totalorder %s532_s15, 1  ;;  %p140_p8 = scmp.lt.s32.totalorder %s532_s15, 3 }
   0xc   : > { %p141_p9 = pnand %p408_p7, %p140_p8 }
   0xd   : > { %p163_p10 = scmp.lt.s32.totalorder (!%p141_p9), %s576_s16, 1  ;;  %s161_s6 = sand.u32 (!%p141_p9), 1, %s524_s13  }
   0xe   : > { %144 = sbr.rel (%p141_p9) target bundleno = 378 (0x17a), region = 32  ;;  %s413_s7 = sshll.u32 (!%p141_p9), %s576_s16, 4 }
   0xf   : > { %s162_s8 = scalar_lea.vmem (!%p141_p9), [#allocation2], %s161_s6  ;;  %s348_s17 = scalar_lea.hbm (!%p141_p9), %s715_s3, %s413_s7 }
  0x10   : > { %s350_s9 = sshll.u32 (!%p141_p9), %s162_s8, 4  ;;  %s338_s19 = scalar_lea.sflag (!%p141_p9), [#allocation3], %s161_s6  ;;  %s351_s9 = int_to_ptr.vmem [resolvable:$true] %s350_s9 }
  0x11   : > { %s472_s20 = scalar_lea.vmem (!%p141_p9), %s351_s9, 16 }
  0x12   : > { %p473_p11 = scmp.ne.s32.totalorder (!%p141_p9), %s351_s9, %s472_s20 }
  0x13   : > { %s164_s24 = scalar_select %p163_p10, %s576_s16, 1  ;;  %vm178_vm0 = vcmask 261120   ;;  %vm335_vm1 = vcmask 253952  }
  0x14   : > { %p474_p12 = pnand %p473_p11, %p593_p5 }
  0x15   : > { %s416_s25 = sshll.u32 %s164_s24, 6  ;;  %s534_s24 = smov [#allocation2]  }
  0x16   : > { %s167_s28 = scalar_lea.vmem %s712_s0, %s416_s25  ;;  %p475_p13 = pneg %p474_p12 }
  0x17   : > { %v168_v0 = vld [vmem:[%s167_s28] sm:$0xff]  ;;  %v170_v1 = vld [vmem:[%s167_s28 + $0x10] sm:$0xff]  ;;  %v169_v2 = vld [vmem:[%s167_s28 + $0x8] sm:$0xff]  ;;  %s476_s25 = sshll.u32 %s534_s24, 4  ;;  %s477_s25 = int_to_ptr.vmem [resolvable:$false] %s476_s25 }
  0x18   : > { %v179_v3 = vsel %vm178_vm0, %v168_v0, 0.0  ;;  %v185_v4 = vsel %vm178_vm0, %v170_v1, 0.0  ;;  %v171_v5 = vld [vmem:[%s167_s28 + $0x18] sm:$0xff]  ;;  %v182_v6 = vsel %vm178_vm0, %v169_v2, 0.0  ;;  %v172_v8 = vld [vmem:[%s167_s28 + $0x20] sm:$0xff]  ;;  %v173_v9 = vld [vmem:[%s167_s28 + $0x28] sm:$0xff]  ;;  %p479_p0 = scmp.lt.s32.totalorder %s351_s9, %s477_s25 }
  0x19   : > { %180 = vadd.xlane.f32.xlu0 %v179_v3  ;;  %186 = vadd.xlane.f32.xlu1 %v185_v4  ;;  %v188_v7 = vsel %vm178_vm0, %v171_v5, 0.0  ;;  %v191_v10 = vsel %vm178_vm0, %v172_v8, 0.0  ;;  %v194_v11 = vsel %vm178_vm0, %v173_v9, 0.0  ;;  %v174_v12 = vld [vmem:[%s167_s28 + $0x30] sm:$0xff]  ;;  %v175_v13 = vld [vmem:[%s167_s28 + $0x38] sm:$0xff]  ;;  %s478_s16 = scalar_lea.vmem %s477_s25, 32 }
  0x1a   : > { %v197_v14 = vsel %vm178_vm0, %v174_v12, 0.0  ;;  %v200_v15 = vsel %vm178_vm0, %v175_v13, 0.0  ;;  %p480_p1 = scmp.lt.s32.totalorder %s478_s16, %s472_s20 }
  0x1c   : > { %p481_p2 = por %p480_p1, %p479_p0 }
  0x1d   : > { %183 = vadd.xlane.f32.xlu0 %v182_v6  ;;  %189 = vadd.xlane.f32.xlu1 %v188_v7 }
  0x1e   : > { %p482_p3 = pnand %p481_p2, %p475_p13 }
  0x21   : > { %192 = vadd.xlane.f32.xlu0 %v191_v10  ;;  %195 = vadd.xlane.f32.xlu1 %v194_v11 }
  0x25   : > { %198 = vadd.xlane.f32.xlu0 %v197_v14  ;;  %201 = vadd.xlane.f32.xlu1 %v200_v15 }
  0xa2   : > { %v181_v16 = vpop.xlane.xlu0 %180  ;;  %v187_v17 = vpop.xlane.xlu1 %186 }
  0xa3   : > { %v204_v18 = vmul.f32 0.03125, %v181_v16  ;;  %v206_v19 = vmul.f32 0.03125, %v187_v17  ;;  %v411_v16 = vld [vmem:[%s713_s1] ss:$0 sm:$0xff] }
  0xa5   : > { %v616_v20 = vsub.f32 %v168_v0, %v204_v18  ;;  %v618_v21 = vsub.f32 %v170_v1, %v206_v19 }
  0xa6   : > { %v184_v22 = vpop.xlane.xlu0 %183  ;;  %v190_v23 = vpop.xlane.xlu1 %189 }
  0xa7   : > { %v205_v24 = vmul.f32 0.03125, %v184_v22  ;;  %v207_v25 = vmul.f32 0.03125, %v190_v23  ;;  %v220_v26 = vmul.f32 %v616_v20, %v616_v20  ;;  %v222_v27 = vmul.f32 %v618_v21, %v618_v21  ;;  %v412_v23 = vld [vmem:[%s714_s2] ss:$0 sm:$0xff] }
  0xa9   : > { %v624_v28 = vsub.f32 %v169_v2, %v205_v24  ;;  %v626_v29 = vsub.f32 %v171_v5, %v207_v25  ;;  %v228_v30 = vsel %vm178_vm0, %v220_v26, 0.0  ;;  %v234_v33 = vsel %vm178_vm0, %v222_v27, 0.0 }
  0xaa   : > { %229 = vadd.xlane.f32.xlu0 %v228_v30  ;;  %v193_v31 = vpop.xlane.xlu0 %192  ;;  %v196_v32 = vpop.xlane.xlu1 %195 }
  0xab   : > { %v208_v34 = vmul.f32 0.03125, %v193_v31  ;;  %v209_v35 = vmul.f32 0.03125, %v196_v32  ;;  %v221_v36 = vmul.f32 %v624_v28, %v624_v28  ;;  %v223_v37 = vmul.f32 %v626_v29, %v626_v29 }
  0xad   : > { %v634_v38 = vsub.f32 %v172_v8, %v208_v34  ;;  %v636_v39 = vsub.f32 %v173_v9, %v209_v35  ;;  %v231_v40 = vsel %vm178_vm0, %v221_v36, 0.0  ;;  %v237_v43 = vsel %vm178_vm0, %v223_v37, 0.0 }
  0xae   : > { %235 = vadd.xlane.f32.xlu0 %v234_v33  ;;  %232 = vadd.xlane.f32.xlu1 %v231_v40  ;;  %v199_v41 = vpop.xlane.xlu0 %198  ;;  %v202_v42 = vpop.xlane.xlu1 %201 }
  0xaf   : > { %v210_v44 = vmul.f32 0.03125, %v199_v41  ;;  %v211_v45 = vmul.f32 0.03125, %v202_v42  ;;  %v224_v46 = vmul.f32 %v634_v38, %v634_v38  ;;  %v225_v47 = vmul.f32 %v636_v39, %v636_v39 }
  0xb1   : > { %v644_v48 = vsub.f32 %v174_v12, %v210_v44  ;;  %v646_v49 = vsub.f32 %v175_v13, %v211_v45  ;;  %v240_v50 = vsel %vm178_vm0, %v224_v46, 0.0  ;;  %v243_v51 = vsel %vm178_vm0, %v225_v47, 0.0 }
  0xb2   : > { %238 = vadd.xlane.f32.xlu1 %v237_v43  ;;  %241 = vadd.xlane.f32.xlu0 %v240_v50 }
  0xb3   : > { %v226_v52 = vmul.f32 %v644_v48, %v644_v48  ;;  %v227_v53 = vmul.f32 %v646_v49, %v646_v49 }
  0xb5   : > { %v246_v54 = vsel %vm178_vm0, %v226_v52, 0.0  ;;  %v249_v55 = vsel %vm178_vm0, %v227_v53, 0.0 }
  0xb6   : > { %244 = vadd.xlane.f32.xlu1 %v243_v51  ;;  %247 = vadd.xlane.f32.xlu0 %v246_v54 }
  0xba   : > { %250 = vadd.xlane.f32.xlu1 %v249_v55 }
 0x133   : > { %v230_v56 = vpop.xlane.xlu0 %229 }
 0x134   : > { %v252_v57 = vmul.f32 0.03125, %v230_v56 }
 0x136   : > { %v260_v58 = vadd.f32 1e-06, %v252_v57 }
 0x137   : > { %v233_v59 = vpop.xlane.xlu1 %232  ;;  %v236_v60 = vpop.xlane.xlu0 %235 }
 0x138   : > { %456 = vrsqrt.f32 %v260_v58  ;;  %v253_v61 = vmul.f32 0.03125, %v233_v59  ;;  %v254_v62 = vmul.f32 0.03125, %v236_v60 }
 0x13a   : > { %v261_v63 = vadd.f32 1e-06, %v253_v61  ;;  %v262_v0 = vadd.f32 1e-06, %v254_v62 }
 0x13b   : > { %v239_v1 = vpop.xlane.xlu1 %238  ;;  %v242_v2 = vpop.xlane.xlu0 %241 }
 0x13c   : > { %458 = vrsqrt.f32 %v261_v63  ;;  %v255_v3 = vmul.f32 0.03125, %v239_v1  ;;  %v256_v4 = vmul.f32 0.03125, %v242_v2 }
 0x13d   : > { %460 = vrsqrt.f32 %v262_v0 }
 0x13e   : > { %v263_v5 = vadd.f32 1e-06, %v255_v3  ;;  %v264_v6 = vadd.f32 1e-06, %v256_v4 }
 0x13f   : > { %v245_v7 = vpop.xlane.xlu1 %244  ;;  %v248_v8 = vpop.xlane.xlu0 %247 }
 0x140   : > { %462 = vrsqrt.f32 %v263_v5  ;;  %v257_v9 = vmul.f32 0.03125, %v245_v7  ;;  %v258_v10 = vmul.f32 0.03125, %v248_v8 }
 0x141   : > { %464 = vrsqrt.f32 %v264_v6 }
 0x142   : > { %v265_v11 = vadd.f32 1e-06, %v257_v9  ;;  %v266_v12 = vadd.f32 1e-06, %v258_v10 }
 0x143   : > { %v251_v13 = vpop.xlane.xlu1 %250 }
 0x144   : > { %466 = vrsqrt.f32 %v265_v11  ;;  %v259_v14 = vmul.f32 0.03125, %v251_v13 }
 0x145   : > { %v457_v15 = vpop.eup %456  ;;  %468 = vrsqrt.f32 %v266_v12 }
 0x146   : > { %v276_v17 = vmul.f32 %v457_v15, %v616_v20  ;;  %v267_v18 = vadd.f32 1e-06, %v259_v14 }
 0x148   : > { %v290_v19 = vmul.f32 %v411_v16, %v276_v17  ;;  %470 = vrsqrt.f32 %v267_v18 }
 0x149   : > { %v459_v22 = vpop.eup %458 }
 0x14a   : > { %v461_v24 = vpop.eup %460  ;;  %v277_v25 = vmul.f32 %v459_v22, %v624_v28  ;;  %v304_v27 = vadd.f32 %v412_v23, %v290_v19 }
 0x14b   : > { %v278_v26 = vmul.f32 %v461_v24, %v618_v21 }
 0x14c   : > { %v291_v30 = vmul.f32 %v411_v16, %v277_v25  ;;  %v312_v37 = vsel %vm178_vm0, %v304_v27, 0.0 }
 0x14d   : > { %v463_v31 = vpop.eup %462  ;;  %v292_v32 = vmul.f32 %v411_v16, %v278_v26 }
 0x14e   : > { %v465_v33 = vpop.eup %464  ;;  %v305_v34 = vadd.f32 %v412_v23, %v291_v30  ;;  %v279_v20 = vmul.f32 %v463_v31, %v626_v29 }
 0x14f   : > { %v306_v35 = vadd.f32 %v412_v23, %v292_v32  ;;  %v280_v36 = vmul.f32 %v465_v33, %v634_v38 }
 0x150   : > { %v313_v40 = vsel %vm178_vm0, %v305_v34, 0.0  ;;  %v293_v41 = vmul.f32 %v411_v16, %v279_v20 }
 0x151   : > { %v467_v42 = vpop.eup %466  ;;  %v314_v28 = vadd.f32 %v313_v40, %v312_v37  ;;  %v294_v43 = vmul.f32 %v411_v16, %v280_v36  ;;  %v315_v44 = vsel %vm178_vm0, %v306_v35, 0.0 }
 0x152   : > { %v469_v21 = vpop.eup %468  ;;  %v307_v45 = vadd.f32 %v412_v23, %v293_v41  ;;  %v281_v46 = vmul.f32 %v467_v42, %v636_v39 }
 0x153   : > { %v316_v47 = vadd.f32 %v315_v44, %v314_v28  ;;  %v308_v50 = vadd.f32 %v412_v23, %v294_v43  ;;  %v282_v29 = vmul.f32 %v469_v21, %v644_v48 }
 0x154   : > { %v317_v38 = vsel %vm178_vm0, %v307_v45, 0.0  ;;  %v295_v51 = vmul.f32 %v411_v16, %v281_v46 }
 0x155   : > { %v471_v52 = vpop.eup %470  ;;  %v296_v53 = vmul.f32 %v411_v16, %v282_v29  ;;  %v318_v54 = vadd.f32 %v317_v38, %v316_v47  ;;  %v319_v57 = vsel %vm178_vm0, %v308_v50, 0.0 }
 0x156   : > { %v309_v55 = vadd.f32 %v412_v23, %v295_v51  ;;  %v283_v56 = vmul.f32 %v471_v52, %v646_v49 }
 0x157   : > { %v310_v58 = vadd.f32 %v412_v23, %v296_v53  ;;  %v320_v59 = vadd.f32 %v319_v57, %v318_v54 }
 0x158   : > { %v297_v39 = vmul.f32 %v411_v16, %v283_v56  ;;  %v321_v60 = vsel %vm178_vm0, %v309_v55, 0.0 }
 0x159   : > { %v322_v61 = vadd.f32 %v321_v60, %v320_v59  ;;  %v323_v62 = vsel %vm178_vm0, %v310_v58, 0.0 }
 0x15a   : > { %v311_v48 = vadd.f32 %v412_v23, %v297_v39 }
 0x15b   : > { %v324_v63 = vadd.f32 %v323_v62, %v322_v61 }
 0x15c   : > { %v325_v0 = vsel %vm178_vm0, %v311_v48, 0.0 }
 0x15d   : > { %v326_v1 = vadd.f32 %v325_v0, %v324_v63 }
 0x15f   : > { %v327_v2 = vrot.slane %v326_v1, 4 }
 0x161   : > { %v328_v3 = vadd.f32 %v327_v2, %v326_v1 }
 0x163   : > { %v329_v49 = vrot.slane %v328_v3, 2 }
 0x165   : > { %v330_v4 = vadd.f32 %v329_v49, %v328_v3 }
 0x167   : > { %v331_v5 = vrot.slane %v330_v4, 1 }
 0x169   : > { %v332_v6 = vadd.f32 %v331_v5, %v330_v4 }
 0x16b   : > { %v334_v7 = vmul.f32 0.015625, %v332_v6 }
 0x16d   : > { %336 = vst.msk [vmem:[%s162_s8] sm:$0x1] %vm335_vm1, %v334_v7 }
 0x16e   : > { %485 = shalt.err (!%p482_p3)
}
 0x16f   : > { %s486_s26 = scalar_lea.hbm %s348_s17, 16  ;;  %s490_s29 = scalar_lea.hbm %s715_s3, 32 }
 0x170   : > { %p487_p4 = scmp.ne.s32.totalorder %s348_s17, %s486_s26  ;;  %p491_p9 = scmp.lt.s32.totalorder %s348_s17, %s715_s3 }
 0x171   : > { %p492_p10 = scmp.lt.s32.totalorder %s490_s29, %s486_s26 }
 0x172   : > { %p488_p7 = pnand %p487_p4, %p593_p5 }
 0x173   : > { %p493_p11 = por %p492_p10, %p491_p9 }
 0x174   : > { %p489_p8 = pneg %p488_p7 }
 0x176   : > { %p494_p12 = pnand %p493_p11, %p489_p8 }
 0x178   : > { %497 = shalt.err (!%p494_p12)
}
 0x179   : > { %417 = dma.vmem_to_hbm [thread:$0]  (%p593_p5), %s351_s9, 16, %s348_s17, %s338_s19  }
 0x17a PF: > { %p423_p13 = scmp.ge.s32.totalorder %s532_s15, 2  ;;  %s362_s5 = sand.u32 1, %s520_s12  }
 0x17b   : > { %s363_s6 = scalar_lea.sflag [#allocation3], %s362_s5 }
 0x17c   : > { %p420_p0 = pnand %p423_p13, %p597_p6 }
 0x17e   : > { %p421_p1 = pneg %p420_p0 }
 0x180   : > { %515 = dma.done.wait (%p421_p1), %s363_s6, 16  }
 0x181   : > { %517 = vsyncadd (%p421_p1), %s363_s6, 4294967280  ;;  %p13_p2 = scmp.ge.s32.totalorder %s580_s18, 4   ;;  %s718_s12 = smov %s524_s13 }
 0x182   : > { %s719_s13 = smov %s528_s14  ;;  %s720_s14 = smov %s591_s21 }
 0x183   : > { %s721_s15 = smov %s580_s18  ;;  %15 = sbr.rel (!%p13_p2) target bundleno = 3 (0x3), region = 67 }
 0x188   :  { %367 = vsyncpa [#allocation3], 1 }
 0x189   :  { %369 = vsyncpa [#allocation3 + $0x1], 1 }

// kernel: st_attnpt_forward.5
= control target key start
LH: loop header
LB: loop body
LE: loop exit
PB: predicated region body
PF: predicated region fallthrough
CT: control target
= control target key end

     0   :  { %s8295_s0 = inlined_call_operand.vmem [shape: f32[2,64,32], index: 0, kind: input, shape index: {}]   ;;  %s8296_s1 = inlined_call_operand.vmem [shape: f32[64,64], index: 1, kind: input, shape index: {}]   ;;  %s8297_s2 = inlined_call_operand.vmem [shape: f32[64,64], index: 2, kind: input, shape index: {}]   ;;  %s8298_s3 = inlined_call_operand.vmem [shape: f32[1,32], index: 3, kind: input, shape index: {}]   ;;  %s8299_s4 = inlined_call_operand.vmem [shape: f32[1,32], index: 4, kind: input, shape index: {}]   ;;  %s8300_s5 = inlined_call_operand.vmem [shape: f32[3,2,32,16], index: 5, kind: input, shape index: {}]   ;;  %s8301_s6 = inlined_call_operand.vmem [shape: f32[32,32], index: 6, kind: input, shape index: {}]   ;;  %s8302_s7 = inlined_call_operand.vmem [shape: f32[1,32], index: 7, kind: input, shape index: {}]   ;;  %s8303_s8 = inlined_call_operand.vmem [shape: f32[1,32], index: 8, kind: input, shape index: {}]   ;;  %s8304_s9 = inlined_call_operand.vmem [shape: f32[1,32], index: 9, kind: input, shape index: {}]   ;;  %s8305_s10 = inlined_call_operand.vmem [shape: f32[3,2,32,16], index: 10, kind: input, shape index: {}]   ;;  %s8306_s11 = inlined_call_operand.vmem [shape: f32[32,32], index: 11, kind: input, shape index: {}]   ;;  %s8307_s12 = inlined_call_operand.vmem [shape: f32[1,32], index: 12, kind: input, shape index: {}]   ;;  %s8308_s13 = inlined_call_operand.vmem [shape: f32[64,32], index: 13, kind: input, shape index: {}]   ;;  %s8309_s14 = inlined_call_operand.vmem [shape: f32[1,32], index: 14, kind: input, shape index: {}]   ;;  %s8310_s15 = inlined_call_operand.vmem [shape: f32[1,32], index: 15, kind: input, shape index: {}]   ;;  %s8311_s16 = inlined_call_operand.vmem [shape: f32[1,32], index: 16, kind: input, shape index: {}]   ;;  %s8312_s17 = inlined_call_operand.vmem [shape: f32[32,64], index: 17, kind: input, shape index: {}]   ;;  %s8313_s18 = inlined_call_operand.vmem [shape: f32[1,64], index: 18, kind: input, shape index: {}]   ;;  %s8314_s19 = inlined_call_operand.vmem [shape: f32[64,32], index: 19, kind: input, shape index: {}]   ;;  %s8315_s20 = inlined_call_operand.vmem [shape: f32[1,32], index: 20, kind: input, shape index: {}]   ;;  %s8316_s21 = inlined_call_operand.vmem [shape: f32[2,64,32], index: 21, kind: output, shape index: {}]  }
   0x1   :  { %8320 = sst [smem:[#allocation2_spill]] %s8295_s0 }
   0x2   :  { %8321 = sst [smem:[#allocation3_spill]] %s8296_s1 }
   0x3   :  { %8322 = sst [smem:[#allocation4_spill]] %s8297_s2  ;;  %s6909_s2 = smov 0  }
   0x4   :  { %8323 = sst [smem:[#allocation5_spill]] %s8298_s3 }
   0x5   :  { %8324 = sst [smem:[#allocation6_spill]] %s8299_s4 }
   0x6   :  { %8325 = sst [smem:[#allocation7_spill]] %s8300_s5 }
   0x7 LB: > { %s5283_s25 = sadd.s32 4294967295, %s6797_s2   ;;  %p5287_p0 = scmp.ge.s32.totalorder %s6797_s2, 1  ;;  %s6797_s2 = sphi %s6909_s2, %s31_s2  }
   0x8   : > { %p587_p1 = scmp.lt.s32.totalorder %s6797_s2, 3 }
   0xa   : > { %p588_p2 = pnand %p5287_p0, %p587_p1 }
   0xb   : > { %p647_p3 = scmp.lt.s32.totalorder (!%p588_p2), %s5283_s25, 1  ;;  %s8326_s28 = sld [smem:[#allocation2_spill]] (!%p588_p2) }
   0xc   : > { %591 = sbr.rel (%p588_p2) target bundleno = 4823 (0x12d7), region = 104  ;;  %s8327_s30 = sld [smem:[#allocation7_spill]] (!%p588_p2) }
   0xd   : > { %s8328_s0 = sld [smem:[#allocation5_spill]] (!%p588_p2) }
   0xe   : > { %s8329_s22 = sld [smem:[#allocation6_spill]] (!%p588_p2) }
   0xf   : > { %s8331_s1 = sld [smem:[#allocation4_spill]] (!%p588_p2) }
  0x11   : > { %s8333_s25 = smov (!%p647_p3, %s5283_s25), 1  ;;  %vm680_vm0 = vcmask 261120   ;;  %vm1175_vm1 = vcmask 130048   ;;  %vm1329_vm2 = vcmask 523264  }
  0x12   : > { %s5601_s26 = sshll.u32 %s8333_s25, 6  ;;  %v817_v56 = vld [vmem:[%s8327_s30 + $0x18] sm:$0xff]  ;;  %v816_v58 = vld [vmem:[%s8327_s30 + $0x10] sm:$0xff]  ;;  %v815_v60 = vld [vmem:[%s8327_s30 + $0x8] sm:$0xff] }
  0x13   : > { %s6925_s29 = scalar_lea.vmem %s8326_s28, %s5601_s26  ;;  %v5305_v57 = vld [vmem:[%s8327_s30 + $0x58] sm:$0xff]  ;;  %5967 = vmatprep.subr.mxu0 %v817_v56  ;;  %v5304_v59 = vld [vmem:[%s8327_s30 + $0x50] sm:$0xff]  ;;  %v5303_v61 = vld [vmem:[%s8327_s30 + $0x48] sm:$0xff]  ;;  %s8259_s3 = scalar_lea.vmem %s8316_s21, %s5601_s26 }
  0x14   : > { %v657_v0 = vld [vmem:[%s6925_s29] sm:$0xff]  ;;  %v659_v1 = vld [vmem:[%s6925_s29 + $0x10] sm:$0xff]  ;;  %v658_v2 = vld [vmem:[%s6925_s29 + $0x8] sm:$0xff]  ;;  %5987 = vmatprep.subr.mxu1 %v5305_v57  ;;  %5968 = vmatpush3.msra.mxu0 %v817_v56 }
  0x15   : > { %v681_v3 = vsel %vm680_vm0, %v657_v0, 0.0  ;;  %v687_v4 = vsel %vm680_vm0, %v659_v1, 0.0  ;;  %v660_v5 = vld [vmem:[%s6925_s29 + $0x18] sm:$0xff]  ;;  %v684_v6 = vsel %vm680_vm0, %v658_v2, 0.0  ;;  %v661_v8 = vld [vmem:[%s6925_s29 + $0x20] sm:$0xff]  ;;  %v662_v9 = vld [vmem:[%s6925_s29 + $0x28] sm:$0xff]  ;;  %5988 = vmatpush3.msra.mxu1 %v5305_v57  ;;  %5969 = vmatprep.subr.mxu0 %v816_v58 }
  0x16   : > { %682 = vadd.xlane.f32.xlu0 %v681_v3  ;;  %688 = vadd.xlane.f32.xlu1 %v687_v4  ;;  %v690_v7 = vsel %vm680_vm0, %v660_v5, 0.0  ;;  %v693_v10 = vsel %vm680_vm0, %v661_v8, 0.0  ;;  %v696_v11 = vsel %vm680_vm0, %v662_v9, 0.0  ;;  %v663_v12 = vld [vmem:[%s6925_s29 + $0x30] sm:$0xff]  ;;  %v664_v13 = vld [vmem:[%s6925_s29 + $0x38] sm:$0xff]  ;;  %v814_v62 = vld [vmem:[%s8327_s30] sm:$0xff] }
  0x17   : > { %v699_v14 = vsel %vm680_vm0, %v663_v12, 0.0  ;;  %v702_v15 = vsel %vm680_vm0, %v664_v13, 0.0  ;;  %5989 = vmatprep.subr.mxu1 %v5304_v59  ;;  %5970 = vmatpush3.msra.mxu0 %v816_v58  ;;  %v5302_v63 = vld [vmem:[%s8327_s30 + $0x40] sm:$0xff] }
  0x18   : > { %5990 = vmatpush3.msra.mxu1 %v5304_v59  ;;  %5971 = vmatprep.subr.mxu0 %v815_v60 }
  0x19   : > { %5991 = vmatprep.subr.mxu1 %v5303_v61  ;;  %5972 = vmatpush3.msra.mxu0 %v815_v60 }
  0x1a   : > { %685 = vadd.xlane.f32.xlu0 %v684_v6  ;;  %691 = vadd.xlane.f32.xlu1 %v690_v7 }
  0x1b   : > { %5992 = vmatpush3.msra.mxu1 %v5303_v61  ;;  %5973 = vmatprep.subr.mxu0 %v814_v62  ;;  %v5314_v61 = vld [vmem:[%s8327_s30 + $0x80] sm:$0xff] }
  0x1c   : > { %5993 = vmatprep.subr.mxu1 %v5302_v63  ;;  %5974 = vmatpush3.msra.mxu0 %v814_v62 }
  0x1d   : > { %5994 = vmatpush3.msra.mxu1 %v5302_v63 }
  0x1e   : > { %694 = vadd.xlane.f32.xlu0 %v693_v10  ;;  %697 = vadd.xlane.f32.xlu1 %v696_v11 }
  0x22   : > { %700 = vadd.xlane.f32.xlu0 %v699_v14  ;;  %703 = vadd.xlane.f32.xlu1 %v702_v15 }
  0x9f   : > { %v683_v16 = vpop.xlane.xlu0 %682  ;;  %v689_v17 = vpop.xlane.xlu1 %688 }
  0xa0   : > { %v706_v18 = vmul.f32 0.03125, %v683_v16  ;;  %v708_v19 = vmul.f32 0.03125, %v689_v17 }
  0xa2   : > { %v6943_v20 = vsub.f32 %v657_v0, %v706_v18  ;;  %v6945_v21 = vsub.f32 %v659_v1, %v708_v19  ;;  %v7010_v0 = vld [vmem:[%s8327_s30 + $0x98] sm:$0xff] }
  0xa3   : > { %v686_v22 = vpop.xlane.xlu0 %685  ;;  %v692_v23 = vpop.xlane.xlu1 %691  ;;  %6007 = vmatprep.subr.mxu0 %v7010_v0 }
  0xa4   : > { %v707_v24 = vmul.f32 0.03125, %v686_v22  ;;  %v709_v25 = vmul.f32 0.03125, %v692_v23  ;;  %v722_v26 = vmul.f32 %v6943_v20, %v6943_v20  ;;  %v724_v27 = vmul.f32 %v6945_v21, %v6945_v21 }
  0xa6   : > { %v6951_v28 = vsub.f32 %v658_v2, %v707_v24  ;;  %v6953_v29 = vsub.f32 %v660_v5, %v709_v25  ;;  %v730_v30 = vsel %vm680_vm0, %v722_v26, 0.0  ;;  %v736_v33 = vsel %vm680_vm0, %v724_v27, 0.0  ;;  %v5292_v27 = vld [vmem:[%s8328_s0] ss:$0 sm:$0xff]  ;;  %s8330_s0 = sld [smem:[#allocation3_spill]] }
  0xa7   : > { %731 = vadd.xlane.f32.xlu0 %v730_v30  ;;  %v695_v31 = vpop.xlane.xlu0 %694  ;;  %v698_v32 = vpop.xlane.xlu1 %697 }
  0xa8   : > { %v710_v34 = vmul.f32 0.03125, %v695_v31  ;;  %v711_v35 = vmul.f32 0.03125, %v698_v32  ;;  %v723_v36 = vmul.f32 %v6951_v28, %v6951_v28  ;;  %v725_v37 = vmul.f32 %v6953_v29, %v6953_v29  ;;  %v5293_v32 = vld [vmem:[%s8329_s22] ss:$0 sm:$0xff] }
  0xaa   : > { %v6961_v38 = vsub.f32 %v661_v8, %v710_v34  ;;  %v6963_v39 = vsub.f32 %v662_v9, %v711_v35  ;;  %v733_v40 = vsel %vm680_vm0, %v723_v36, 0.0  ;;  %v739_v43 = vsel %vm680_vm0, %v725_v37, 0.0 }
  0xab   : > { %737 = vadd.xlane.f32.xlu0 %v736_v33  ;;  %734 = vadd.xlane.f32.xlu1 %v733_v40  ;;  %v701_v41 = vpop.xlane.xlu0 %700  ;;  %v704_v42 = vpop.xlane.xlu1 %703 }
  0xac   : > { %v712_v44 = vmul.f32 0.03125, %v701_v41  ;;  %v713_v45 = vmul.f32 0.03125, %v704_v42  ;;  %v726_v46 = vmul.f32 %v6961_v38, %v6961_v38  ;;  %v727_v47 = vmul.f32 %v6963_v39, %v6963_v39 }
  0xae   : > { %v6971_v48 = vsub.f32 %v663_v12, %v712_v44  ;;  %v6973_v49 = vsub.f32 %v664_v13, %v713_v45  ;;  %v742_v50 = vsel %vm680_vm0, %v726_v46, 0.0  ;;  %v745_v51 = vsel %vm680_vm0, %v727_v47, 0.0 }
  0xaf   : > { %740 = vadd.xlane.f32.xlu1 %v739_v43  ;;  %743 = vadd.xlane.f32.xlu0 %v742_v50 }
  0xb0   : > { %v728_v52 = vmul.f32 %v6971_v48, %v6971_v48  ;;  %v729_v53 = vmul.f32 %v6973_v49, %v6973_v49 }
  0xb2   : > { %v748_v54 = vsel %vm680_vm0, %v728_v52, 0.0  ;;  %v751_v55 = vsel %vm680_vm0, %v729_v53, 0.0 }
  0xb3   : > { %746 = vadd.xlane.f32.xlu1 %v745_v51  ;;  %749 = vadd.xlane.f32.xlu0 %v748_v54 }
  0xb7   : > { %752 = vadd.xlane.f32.xlu1 %v751_v55 }
 0x130   : > { %v732_v1 = vpop.xlane.xlu0 %731 }
 0x131   : > { %v754_v2 = vmul.f32 0.03125, %v732_v1 }
 0x133   : > { %v762_v3 = vadd.f32 1e-05, %v754_v2 }
 0x134   : > { %v735_v4 = vpop.xlane.xlu1 %734  ;;  %v738_v5 = vpop.xlane.xlu0 %737 }
 0x135   : > { %6591 = vrsqrt.f32 %v762_v3  ;;  %v755_v6 = vmul.f32 0.03125, %v735_v4  ;;  %v756_v7 = vmul.f32 0.03125, %v738_v5 }
 0x137   : > { %v763_v8 = vadd.f32 1e-05, %v755_v6  ;;  %v764_v9 = vadd.f32 1e-05, %v756_v7 }
 0x138   : > { %v741_v10 = vpop.xlane.xlu1 %740  ;;  %v744_v11 = vpop.xlane.xlu0 %743 }
 0x139   : > { %6593 = vrsqrt.f32 %v763_v8  ;;  %v757_v12 = vmul.f32 0.03125, %v741_v10  ;;  %v758_v13 = vmul.f32 0.03125, %v744_v11 }
 0x13a   : > { %6595 = vrsqrt.f32 %v764_v9 }
 0x13b   : > { %v765_v14 = vadd.f32 1e-05, %v757_v12  ;;  %v766_v15 = vadd.f32 1e-05, %v758_v13 }
 0x13c   : > { %v747_v16 = vpop.xlane.xlu1 %746  ;;  %v750_v17 = vpop.xlane.xlu0 %749 }
 0x13d   : > { %6597 = vrsqrt.f32 %v765_v14  ;;  %v759_v18 = vmul.f32 0.03125, %v747_v16  ;;  %v760_v19 = vmul.f32 0.03125, %v750_v17 }
 0x13e   : > { %6599 = vrsqrt.f32 %v766_v15 }
 0x13f   : > { %v767_v22 = vadd.f32 1e-05, %v759_v18  ;;  %v768_v23 = vadd.f32 1e-05, %v760_v19 }
 0x140   : > { %v753_v24 = vpop.xlane.xlu1 %752 }
 0x141   : > { %6601 = vrsqrt.f32 %v767_v22  ;;  %v761_v25 = vmul.f32 0.03125, %v753_v24 }
 0x142   : > { %v6592_v26 = vpop.eup %6591  ;;  %6603 = vrsqrt.f32 %v768_v23 }
 0x143   : > { %v7017_v30 = vmul.f32 %v6592_v26, %v6943_v20  ;;  %v769_v31 = vadd.f32 1e-05, %v761_v25  ;;  %v5365_v25 = vld [vmem:[%s8327_s30 + $0x78] sm:$0xff] }
 0x145   : > { %v792_v33 = vmul.f32 %v5292_v27, %v7017_v30  ;;  %6605 = vrsqrt.f32 %v769_v31  ;;  %v5364_v31 = vld [vmem:[%s8327_s30 + $0x70] sm:$0xff] }
 0x146   : > { %v6594_v34 = vpop.eup %6593 }
 0x147   : > { %v6596_v35 = vpop.eup %6595  ;;  %v7024_v36 = vmul.f32 %v6594_v34, %v6951_v28  ;;  %v7026_v37 = vadd.f32 %v5293_v32, %v792_v33 }
 0x148   : > { %v7029_v40 = vmul.f32 %v6596_v35, %v6945_v21  ;;  %v5362_v35 = vld [vmem:[%s8327_s30 + $0x60] sm:$0xff] }
 0x149   : > { %v793_v20 = vmul.f32 %v5292_v27, %v7024_v36  ;;  %5975 = vmatprep.mubr.msk.f32.mxu0 %vm680_vm0, %v7026_v37  ;;  %5995 = vmatprep.mubr.msk.f32.mxu1 %vm680_vm0, %v7026_v37 }
 0x14a   : > { %v6598_v41 = vpop.eup %6597  ;;  %v794_v42 = vmul.f32 %v5292_v27, %v7029_v40 }
 0x14b   : > { %v6600_v43 = vpop.eup %6599  ;;  %v7038_v28 = vmul.f32 %v6598_v41, %v6953_v29  ;;  %v7040_v44 = vadd.f32 %v5293_v32, %v793_v20  ;;  %v5316_v29 = vld [vmem:[%s8327_s30 + $0x90] sm:$0xff] }
 0x14c   : > { %v7043_v21 = vmul.f32 %v6600_v43, %v6961_v38  ;;  %v7045_v45 = vadd.f32 %v5293_v32, %v794_v42  ;;  %v7186_v43 = vld [vmem:[%s8330_s0 + $0x8] sm:$0xff] }
 0x14d   : > { %v795_v46 = vmul.f32 %v5292_v27, %v7038_v28  ;;  %5976 = vmatmul.mubr.msk.f32.vlgmr.msra.gmra.mxu0 %vm680_vm0, %v7040_v44  ;;  %5996 = vmatmul.mubr.msk.f32.vlgmr.msra.gmra.mxu1 %vm680_vm0, %v7040_v44 }
 0x14e   : > { %v6602_v47 = vpop.eup %6601  ;;  %v796_v50 = vmul.f32 %v5292_v27, %v7043_v21  ;;  %5978 = vmatprep.mubr.msk.f32.mxu0 %vm680_vm0, %v7045_v45  ;;  %5998 = vmatprep.mubr.msk.f32.mxu1 %vm680_vm0, %v7045_v45 }
 0x14f   : > { %v6604_v38 = vpop.eup %6603  ;;  %v7061_v51 = vmul.f32 %v6602_v47, %v6963_v39  ;;  %v7063_v52 = vadd.f32 %v5293_v32, %v795_v46  ;;  %6008 = vmatpush3.msra.mxu0 %v7010_v0  ;;  %v5315_v39 = vld [vmem:[%s8327_s30 + $0x88] sm:$0xff] }
 0x150   : > { %v7067_v53 = vmul.f32 %v6604_v38, %v6971_v48  ;;  %v7069_v54 = vadd.f32 %v5293_v32, %v796_v50  ;;  %6009 = vmatprep.subr.mxu0 %v5316_v29  ;;  %v7199_v38 = vld [vmem:[%s8330_s0 + $0x18] sm:$0xff] }
 0x151   : > { %v797_v55 = vmul.f32 %v5292_v27, %v7061_v51  ;;  %5979 = vmatmul.mubr.msk.f32.gmra.mxu0 %vm680_vm0, %v7063_v52  ;;  %5999 = vmatmul.mubr.msk.f32.gmra.mxu1 %vm680_vm0, %v7063_v52 }
 0x152   : > { %v6606_v56 = vpop.eup %6605  ;;  %v798_v57 = vmul.f32 %v5292_v27, %v7067_v53  ;;  %5981 = vmatprep.mubr.msk.f32.mxu0 %vm680_vm0, %v7069_v54  ;;  %6001 = vmatprep.mubr.msk.f32.mxu1 %vm680_vm0, %v7069_v54 }
 0x153   : > { %v7085_v48 = vmul.f32 %v6606_v56, %v6973_v49  ;;  %v7087_v58 = vadd.f32 %v5293_v32, %v797_v55  ;;  %6010 = vmatpush3.msra.mxu0 %v5316_v29  ;;  %v7191_v29 = vld [vmem:[%s8330_s0] sm:$0xff] }
 0x154   : > { %v7089_v59 = vadd.f32 %v5293_v32, %v798_v57  ;;  %6011 = vmatprep.subr.mxu0 %v5315_v39  ;;  %v7209_v57 = vld [vmem:[%s8330_s0 + $0x10] sm:$0xff] }
 0x155   : > { %v799_v60 = vmul.f32 %v5292_v27, %v7085_v48  ;;  %5982 = vmatmul.mubr.msk.f32.gmra.mxu0 %vm680_vm0, %v7087_v58  ;;  %6002 = vmatmul.mubr.msk.f32.gmra.mxu1 %vm680_vm0, %v7087_v58 }
 0x156   : > { %5984 = vmatprep.mubr.msk.f32.mxu0 %vm680_vm0, %v7089_v59  ;;  %6004 = vmatprep.mubr.msk.f32.mxu1 %vm680_vm0, %v7089_v59 }
 0x157   : > { %v7103_v49 = vadd.f32 %v5293_v32, %v799_v60  ;;  %6012 = vmatpush3.msra.mxu0 %v5315_v39  ;;  %v5363_v32 = vld [vmem:[%s8327_s30 + $0x68] sm:$0xff] }
 0x158   : > { %6013 = vmatprep.subr.mxu0 %v5314_v61 }
 0x159   : > { %5985 = vmatmul.mubr.msk.f32.gmra.mxu0 %vm680_vm0, %v7103_v49  ;;  %6005 = vmatmul.mubr.msk.f32.gmra.mxu1 %vm680_vm0, %v7103_v49 }
 0x15a   : > { %6015 = vmatprep.mubr.msk.f32.mxu0 %vm680_vm0, %v7026_v37  ;;  %6014 = vmatpush3.msra.mxu0 %v5314_v61 }
 0x15d   : > { %6016 = vmatmul.mubr.msk.f32.vlgmr.msra.gmra.mxu0 %vm680_vm0, %v7040_v44 }
 0x15e   : > { %6018 = vmatprep.mubr.msk.f32.mxu0 %vm680_vm0, %v7045_v45 }
 0x161   : > { %6019 = vmatmul.mubr.msk.f32.gmra.mxu0 %vm680_vm0, %v7063_v52 }
 0x162   : > { %6021 = vmatprep.mubr.msk.f32.mxu0 %vm680_vm0, %v7069_v54 }
 0x165   : > { %6022 = vmatmul.mubr.msk.f32.gmra.mxu0 %vm680_vm0, %v7087_v58 }
 0x166   : > { %6024 = vmatprep.mubr.msk.f32.mxu0 %vm680_vm0, %v7089_v59 }
 0x169   : > { %6025 = vmatmul.mubr.msk.f32.gmra.mxu0 %vm680_vm0, %v7103_v49 }
 0x20d   : > { %v5977_v62 = vpop.f32.mrf.mxu0  ;;  %v5997_v63 = vpop.f32.mrf.mxu1 }
 0x20e   : > { %v948_v26 = vmul.f32 0.25, %v5977_v62 }
 0x20f   : > { %v908_v0 = vpop.f32.mrf.mxu0  ;;  %v1026_v1 = vpop.f32.mrf.mxu1 }
 0x210   : > { %v947_v2 = vmul.f32 0.25, %v908_v0 }
 0x211   : > { %v5980_v3 = vpop.f32.mrf.mxu0  ;;  %v6000_v4 = vpop.f32.mrf.mxu1 }
 0x212   : > { %6043 = vmatprep.mubr.msk.f32.mxu1 %vm1175_vm1, %v947_v2  ;;  %v950_v33 = vmul.f32 0.25, %v5980_v3  ;;  %v7229_v3 = vld [vmem:[%s8330_s0 + $0x20] sm:$0xff] }
 0x213   : > { %v918_v5 = vpop.f32.mrf.mxu0  ;;  %v1036_v6 = vpop.f32.mrf.mxu1 }
 0x214   : > { %v949_v27 = vmul.f32 0.25, %v918_v5 }
 0x215   : > { %v7126_v7 = vpop.f32.mrf.mxu0  ;;  %v6003_v8 = vpop.f32.mrf.mxu1 }
 0x216   : > { %v952_v20 = vmul.f32 0.25, %v7126_v7  ;;  %v7237_v7 = vld [vmem:[%s8330_s0 + $0x38] sm:$0xff] }
 0x217   : > { %v928_v9 = vpop.f32.mrf.mxu0  ;;  %v1046_v10 = vpop.f32.mrf.mxu1 }
 0x218   : > { %v951_v34 = vmul.f32 0.25, %v928_v9 }
 0x219   : > { %v7128_v11 = vpop.f32.mrf.mxu0  ;;  %v6006_v12 = vpop.f32.mrf.mxu1 }
 0x21a   : > { %6027 = vmatprep.subr.msk.mxu1 %vm1175_vm1, %v6006_v12  ;;  %v954_v42 = vmul.f32 0.25, %v7128_v11  ;;  %v7244_v11 = vld [vmem:[%s8330_s0 + $0x30] sm:$0xff] }
 0x21b   : > { %v938_v13 = vpop.f32.mrf.mxu0  ;;  %v1056_v14 = vpop.f32.mrf.mxu1  ;;  %6028 = vmatpush3.xpose.msk.msra.mxu1 %vm1175_vm1, %v6006_v12 }
 0x21c   : > { %6029 = vmatprep.subr.msk.mxu1 %vm1175_vm1, %v1056_v14  ;;  %v953_v41 = vmul.f32 0.25, %v938_v13 }
 0x21d   : > { %v6017_v15 = vpop.f32.mrf.mxu0 }
 0x21f   : > { %v1136_v16 = vpop.f32.mrf.mxu0  ;;  %6030 = vmatpush3.xpose.msk.msra.mxu1 %vm1175_vm1, %v1056_v14 }
 0x220   : > { %6031 = vmatprep.subr.msk.mxu1 %vm1175_vm1, %v6003_v8 }
 0x221   : > { %v6020_v17 = vpop.f32.mrf.mxu0 }
 0x223   : > { %v1146_v18 = vpop.f32.mrf.mxu0  ;;  %6032 = vmatpush3.xpose.msk.msra.mxu1 %vm1175_vm1, %v6003_v8 }
 0x224   : > { %6033 = vmatprep.subr.msk.mxu1 %vm1175_vm1, %v1046_v10 }
 0x225   : > { %v6023_v19 = vpop.f32.mrf.mxu0 }
 0x227   : > { %v1156_v22 = vpop.f32.mrf.mxu0  ;;  %6034 = vmatpush3.xpose.msk.msra.mxu1 %vm1175_vm1, %v1046_v10 }
 0x228   : > { %6035 = vmatprep.subr.msk.mxu1 %vm1175_vm1, %v6000_v4 }
 0x229   : > { %v6026_v23 = vpop.f32.mrf.mxu0 }
 0x22a   : > { %6055 = vmatprep.subr.mxu0 %v6026_v23 }
 0x22b   : > { %v1166_v24 = vpop.f32.mrf.mxu0  ;;  %6036 = vmatpush3.xpose.msk.msra.mxu1 %vm1175_vm1, %v6000_v4  ;;  %6056 = vmatpush3.msra.mxu0 %v6026_v23 }
 0x22c   : > { %6037 = vmatprep.subr.msk.mxu1 %vm1175_vm1, %v1036_v6  ;;  %6057 = vmatprep.subr.mxu0 %v1166_v24 }
 0x22d   : > { %6058 = vmatpush3.msra.mxu0 %v1166_v24 }
 0x22e   : > { %6059 = vmatprep.subr.mxu0 %v6023_v19 }
 0x22f   : > { %6038 = vmatpush3.xpose.msk.msra.mxu1 %vm1175_vm1, %v1036_v6  ;;  %6060 = vmatpush3.msra.mxu0 %v6023_v19 }
 0x230   : > { %6039 = vmatprep.subr.msk.mxu1 %vm1175_vm1, %v5997_v63  ;;  %6061 = vmatprep.subr.mxu0 %v1156_v22 }
 0x231   : > { %6062 = vmatpush3.msra.mxu0 %v1156_v22 }
 0x232   : > { %6063 = vmatprep.subr.mxu0 %v6020_v17 }
 0x233   : > { %6040 = vmatpush3.xpose.msk.msra.mxu1 %vm1175_vm1, %v5997_v63  ;;  %6064 = vmatpush3.msra.mxu0 %v6020_v17  ;;  %v7219_v63 = vld [vmem:[%s8330_s0 + $0x28] sm:$0xff] }
 0x234   : > { %6041 = vmatprep.subr.msk.mxu1 %vm1175_vm1, %v1026_v1  ;;  %6065 = vmatprep.subr.mxu0 %v1146_v18 }
 0x235   : > { %6066 = vmatpush3.msra.mxu0 %v1146_v18 }
 0x236   : > { %6067 = vmatprep.subr.mxu0 %v6017_v15 }
 0x237   : > { %6042 = vmatpush3.xpose.msk.msra.mxu1 %vm1175_vm1, %v1026_v1  ;;  %6068 = vmatpush3.msra.mxu0 %v6017_v15 }
 0x238   : > { %6069 = vmatprep.subr.mxu0 %v1136_v16  ;;  %6103 = vmatprep.subr.mxu1 %v5365_v25 }
 0x239   : > { %6070 = vmatpush3.msra.mxu0 %v1136_v16 }
 0x23a   : > { %6044 = vmatmul.mubr.msk.f32.vlgmr.msra.gmra.mxu1 %vm1175_vm1, %v948_v26 }
 0x23b   : > { %6046 = vmatprep.mubr.msk.f32.mxu1 %vm1175_vm1, %v949_v27  ;;  %6104 = vmatpush3.msra.mxu1 %v5365_v25 }
 0x23c   : > { %6105 = vmatprep.subr.mxu1 %v5364_v31 }
 0x23d   : > { %6106 = vmatpush3.msra.mxu1 %v5364_v31 }
 0x23e   : > { %6047 = vmatmul.mubr.msk.f32.gmra.mxu1 %vm1175_vm1, %v950_v33  ;;  %6107 = vmatprep.subr.mxu1 %v5363_v32 }
 0x23f   : > { %6049 = vmatprep.mubr.msk.f32.mxu1 %vm1175_vm1, %v951_v34  ;;  %6108 = vmatpush3.msra.mxu1 %v5363_v32 }
 0x240   : > { %6109 = vmatprep.subr.mxu1 %v5362_v35 }
 0x241   : > { %6110 = vmatpush3.msra.mxu1 %v5362_v35 }
 0x242   : > { %6050 = vmatmul.mubr.msk.f32.gmra.mxu1 %vm1175_vm1, %v952_v20 }
 0x243   : > { %6052 = vmatprep.mubr.msk.f32.mxu1 %vm1175_vm1, %v953_v41 }
 0x246   : > { %6053 = vmatmul.mubr.msk.f32.gmra.mxu1 %vm1175_vm1, %v954_v42 }
 0x247   : > { %6111 = vmatprep.mubr.msk.f32.mxu1 %vm680_vm0, %v7026_v37 }
 0x24a   : > { %6112 = vmatmul.mubr.msk.f32.vlgmr.msra.gmra.mxu1 %vm680_vm0, %v7040_v44 }
 0x24b   : > { %6114 = vmatprep.mubr.msk.f32.mxu1 %vm680_vm0, %v7045_v45 }
 0x24e   : > { %6115 = vmatmul.mubr.msk.f32.gmra.mxu1 %vm680_vm0, %v7063_v52 }
 0x24f   : > { %6117 = vmatprep.mubr.msk.f32.mxu1 %vm680_vm0, %v7069_v54 }
 0x252   : > { %6118 = vmatmul.mubr.msk.f32.gmra.mxu1 %vm680_vm0, %v7087_v58 }
 0x253   : > { %6120 = vmatprep.mubr.msk.f32.mxu1 %vm680_vm0, %v7089_v59 }
 0x256   : > { %6121 = vmatmul.mubr.msk.f32.gmra.mxu1 %vm680_vm0, %v7103_v49 }
 0x2fa   : > { %v6045_v46 = vpop.f32.mrf.mxu1 }
 0x2fb   : > { %v7194_v47 = vadd.f32 %v6045_v46, %v7186_v43 }
 0x2fc   : > { %v1290_v50 = vpop.f32.mrf.mxu1 }
 0x2fd   : > { %v7202_v55 = vadd.f32 %v1290_v50, %v7191_v29  ;;  %v1333_v39 = vsel %vm1329_vm2, %v7194_v47, -inf }
 0x2fe   : > { %1334 = vmax.xlane.f32.xlu1 %v1333_v39  ;;  %v6048_v56 = vpop.f32.mrf.mxu1 }
 0x2ff   : > { %v7212_v60 = vadd.f32 %v6048_v56, %v7199_v38  ;;  %v1330_v61 = vsel %vm1329_vm2, %v7202_v55, -inf }
 0x300   : > { %v1300_v62 = vpop.f32.mrf.mxu1  ;;  %1331 = vmax.xlane.f32.xlu0 %v1330_v61 }
 0x301   : > { %v7222_v0 = vadd.f32 %v1300_v62, %v7209_v57  ;;  %v1339_v1 = vsel %vm1329_vm2, %v7212_v60, -inf }
 0x302   : > { %1340 = vmax.xlane.f32.xlu1 %v1339_v1  ;;  %v6051_v2 = vpop.f32.mrf.mxu1 }
 0x303   : > { %v1316_v4 = vadd.f32 %v6051_v2, %v7219_v63  ;;  %v1336_v5 = vsel %vm1329_vm2, %v7222_v0, -inf }
 0x304   : > { %v1310_v6 = vpop.f32.mrf.mxu1  ;;  %1337 = vmax.xlane.f32.xlu0 %v1336_v5 }
 0x305   : > { %v1311_v8 = vadd.f32 %v1310_v6, %v7229_v3  ;;  %v1345_v9 = vsel %vm1329_vm2, %v1316_v4, -inf }
 0x306   : > { %1346 = vmax.xlane.f32.xlu1 %v1345_v9  ;;  %v6054_v10 = vpop.f32.mrf.mxu1 }
 0x307   : > { %v1326_v12 = vadd.f32 %v6054_v10, %v7237_v7  ;;  %v1342_v13 = vsel %vm1329_vm2, %v1311_v8, -inf }
 0x308   : > { %1343 = vmax.xlane.f32.xlu0 %v1342_v13  ;;  %v1320_v14 = vpop.f32.mrf.mxu1 }
 0x309   : > { %v1321_v15 = vadd.f32 %v1320_v14, %v7244_v11  ;;  %v1351_v16 = vsel %vm1329_vm2, %v1326_v12, -inf }
 0x30a   : > { %1352 = vmax.xlane.f32.xlu1 %v1351_v16  ;;  %v6113_v17 = vpop.f32.mrf.mxu1 }
 0x30b   : > { %v1348_v18 = vsel %vm1329_vm2, %v1321_v15, -inf }
 0x30c   : > { %v1736_v19 = vpop.f32.mrf.mxu1  ;;  %1349 = vmax.xlane.f32.xlu0 %v1348_v18 }
 0x30e   : > { %v6116_v22 = vpop.f32.mrf.mxu1 }
 0x310   : > { %v1746_v23 = vpop.f32.mrf.mxu1 }
 0x312   : > { %v6119_v24 = vpop.f32.mrf.mxu1 }
 0x314   : > { %v1756_v25 = vpop.f32.mrf.mxu1 }
 0x316   : > { %v6122_v26 = vpop.f32.mrf.mxu1 }
 0x317   : > { %6143 = vmatprep.subr.msk.mxu1 %vm1175_vm1, %v6122_v26 }
 0x318   : > { %v1766_v27 = vpop.f32.mrf.mxu1  ;;  %6144 = vmatpush3.xpose.msk.msra.mxu1 %vm1175_vm1, %v6122_v26 }
 0x319   : > { %6145 = vmatprep.subr.msk.mxu1 %vm1175_vm1, %v1766_v27 }
 0x31c   : > { %6146 = vmatpush3.xpose.msk.msra.mxu1 %vm1175_vm1, %v1766_v27 }
 0x31d   : > { %6147 = vmatprep.subr.msk.mxu1 %vm1175_vm1, %v6119_v24 }
 0x320   : > { %6148 = vmatpush3.xpose.msk.msra.mxu1 %vm1175_vm1, %v6119_v24 }
 0x321   : > { %6149 = vmatprep.subr.msk.mxu1 %vm1175_vm1, %v1756_v25 }
 0x324   : > { %6150 = vmatpush3.xpose.msk.msra.mxu1 %vm1175_vm1, %v1756_v25 }
 0x325   : > { %6151 = vmatprep.subr.msk.mxu1 %vm1175_vm1, %v6116_v22 }
 0x328   : > { %6152 = vmatpush3.xpose.msk.msra.mxu1 %vm1175_vm1, %v6116_v22 }
 0x329   : > { %6153 = vmatprep.subr.msk.mxu1 %vm1175_vm1, %v1746_v23 }
 0x32c   : > { %6154 = vmatpush3.xpose.msk.msra.mxu1 %vm1175_vm1, %v1746_v23 }
 0x32d   : > { %6155 = vmatprep.subr.msk.mxu1 %vm1175_vm1, %v6113_v17 }
 0x330   : > { %6156 = vmatpush3.xpose.msk.msra.mxu1 %vm1175_vm1, %v6113_v17 }
 0x331   : > { %6157 = vmatprep.subr.msk.mxu1 %vm1175_vm1, %v1736_v19 }
 0x334   : > { %6158 = vmatpush3.xpose.msk.msra.mxu1 %vm1175_vm1, %v1736_v19 }
 0x387   : > { %v1335_v31 = vpop.xlane.xlu1 %1334 }
 0x388   : > { %v1355_v32 = vsub.f32 %v7194_v47, %v1335_v31  ;;  %v5353_v31 = vld [vmem:[%s8327_s30 + $0x38] sm:$0xff] }
 0x389   : > { %v1332_v33 = vpop.xlane.xlu0 %1331  ;;  %6083 = vmatprep.subr.mxu0 %v5353_v31 }
 0x38a   : > { %v1364_v34 = vmul.f32 1.442695, %v1355_v32  ;;  %v1354_v35 = vsub.f32 %v7202_v55, %v1332_v33 }
 0x38b   : > { %v1341_v20 = vpop.xlane.xlu1 %1340 }
 0x38c   : > { %6607 = vpow2.f32 %v1364_v34  ;;  %v1362_v41 = vmul.f32 1.442695, %v1354_v35  ;;  %v1357_v42 = vsub.f32 %v7212_v60, %v1341_v20 }
 0x38d   : > { %v1338_v46 = vpop.xlane.xlu0 %1337 }
 0x38e   : > { %6609 = vpow2.f32 %v1362_v41  ;;  %v1368_v50 = vmul.f32 1.442695, %v1357_v42  ;;  %v1356_v39 = vsub.f32 %v7222_v0, %v1338_v46 }
 0x38f   : > { %v1347_v56 = vpop.xlane.xlu1 %1346 }
 0x390   : > { %6611 = vpow2.f32 %v1368_v50  ;;  %v1366_v61 = vmul.f32 1.442695, %v1356_v39  ;;  %v1359_v62 = vsub.f32 %v1316_v4, %v1347_v56 }
 0x391   : > { %v1344_v1 = vpop.xlane.xlu0 %1343 }
 0x392   : > { %6613 = vpow2.f32 %v1366_v61  ;;  %v1372_v47 = vmul.f32 1.442695, %v1359_v62  ;;  %v1358_v2 = vsub.f32 %v1311_v8, %v1344_v1  ;;  %v5352_v1 = vld [vmem:[%s8327_s30 + $0x30] sm:$0xff] }
 0x393   : > { %v1353_v5 = vpop.xlane.xlu1 %1352 }
 0x394   : > { %6615 = vpow2.f32 %v1372_v47  ;;  %v1370_v55 = vmul.f32 1.442695, %v1358_v2  ;;  %v1361_v6 = vsub.f32 %v1326_v12, %v1353_v5  ;;  %v5351_v5 = vld [vmem:[%s8327_s30 + $0x28] sm:$0xff] }
 0x395   : > { %v1350_v9 = vpop.xlane.xlu0 %1349 }
 0x396   : > { %6617 = vpow2.f32 %v1370_v55  ;;  %v1376_v60 = vmul.f32 1.442695, %v1361_v6  ;;  %v1360_v10 = vsub.f32 %v1321_v15, %v1350_v9  ;;  %v5350_v9 = vld [vmem:[%s8327_s30 + $0x20] sm:$0xff] }
 0x398   : > { %6619 = vpow2.f32 %v1376_v60  ;;  %v1374_v13 = vmul.f32 1.442695, %v1360_v10 }
 0x399   : > { %v6608_v14 = vpop.eup %6607 }
 0x39a   : > { %6621 = vpow2.f32 %v1374_v13  ;;  %v1381_v0 = vsel %vm1329_vm2, %v6608_v14, 0.0  ;;  %v5377_v13 = vld [vmem:[%s8327_s30 + $0xb8] sm:$0xff] }
 0x39b   : > { %v6610_v16 = vpop.eup %6609  ;;  %1382 = vadd.xlane.f32.xlu1 %v1381_v0 }
 0x39c   : > { %v1378_v4 = vsel %vm1329_vm2, %v6610_v16, 0.0 }
 0x39d   : > { %v6612_v17 = vpop.eup %6611  ;;  %1379 = vadd.xlane.f32.xlu0 %v1378_v4 }
 0x39e   : > { %v1387_v8 = vsel %vm1329_vm2, %v6612_v17, 0.0 }
 0x39f   : > { %v6614_v18 = vpop.eup %6613  ;;  %1388 = vadd.xlane.f32.xlu1 %v1387_v8  ;;  %v5376_v8 = vld [vmem:[%s8327_s30 + $0xb0] sm:$0xff] }
 0x3a0   : > { %v1384_v12 = vsel %vm1329_vm2, %v6614_v18, 0.0 }
 0x3a1   : > { %v6616_v19 = vpop.eup %6615  ;;  %1385 = vadd.xlane.f32.xlu0 %v1384_v12  ;;  %v5374_v12 = vld [vmem:[%s8327_s30 + $0xa0] sm:$0xff] }
 0x3a2   : > { %v1393_v15 = vsel %vm1329_vm2, %v6616_v19, 0.0 }
 0x3a3   : > { %v6618_v22 = vpop.eup %6617  ;;  %1394 = vadd.xlane.f32.xlu1 %v1393_v15 }
 0x3a4   : > { %v1390_v23 = vsel %vm1329_vm2, %v6618_v22, 0.0 }
 0x3a5   : > { %v6620_v24 = vpop.eup %6619  ;;  %1391 = vadd.xlane.f32.xlu0 %v1390_v23 }
 0x3a6   : > { %v1399_v25 = vsel %vm1329_vm2, %v6620_v24, 0.0 }
 0x3a7   : > { %v6622_v26 = vpop.eup %6621  ;;  %1400 = vadd.xlane.f32.xlu1 %v1399_v25 }
 0x3a8   : > { %v1396_v27 = vsel %vm1329_vm2, %v6622_v26, 0.0 }
 0x3a9   : > { %1397 = vadd.xlane.f32.xlu0 %v1396_v27 }
 0x424   : > { %v1383_v32 = vpop.xlane.xlu1 %1382 }
 0x425   : > { %6623 = vrcp.f32 %v1383_v32  ;;  %v5440_v32 = vld [vmem:[%s8305_s10 + $0x58] sm:$0xff] }
 0x426   : > { %v1380_v33 = vpop.xlane.xlu0 %1379 }
 0x427   : > { %6625 = vrcp.f32 %v1380_v33 }
 0x428   : > { %v1389_v34 = vpop.xlane.xlu1 %1388 }
 0x429   : > { %6627 = vrcp.f32 %v1389_v34 }
 0x42a   : > { %v1386_v35 = vpop.xlane.xlu0 %1385 }
 0x42b   : > { %6629 = vrcp.f32 %v1386_v35 }
 0x42c   : > { %v1395_v20 = vpop.xlane.xlu1 %1394 }
 0x42d   : > { %6631 = vrcp.f32 %v1395_v20 }
 0x42e   : > { %v1392_v41 = vpop.xlane.xlu0 %1391 }
 0x42f   : > { %6633 = vrcp.f32 %v1392_v41 }
 0x430   : > { %v1401_v42 = vpop.xlane.xlu1 %1400 }
 0x431   : > { %6635 = vrcp.f32 %v1401_v42 }
 0x432   : > { %v1398_v46 = vpop.xlane.xlu0 %1397  ;;  %v6624_v50 = vpop.eup %6623 }
 0x433   : > { %6637 = vrcp.f32 %v1398_v46  ;;  %v1411_v61 = vmul.f32 %v6624_v50, %v6608_v14 }
 0x434   : > { %v6626_v39 = vpop.eup %6625 }
 0x435   : > { %v1410_v56 = vmul.f32 %v6626_v39, %v6610_v16 }
 0x436   : > { %v6628_v62 = vpop.eup %6627 }
 0x437   : > { %6071 = vmatprep.mubr.msk.f32.mxu0 %vm1329_vm2, %v1410_v56  ;;  %v1413_v55 = vmul.f32 %v6628_v62, %v6612_v17 }
 0x438   : > { %v6630_v47 = vpop.eup %6629  ;;  %6072 = vmatmul.mubr.msk.f32.vlgmr.msra.gmra.mxu0 %vm1329_vm2, %v1411_v61 }
 0x439   : > { %6084 = vmatpush3.msra.mxu0 %v5353_v31  ;;  %v1412_v2 = vmul.f32 %v6630_v47, %v6614_v18  ;;  %v5375_v18 = vld [vmem:[%s8327_s30 + $0xa8] sm:$0xff] }
 0x43a   : > { %6085 = vmatprep.subr.mxu0 %v5352_v1  ;;  %v6632_v6 = vpop.eup %6631 }
 0x43b   : > { %6074 = vmatprep.mubr.msk.f32.mxu0 %vm1329_vm2, %v1412_v2  ;;  %6086 = vmatpush3.msra.mxu0 %v5352_v1  ;;  %v1415_v14 = vmul.f32 %v6632_v6, %v6616_v19  ;;  %v5439_v1 = vld [vmem:[%s8305_s10 + $0x50] sm:$0xff]  ;;  %v5438_v2 = vld [vmem:[%s8305_s10 + $0x48] sm:$0xff]  ;;  %v5427_v6 = vld [vmem:[%s8303_s8] ss:$0 sm:$0xff] }
 0x43c   : > { %v6634_v60 = vpop.eup %6633  ;;  %6075 = vmatmul.mubr.msk.f32.gmra.mxu0 %vm1329_vm2, %v1413_v55  ;;  %6087 = vmatprep.subr.mxu0 %v5351_v5  ;;  %v5437_v55 = vld [vmem:[%s8305_s10 + $0x40] sm:$0xff] }
 0x43d   : > { %v1414_v10 = vmul.f32 %v6634_v60, %v6618_v22  ;;  %6088 = vmatpush3.msra.mxu0 %v5351_v5 }
 0x43e   : > { %6089 = vmatprep.subr.mxu0 %v5350_v9  ;;  %v6636_v0 = vpop.eup %6635 }
 0x43f   : > { %6077 = vmatprep.mubr.msk.f32.mxu0 %vm1329_vm2, %v1414_v10  ;;  %6090 = vmatpush3.msra.mxu0 %v5350_v9  ;;  %v1417_v17 = vmul.f32 %v6636_v0, %v6620_v24  ;;  %v2548_v10 = vmul.f32 %v5427_v6, %v7017_v30  ;;  %v2549_v0 = vmul.f32 %v5427_v6, %v7024_v36 }
 0x440   : > { %v6638_v16 = vpop.eup %6637  ;;  %6078 = vmatmul.mubr.msk.f32.gmra.mxu0 %vm1329_vm2, %v1415_v14  ;;  %6123 = vmatprep.subr.mxu0 %v5377_v13  ;;  %v5428_v14 = vld [vmem:[%s8304_s9] ss:$0 sm:$0xff]  ;;  %v2552_v36 = vmul.f32 %v5427_v6, %v7043_v21 }
 0x441   : > { %v1416_v4 = vmul.f32 %v6638_v16, %v6622_v26  ;;  %v2550_v16 = vmul.f32 %v5427_v6, %v7029_v40  ;;  %v7387_v30 = vadd.f32 %v5428_v14, %v2548_v10 }
 0x442   : > { %v7407_v21 = vadd.f32 %v5428_v14, %v2552_v36 }
 0x443   : > { %6080 = vmatprep.mubr.msk.f32.mxu0 %vm1329_vm2, %v1416_v4  ;;  %v2551_v4 = vmul.f32 %v5427_v6, %v7038_v28  ;;  %v7397_v40 = vadd.f32 %v5428_v14, %v2550_v16 }
 0x444   : > { %6081 = vmatmul.mubr.msk.f32.gmra.mxu0 %vm1329_vm2, %v1417_v17  ;;  %v7394_v17 = vadd.f32 %v5428_v14, %v2549_v0 }
 0x445   : > { %6091 = vmatprep.mubr.msk.f32.mxu0 %vm680_vm0, %v7026_v37  ;;  %v7404_v28 = vadd.f32 %v5428_v14, %v2551_v4 }
 0x448   : > { %6092 = vmatmul.mubr.msk.f32.vlgmr.msra.gmra.mxu0 %vm680_vm0, %v7040_v44 }
 0x449   : > { %6094 = vmatprep.mubr.msk.f32.mxu0 %vm680_vm0, %v7045_v45  ;;  %6124 = vmatpush3.msra.mxu0 %v5377_v13 }
 0x44a   : > { %6125 = vmatprep.subr.mxu0 %v5376_v8 }
 0x44b   : > { %6126 = vmatpush3.msra.mxu0 %v5376_v8  ;;  %v2553_v8 = vmul.f32 %v5427_v6, %v7061_v51 }
 0x44c   : > { %6095 = vmatmul.mubr.msk.f32.gmra.mxu0 %vm680_vm0, %v7063_v52  ;;  %6127 = vmatprep.subr.mxu0 %v5375_v18 }
 0x44d   : > { %6097 = vmatprep.mubr.msk.f32.mxu0 %vm680_vm0, %v7069_v54  ;;  %6128 = vmatpush3.msra.mxu0 %v5375_v18  ;;  %v2554_v18 = vmul.f32 %v5427_v6, %v7067_v53  ;;  %v7414_v51 = vadd.f32 %v5428_v14, %v2553_v8 }
 0x44e   : > { %6129 = vmatprep.subr.mxu0 %v5374_v12 }
 0x44f   : > { %6130 = vmatpush3.msra.mxu0 %v5374_v12  ;;  %v2555_v12 = vmul.f32 %v5427_v6, %v7085_v48 }
 0x450   : > { %6098 = vmatmul.mubr.msk.f32.gmra.mxu0 %vm680_vm0, %v7087_v58 }
 0x451   : > { %6100 = vmatprep.mubr.msk.f32.mxu0 %vm680_vm0, %v7089_v59  ;;  %v7422_v53 = vadd.f32 %v5428_v14, %v2555_v12 }
 0x454   : > { %6101 = vmatmul.mubr.msk.f32.gmra.mxu0 %vm680_vm0, %v7103_v49 }
 0x455   : > { %6131 = vmatprep.mubr.msk.f32.mxu0 %vm680_vm0, %v7026_v37  ;;  %v668_v37 = vld [vmem:[%s8301_s6 + $0x8] sm:$0xff] }
 0x456   : > { %6215 = vmatprep.subr.mxu1 %v668_v37 }
 0x458   : > { %6132 = vmatmul.mubr.msk.f32.vlgmr.msra.gmra.mxu0 %vm680_vm0, %v7040_v44 }
 0x459   : > { %6134 = vmatprep.mubr.msk.f32.mxu0 %vm680_vm0, %v7045_v45 }
 0x45c   : > { %6135 = vmatmul.mubr.msk.f32.gmra.mxu0 %vm680_vm0, %v7063_v52 }
 0x45d   : > { %6137 = vmatprep.mubr.msk.f32.mxu0 %vm680_vm0, %v7069_v54 }
 0x460   : > { %6138 = vmatmul.mubr.msk.f32.gmra.mxu0 %vm680_vm0, %v7087_v58 }
 0x461   : > { %6140 = vmatprep.mubr.msk.f32.mxu0 %vm680_vm0, %v7089_v59 }
 0x464   : > { %6141 = vmatmul.mubr.msk.f32.gmra.mxu0 %vm680_vm0, %v7103_v49  ;;  %v667_v49 = vld [vmem:[%s8301_s6] sm:$0xff] }
 0x4f8   : > { %v6073_v44 = vpop.f32.mrf.mxu0 }
 0x4fa   : > { %v1508_v45 = vpop.f32.mrf.mxu0 }
 0x4fc   : > { %v6076_v52 = vpop.f32.mrf.mxu0 }
 0x4fe   : > { %v1518_v19 = vpop.f32.mrf.mxu0 }
 0x500   : > { %v6079_v15 = vpop.f32.mrf.mxu0 }
 0x502   : > { %v1528_v54 = vpop.f32.mrf.mxu0 }
 0x504   : > { %v7346_v22 = vpop.f32.mrf.mxu0 }
 0x506   : > { %v1538_v58 = vpop.f32.mrf.mxu0 }
 0x508   : > { %v6093_v23 = vpop.f32.mrf.mxu0 }
 0x509   : > { %v1658_v25 = vmul.f32 0.25, %v6093_v23 }
 0x50a   : > { %v1618_v24 = vpop.f32.mrf.mxu0 }
 0x50b   : > { %v1657_v59 = vmul.f32 0.25, %v1618_v24 }
 0x50c   : > { %v6096_v26 = vpop.f32.mrf.mxu0 }
 0x50d   : > { %6159 = vmatprep.mubr.msk.f32.mxu1 %vm1175_vm1, %v1657_v59  ;;  %v1660_v33 = vmul.f32 0.25, %v6096_v26 }
 0x50e   : > { %v1628_v27 = vpop.f32.mrf.mxu0  ;;  %6160 = vmatmul.mubr.msk.f32.vlgmr.msra.gmra.mxu1 %vm1175_vm1, %v1658_v25 }
 0x50f   : > { %v1659_v31 = vmul.f32 0.25, %v1628_v27  ;;  %6216 = vmatpush3.msra.mxu1 %v668_v37  ;;  %v7416_v37 = vadd.f32 %v5428_v14, %v2554_v18 }
 0x510   : > { %v6099_v34 = vpop.f32.mrf.mxu0  ;;  %6217 = vmatprep.subr.mxu1 %v667_v49 }
 0x511   : > { %6162 = vmatprep.mubr.msk.f32.mxu1 %vm1175_vm1, %v1659_v31  ;;  %6218 = vmatpush3.msra.mxu1 %v667_v49  ;;  %v1662_v41 = vmul.f32 0.25, %v6099_v34 }
 0x512   : > { %v1638_v35 = vpop.f32.mrf.mxu0  ;;  %6163 = vmatmul.mubr.msk.f32.gmra.mxu1 %vm1175_vm1, %v1660_v33  ;;  %6251 = vmatprep.subr.mxu1 %v5440_v32 }
 0x513   : > { %v1661_v20 = vmul.f32 0.25, %v1638_v35 }
 0x514   : > { %v6102_v42 = vpop.f32.mrf.mxu0 }
 0x515   : > { %6165 = vmatprep.mubr.msk.f32.mxu1 %vm1175_vm1, %v1661_v20  ;;  %v1664_v39 = vmul.f32 0.25, %v6102_v42 }
 0x516   : > { %v1648_v46 = vpop.f32.mrf.mxu0  ;;  %6166 = vmatmul.mubr.msk.f32.gmra.mxu1 %vm1175_vm1, %v1662_v41 }
 0x517   : > { %v1663_v50 = vmul.f32 0.25, %v1648_v46 }
 0x518   : > { %v6133_v56 = vpop.f32.mrf.mxu0 }
 0x519   : > { %6168 = vmatprep.mubr.msk.f32.mxu1 %vm1175_vm1, %v1663_v50 }
 0x51a   : > { %v1846_v61 = vpop.f32.mrf.mxu0  ;;  %6169 = vmatmul.mubr.msk.f32.gmra.mxu1 %vm1175_vm1, %v1664_v39 }
 0x51b   : > { %6219 = vmatprep.mubr.msk.f32.mxu1 %vm1175_vm1, %v1508_v45 }
 0x51c   : > { %v6136_v62 = vpop.f32.mrf.mxu0 }
 0x51e   : > { %v1856_v47 = vpop.f32.mrf.mxu0  ;;  %6220 = vmatmul.mubr.msk.f32.vlgmr.msra.gmra.mxu1 %vm1175_vm1, %v6073_v44 }
 0x51f   : > { %6222 = vmatprep.mubr.msk.f32.mxu1 %vm1175_vm1, %v1518_v19  ;;  %6252 = vmatpush3.msra.mxu1 %v5440_v32 }
 0x520   : > { %v6139_v5 = vpop.f32.mrf.mxu0  ;;  %6253 = vmatprep.subr.mxu1 %v5439_v1 }
 0x521   : > { %6254 = vmatpush3.msra.mxu1 %v5439_v1 }
 0x522   : > { %v1866_v9 = vpop.f32.mrf.mxu0  ;;  %6223 = vmatmul.mubr.msk.f32.gmra.mxu1 %vm1175_vm1, %v6076_v52  ;;  %6255 = vmatprep.subr.mxu1 %v5438_v2 }
 0x523   : > { %6225 = vmatprep.mubr.msk.f32.mxu1 %vm1175_vm1, %v1528_v54  ;;  %6256 = vmatpush3.msra.mxu1 %v5438_v2 }
 0x524   : > { %v6142_v60 = vpop.f32.mrf.mxu0  ;;  %6257 = vmatprep.subr.mxu1 %v5437_v55 }
 0x525   : > { %6171 = vmatprep.subr.mxu0 %v6142_v60  ;;  %6258 = vmatpush3.msra.mxu1 %v5437_v55 }
 0x526   : > { %v1876_v13 = vpop.f32.mrf.mxu0  ;;  %6172 = vmatpush3.msra.mxu0 %v6142_v60  ;;  %6226 = vmatmul.mubr.msk.f32.gmra.mxu1 %vm1175_vm1, %v6079_v15 }
 0x527   : > { %6173 = vmatprep.subr.mxu0 %v1876_v13  ;;  %6228 = vmatprep.mubr.msk.f32.mxu1 %vm1175_vm1, %v1538_v58 }
 0x528   : > { %6174 = vmatpush3.msra.mxu0 %v1876_v13 }
 0x529   : > { %6175 = vmatprep.subr.mxu0 %v6139_v5 }
 0x52a   : > { %6176 = vmatpush3.msra.mxu0 %v6139_v5  ;;  %6229 = vmatmul.mubr.msk.f32.gmra.mxu1 %vm1175_vm1, %v7346_v22 }
 0x52b   : > { %6177 = vmatprep.subr.mxu0 %v1866_v9  ;;  %6259 = vmatprep.mubr.msk.f32.mxu1 %vm680_vm0, %v7387_v30 }
 0x52c   : > { %6178 = vmatpush3.msra.mxu0 %v1866_v9 }
 0x52d   : > { %6179 = vmatprep.subr.mxu0 %v6136_v62 }
 0x52e   : > { %6180 = vmatpush3.msra.mxu0 %v6136_v62  ;;  %6260 = vmatmul.mubr.msk.f32.vlgmr.msra.gmra.mxu1 %vm680_vm0, %v7394_v17 }
 0x52f   : > { %6181 = vmatprep.subr.mxu0 %v1856_v47  ;;  %6262 = vmatprep.mubr.msk.f32.mxu1 %vm680_vm0, %v7397_v40 }
 0x530   : > { %6182 = vmatpush3.msra.mxu0 %v1856_v47 }
 0x531   : > { %6183 = vmatprep.subr.mxu0 %v6133_v56 }
 0x532   : > { %6184 = vmatpush3.msra.mxu0 %v6133_v56  ;;  %6263 = vmatmul.mubr.msk.f32.gmra.mxu1 %vm680_vm0, %v7404_v28 }
 0x533   : > { %6185 = vmatprep.subr.mxu0 %v1846_v61  ;;  %6265 = vmatprep.mubr.msk.f32.mxu1 %vm680_vm0, %v7407_v21 }
 0x534   : > { %6186 = vmatpush3.msra.mxu0 %v1846_v61 }
 0x536   : > { %6266 = vmatmul.mubr.msk.f32.gmra.mxu1 %vm680_vm0, %v7414_v51 }
 0x537   : > { %6268 = vmatprep.mubr.msk.f32.mxu1 %vm680_vm0, %v7416_v37 }
 0x53a   : > { %6269 = vmatmul.mubr.msk.f32.gmra.mxu1 %vm680_vm0, %v7422_v53 }
 0x5ce   : > { %v6161_v44 = vpop.f32.mrf.mxu1 }
 0x5cf   : > { %v7427_v45 = vadd.f32 %v6161_v44, %v7186_v43 }
 0x5d0   : > { %v1999_v48 = vpop.f32.mrf.mxu1 }
 0x5d1   : > { %v7430_v52 = vadd.f32 %v1999_v48, %v7191_v29  ;;  %v2041_v19 = vsel %vm1329_vm2, %v7427_v45, -inf }
 0x5d2   : > { %2042 = vmax.xlane.f32.xlu1 %v2041_v19  ;;  %v6164_v15 = vpop.f32.mrf.mxu1 }
 0x5d3   : > { %v7435_v54 = vadd.f32 %v6164_v15, %v7199_v38  ;;  %v2038_v22 = vsel %vm1329_vm2, %v7430_v52, -inf }
 0x5d4   : > { %2039 = vmax.xlane.f32.xlu0 %v2038_v22  ;;  %v2009_v58 = vpop.f32.mrf.mxu1 }
 0x5d5   : > { %v7440_v43 = vadd.f32 %v2009_v58, %v7209_v57  ;;  %v2047_v29 = vsel %vm1329_vm2, %v7435_v54, -inf }
 0x5d6   : > { %2048 = vmax.xlane.f32.xlu1 %v2047_v29  ;;  %v6167_v23 = vpop.f32.mrf.mxu1 }
 0x5d7   : > { %v7445_v24 = vadd.f32 %v6167_v23, %v7219_v63  ;;  %v2044_v38 = vsel %vm1329_vm2, %v7440_v43, -inf }
 0x5d8   : > { %2045 = vmax.xlane.f32.xlu0 %v2044_v38  ;;  %v2019_v59 = vpop.f32.mrf.mxu1 }
 0x5d9   : > { %v7450_v25 = vadd.f32 %v2019_v59, %v7229_v3  ;;  %v2053_v57 = vsel %vm1329_vm2, %v7445_v24, -inf }
 0x5da   : > { %2054 = vmax.xlane.f32.xlu1 %v2053_v57  ;;  %v6170_v26 = vpop.f32.mrf.mxu1 }
 0x5db   : > { %v7455_v49 = vadd.f32 %v6170_v26, %v7237_v7  ;;  %v2050_v63 = vsel %vm1329_vm2, %v7450_v25, -inf }
 0x5dc   : > { %2051 = vmax.xlane.f32.xlu0 %v2050_v63  ;;  %v2029_v27 = vpop.f32.mrf.mxu1 }
 0x5dd   : > { %v7460_v31 = vadd.f32 %v2029_v27, %v7244_v11  ;;  %v2059_v3 = vsel %vm1329_vm2, %v7455_v49, -inf }
 0x5de   : > { %2060 = vmax.xlane.f32.xlu1 %v2059_v3  ;;  %v7464_v32 = vpop.f32.mrf.mxu1 }
 0x5df   : > { %v2056_v33 = vsel %vm1329_vm2, %v7460_v31, -inf }
 0x5e0   : > { %v7468_v34 = vpop.f32.mrf.mxu1  ;;  %2057 = vmax.xlane.f32.xlu0 %v2056_v33 }
 0x5e2   : > { %v7470_v7 = vpop.f32.mrf.mxu1 }
 0x5e4   : > { %v7472_v35 = vpop.f32.mrf.mxu1 }
 0x5e6   : > { %v7474_v20 = vpop.f32.mrf.mxu1 }
 0x5e8   : > { %v7476_v11 = vpop.f32.mrf.mxu1 }
 0x5ea   : > { %v7478_v41 = vpop.f32.mrf.mxu1 }
 0x5ec   : > { %v7480_v42 = vpop.f32.mrf.mxu1 }
 0x5ee   : > { %v6261_v46 = vpop.f32.mrf.mxu1 }
 0x5f0   : > { %v2782_v50 = vpop.f32.mrf.mxu1 }
 0x5f2   : > { %v6264_v39 = vpop.f32.mrf.mxu1 }
 0x5f4   : > { %v2792_v56 = vpop.f32.mrf.mxu1 }
 0x5f6   : > { %v6267_v61 = vpop.f32.mrf.mxu1 }
 0x5f8   : > { %v2802_v62 = vpop.f32.mrf.mxu1 }
 0x5fa   : > { %v6270_v1 = vpop.f32.mrf.mxu1 }
 0x5fb   : > { %6291 = vmatprep.subr.msk.mxu1 %vm1175_vm1, %v6270_v1 }
 0x5fc   : > { %v2812_v47 = vpop.f32.mrf.mxu1  ;;  %6292 = vmatpush3.xpose.msk.msra.mxu1 %vm1175_vm1, %v6270_v1 }
 0x5fd   : > { %6293 = vmatprep.subr.msk.mxu1 %vm1175_vm1, %v2812_v47 }
 0x600   : > { %6294 = vmatpush3.xpose.msk.msra.mxu1 %vm1175_vm1, %v2812_v47 }
 0x601   : > { %6295 = vmatprep.subr.msk.mxu1 %vm1175_vm1, %v6267_v61 }
 0x604   : > { %6296 = vmatpush3.xpose.msk.msra.mxu1 %vm1175_vm1, %v6267_v61 }
 0x605   : > { %6297 = vmatprep.subr.msk.mxu1 %vm1175_vm1, %v2802_v62 }
 0x608   : > { %6298 = vmatpush3.xpose.msk.msra.mxu1 %vm1175_vm1, %v2802_v62 }
 0x609   : > { %6299 = vmatprep.subr.msk.mxu1 %vm1175_vm1, %v6264_v39 }
 0x60c   : > { %6300 = vmatpush3.xpose.msk.msra.mxu1 %vm1175_vm1, %v6264_v39 }
 0x60d   : > { %6301 = vmatprep.subr.msk.mxu1 %vm1175_vm1, %v2792_v56 }
 0x610   : > { %6302 = vmatpush3.xpose.msk.msra.mxu1 %vm1175_vm1, %v2792_v56 }
 0x611   : > { %6303 = vmatprep.subr.msk.mxu1 %vm1175_vm1, %v6261_v46 }
 0x614   : > { %6304 = vmatpush3.xpose.msk.msra.mxu1 %vm1175_vm1, %v6261_v46  ;;  %v670_v46 = vld [vmem:[%s8301_s6 + $0x18] sm:$0xff] }
 0x615   : > { %6305 = vmatprep.subr.msk.mxu1 %vm1175_vm1, %v2782_v50  ;;  %6199 = vmatprep.subr.mxu0 %v670_v46 }
 0x618   : > { %6306 = vmatpush3.xpose.msk.msra.mxu1 %vm1175_vm1, %v2782_v50 }
 0x65b   : > { %v2043_v2 = vpop.xlane.xlu1 %2042 }
 0x65c   : > { %v2063_v5 = vsub.f32 %v7427_v45, %v2043_v2 }
 0x65d   : > { %v2040_v55 = vpop.xlane.xlu0 %2039 }
 0x65e   : > { %v2072_v6 = vmul.f32 1.442695, %v2063_v5  ;;  %v2062_v9 = vsub.f32 %v7430_v52, %v2040_v55 }
 0x65f   : > { %v2049_v60 = vpop.xlane.xlu1 %2048 }
 0x660   : > { %6639 = vpow2.f32 %v2072_v6  ;;  %v2070_v10 = vmul.f32 1.442695, %v2062_v9  ;;  %v2065_v13 = vsub.f32 %v7435_v54, %v2049_v60 }
 0x661   : > { %v2046_v14 = vpop.xlane.xlu0 %2045 }
 0x662   : > { %6641 = vpow2.f32 %v2070_v10  ;;  %v2076_v0 = vmul.f32 1.442695, %v2065_v13  ;;  %v2064_v16 = vsub.f32 %v7440_v43, %v2046_v14  ;;  %v669_v10 = vld [vmem:[%s8301_s6 + $0x10] sm:$0xff] }
 0x663   : > { %v2055_v4 = vpop.xlane.xlu1 %2054 }
 0x664   : > { %6643 = vpow2.f32 %v2076_v0  ;;  %v2074_v36 = vmul.f32 1.442695, %v2064_v16  ;;  %v2067_v8 = vsub.f32 %v7445_v24, %v2055_v4 }
 0x665   : > { %v2052_v18 = vpop.xlane.xlu0 %2051 }
 0x666   : > { %6645 = vpow2.f32 %v2074_v36  ;;  %v2080_v12 = vmul.f32 1.442695, %v2067_v8  ;;  %v2066_v44 = vsub.f32 %v7450_v25, %v2052_v18 }
 0x667   : > { %v2061_v45 = vpop.xlane.xlu1 %2060 }
 0x668   : > { %6647 = vpow2.f32 %v2080_v12  ;;  %v2078_v48 = vmul.f32 1.442695, %v2066_v44  ;;  %v2069_v52 = vsub.f32 %v7455_v49, %v2061_v45 }
 0x669   : > { %v2058_v19 = vpop.xlane.xlu0 %2057 }
 0x66a   : > { %6649 = vpow2.f32 %v2078_v48  ;;  %v2084_v15 = vmul.f32 1.442695, %v2069_v52  ;;  %v2068_v54 = vsub.f32 %v7460_v31, %v2058_v19  ;;  %v2573_v48 = vld [vmem:[%s8305_s10 + $0x18] sm:$0xff] }
 0x66c   : > { %6651 = vpow2.f32 %v2084_v15  ;;  %v2082_v22 = vmul.f32 1.442695, %v2068_v54  ;;  %v2572_v15 = vld [vmem:[%s8305_s10 + $0x10] sm:$0xff] }
 0x66d   : > { %v6640_v58 = vpop.eup %6639 }
 0x66e   : > { %6653 = vpow2.f32 %v2082_v22  ;;  %v2089_v43 = vsel %vm1329_vm2, %v6640_v58, 0.0  ;;  %v2571_v22 = vld [vmem:[%s8305_s10 + $0x8] sm:$0xff] }
 0x66f   : > { %v6642_v29 = vpop.eup %6641  ;;  %2090 = vadd.xlane.f32.xlu1 %v2089_v43  ;;  %v2570_v43 = vld [vmem:[%s8305_s10] sm:$0xff] }
 0x670   : > { %v2086_v23 = vsel %vm1329_vm2, %v6642_v29, 0.0 }
 0x671   : > { %v6644_v24 = vpop.eup %6643  ;;  %2087 = vadd.xlane.f32.xlu0 %v2086_v23  ;;  %v5452_v23 = vld [vmem:[%s8305_s10 + $0x98] sm:$0xff] }
 0x672   : > { %v2095_v38 = vsel %vm1329_vm2, %v6644_v24, 0.0 }
 0x673   : > { %v6646_v59 = vpop.eup %6645  ;;  %2096 = vadd.xlane.f32.xlu1 %v2095_v38 }
 0x674   : > { %v2092_v25 = vsel %vm1329_vm2, %v6646_v59, 0.0 }
 0x675   : > { %v6648_v57 = vpop.eup %6647  ;;  %2093 = vadd.xlane.f32.xlu0 %v2092_v25  ;;  %v5451_v25 = vld [vmem:[%s8305_s10 + $0x90] sm:$0xff] }
 0x676   : > { %v2101_v26 = vsel %vm1329_vm2, %v6648_v57, 0.0 }
 0x677   : > { %v6650_v49 = vpop.eup %6649  ;;  %2102 = vadd.xlane.f32.xlu1 %v2101_v26  ;;  %v5449_v26 = vld [vmem:[%s8305_s10 + $0x80] sm:$0xff] }
 0x678   : > { %v2098_v63 = vsel %vm1329_vm2, %v6650_v49, 0.0 }
 0x679   : > { %v6652_v27 = vpop.eup %6651  ;;  %2099 = vadd.xlane.f32.xlu0 %v2098_v63 }
 0x67a   : > { %v2107_v31 = vsel %vm1329_vm2, %v6652_v27, 0.0 }
 0x67b   : > { %v6654_v3 = vpop.eup %6653  ;;  %2108 = vadd.xlane.f32.xlu1 %v2107_v31 }
 0x67c   : > { %v2104_v33 = vsel %vm1329_vm2, %v6654_v3, 0.0 }
 0x67d   : > { %2105 = vadd.xlane.f32.xlu0 %v2104_v33 }
 0x6f8   : > { %v2091_v50 = vpop.xlane.xlu1 %2090 }
 0x6f9   : > { %6655 = vrcp.f32 %v2091_v50 }
 0x6fa   : > { %v2088_v39 = vpop.xlane.xlu0 %2087 }
 0x6fb   : > { %6657 = vrcp.f32 %v2088_v39 }
 0x6fc   : > { %v2097_v56 = vpop.xlane.xlu1 %2096 }
 0x6fd   : > { %6659 = vrcp.f32 %v2097_v56 }
 0x6fe   : > { %v2094_v61 = vpop.xlane.xlu0 %2093 }
 0x6ff   : > { %6661 = vrcp.f32 %v2094_v61 }
 0x700   : > { %v2103_v62 = vpop.xlane.xlu1 %2102 }
 0x701   : > { %6663 = vrcp.f32 %v2103_v62 }
 0x702   : > { %v2100_v1 = vpop.xlane.xlu0 %2099 }
 0x703   : > { %6665 = vrcp.f32 %v2100_v1 }
 0x704   : > { %v2109_v47 = vpop.xlane.xlu1 %2108 }
 0x705   : > { %6667 = vrcp.f32 %v2109_v47 }
 0x706   : > { %v2106_v2 = vpop.xlane.xlu0 %2105  ;;  %v6656_v5 = vpop.eup %6655 }
 0x707   : > { %6669 = vrcp.f32 %v2106_v2  ;;  %v2119_v9 = vmul.f32 %v6656_v5, %v6640_v58  ;;  %v5499_v2 = vld [vmem:[%s8305_s10 + $0x70] sm:$0xff] }
 0x708   : > { %v6658_v55 = vpop.eup %6657 }
 0x709   : > { %v2118_v6 = vmul.f32 %v6658_v55, %v6642_v29 }
 0x70a   : > { %v6660_v60 = vpop.eup %6659 }
 0x70b   : > { %6187 = vmatprep.mubr.msk.f32.mxu0 %vm1329_vm2, %v2118_v6  ;;  %v2121_v0 = vmul.f32 %v6660_v60, %v6644_v24  ;;  %v5498_v6 = vld [vmem:[%s8305_s10 + $0x68] sm:$0xff] }
 0x70c   : > { %v6662_v13 = vpop.eup %6661  ;;  %6188 = vmatmul.mubr.msk.f32.vlgmr.msra.gmra.mxu0 %vm1329_vm2, %v2119_v9 }
 0x70d   : > { %v2120_v14 = vmul.f32 %v6662_v13, %v6646_v59  ;;  %6200 = vmatpush3.msra.mxu0 %v670_v46 }
 0x70e   : > { %6201 = vmatprep.subr.mxu0 %v669_v10  ;;  %v6664_v16 = vpop.eup %6663 }
 0x70f   : > { %6190 = vmatprep.mubr.msk.f32.mxu0 %vm1329_vm2, %v2120_v14  ;;  %6202 = vmatpush3.msra.mxu0 %v669_v10  ;;  %v2123_v8 = vmul.f32 %v6664_v16, %v6648_v57  ;;  %v5450_v57 = vld [vmem:[%s8305_s10 + $0x88] sm:$0xff]  ;;  %v5497_v10 = vld [vmem:[%s8305_s10 + $0x60] sm:$0xff] }
 0x710   : > { %v6666_v4 = vpop.eup %6665  ;;  %6191 = vmatmul.mubr.msk.f32.gmra.mxu0 %vm1329_vm2, %v2121_v0  ;;  %6231 = vmatprep.subr.mxu0 %v2573_v48 }
 0x711   : > { %v2122_v36 = vmul.f32 %v6666_v4, %v6650_v49  ;;  %v5500_v49 = vld [vmem:[%s8305_s10 + $0x78] sm:$0xff] }
 0x712   : > { %v6668_v18 = vpop.eup %6667  ;;  %6367 = vmatprep.subr.mxu1 %v5500_v49 }
 0x713   : > { %6193 = vmatprep.mubr.msk.f32.mxu0 %vm1329_vm2, %v2122_v36  ;;  %v2125_v45 = vmul.f32 %v6668_v18, %v6652_v27 }
 0x714   : > { %v6670_v12 = vpop.eup %6669  ;;  %6194 = vmatmul.mubr.msk.f32.gmra.mxu0 %vm1329_vm2, %v2123_v8 }
 0x715   : > { %v2124_v44 = vmul.f32 %v6670_v12, %v6654_v3 }
 0x717   : > { %6196 = vmatprep.mubr.msk.f32.mxu0 %vm1329_vm2, %v2124_v44 }
 0x718   : > { %6197 = vmatmul.mubr.msk.f32.gmra.mxu0 %vm1329_vm2, %v2125_v45 }
 0x7cc   : > { %v6189_v52 = vpop.f32.mrf.mxu0 }
 0x7ce   : > { %v2216_v19 = vpop.f32.mrf.mxu0 }
 0x7cf   : > { %6203 = vmatprep.mubr.msk.f32.mxu0 %vm1175_vm1, %v2216_v19 }
 0x7d0   : > { %v6192_v54 = vpop.f32.mrf.mxu0  ;;  %6204 = vmatmul.mubr.msk.f32.vlgmr.msra.gmra.mxu0 %vm1175_vm1, %v6189_v52 }
 0x7d1   : > { %6232 = vmatpush3.msra.mxu0 %v2573_v48 }
 0x7d2   : > { %v2226_v58 = vpop.f32.mrf.mxu0  ;;  %6233 = vmatprep.subr.mxu0 %v2572_v15 }
 0x7d3   : > { %6206 = vmatprep.mubr.msk.f32.mxu0 %vm1175_vm1, %v2226_v58  ;;  %6234 = vmatpush3.msra.mxu0 %v2572_v15  ;;  %v7652_v58 = vld [vmem:[%s8331_s1] sm:$0xff] }
 0x7d4   : > { %v6195_v29 = vpop.f32.mrf.mxu0  ;;  %6207 = vmatmul.mubr.msk.f32.gmra.mxu0 %vm1175_vm1, %v6192_v54  ;;  %6235 = vmatprep.subr.mxu0 %v2571_v22  ;;  %v7647_v54 = vld [vmem:[%s8331_s1 + $0x8] sm:$0xff] }
 0x7d5   : > { %6236 = vmatpush3.msra.mxu0 %v2571_v22 }
 0x7d6   : > { %v2236_v24 = vpop.f32.mrf.mxu0  ;;  %6237 = vmatprep.subr.mxu0 %v2570_v43 }
 0x7d7   : > { %6209 = vmatprep.mubr.msk.f32.mxu0 %vm1175_vm1, %v2236_v24  ;;  %6238 = vmatpush3.msra.mxu0 %v2570_v43 }
 0x7d8   : > { %v6198_v38 = vpop.f32.mrf.mxu0  ;;  %6210 = vmatmul.mubr.msk.f32.gmra.mxu0 %vm1175_vm1, %v6195_v29  ;;  %6271 = vmatprep.subr.mxu0 %v5452_v23 }
 0x7da   : > { %v2246_v59 = vpop.f32.mrf.mxu0 }
 0x7db   : > { %6212 = vmatprep.mubr.msk.f32.mxu0 %vm1175_vm1, %v2246_v59 }
 0x7dc   : > { %6213 = vmatmul.mubr.msk.f32.gmra.mxu0 %vm1175_vm1, %v6198_v38 }
 0x7dd   : > { %6239 = vmatprep.mubr.msk.f32.mxu0 %vm680_vm0, %v7387_v30 }
 0x7e0   : > { %6240 = vmatmul.mubr.msk.f32.vlgmr.msra.gmra.mxu0 %vm680_vm0, %v7394_v17 }
 0x7e1   : > { %6242 = vmatprep.mubr.msk.f32.mxu0 %vm680_vm0, %v7397_v40  ;;  %6272 = vmatpush3.msra.mxu0 %v5452_v23  ;;  %v7660_v23 = vld [vmem:[%s8331_s1 + $0x18] sm:$0xff] }
 0x7e2   : > { %6273 = vmatprep.subr.mxu0 %v5451_v25 }
 0x7e3   : > { %6274 = vmatpush3.msra.mxu0 %v5451_v25  ;;  %v7670_v25 = vld [vmem:[%s8331_s1 + $0x10] sm:$0xff] }
 0x7e4   : > { %6243 = vmatmul.mubr.msk.f32.gmra.mxu0 %vm680_vm0, %v7404_v28  ;;  %6275 = vmatprep.subr.mxu0 %v5450_v57 }
 0x7e5   : > { %6245 = vmatprep.mubr.msk.f32.mxu0 %vm680_vm0, %v7407_v21  ;;  %6276 = vmatpush3.msra.mxu0 %v5450_v57 }
 0x7e6   : > { %6277 = vmatprep.subr.mxu0 %v5449_v26 }
 0x7e7   : > { %6278 = vmatpush3.msra.mxu0 %v5449_v26 }
 0x7e8   : > { %6246 = vmatmul.mubr.msk.f32.gmra.mxu0 %vm680_vm0, %v7414_v51 }
 0x7e9   : > { %6248 = vmatprep.mubr.msk.f32.mxu0 %vm680_vm0, %v7416_v37 }
 0x7ec   : > { %6249 = vmatmul.mubr.msk.f32.gmra.mxu0 %vm680_vm0, %v7422_v53 }
 0x7ed   : > { %6279 = vmatprep.mubr.msk.f32.mxu0 %vm680_vm0, %v7387_v30 }
 0x7f0   : > { %6280 = vmatmul.mubr.msk.f32.vlgmr.msra.gmra.mxu0 %vm680_vm0, %v7394_v17 }
 0x7f1   : > { %6282 = vmatprep.mubr.msk.f32.mxu0 %vm680_vm0, %v7397_v40 }
 0x7f4   : > { %6283 = vmatmul.mubr.msk.f32.gmra.mxu0 %vm680_vm0, %v7404_v28 }
 0x7f5   : > { %6285 = vmatprep.mubr.msk.f32.mxu0 %vm680_vm0, %v7407_v21 }
 0x7f8   : > { %6286 = vmatmul.mubr.msk.f32.gmra.mxu0 %vm680_vm0, %v7414_v51 }
 0x7f9   : > { %6288 = vmatprep.mubr.msk.f32.mxu0 %vm680_vm0, %v7416_v37 }
 0x7fc   : > { %6289 = vmatmul.mubr.msk.f32.gmra.mxu0 %vm680_vm0, %v7422_v53 }
 0x890   : > { %v7595_v63 = vpop.f32.mrf.mxu0 }
 0x892   : > { %v7597_v27 = vpop.f32.mrf.mxu0 }
 0x894   : > { %v7599_v31 = vpop.f32.mrf.mxu0 }
 0x896   : > { %v7601_v3 = vpop.f32.mrf.mxu0 }
 0x898   : > { %v7603_v33 = vpop.f32.mrf.mxu0 }
 0x89a   : > { %v7605_v46 = vpop.f32.mrf.mxu0 }
 0x89c   : > { %v7607_v50 = vpop.f32.mrf.mxu0 }
 0x89e   : > { %v7609_v39 = vpop.f32.mrf.mxu0 }
 0x8a0   : > { %v6241_v56 = vpop.f32.mrf.mxu0 }
 0x8a1   : > { %v2704_v1 = vmul.f32 0.25, %v6241_v56  ;;  %v7680_v56 = vld [vmem:[%s8331_s1 + $0x28] sm:$0xff] }
 0x8a2   : > { %v2664_v61 = vpop.f32.mrf.mxu0 }
 0x8a3   : > { %v2703_v62 = vmul.f32 0.25, %v2664_v61 }
 0x8a4   : > { %v6244_v47 = vpop.f32.mrf.mxu0 }
 0x8a5   : > { %6307 = vmatprep.mubr.msk.f32.mxu1 %vm1175_vm1, %v2703_v62  ;;  %v2706_v9 = vmul.f32 0.25, %v6244_v47  ;;  %v7690_v47 = vld [vmem:[%s8331_s1 + $0x20] sm:$0xff] }
 0x8a6   : > { %v2674_v5 = vpop.f32.mrf.mxu0  ;;  %6308 = vmatmul.mubr.msk.f32.vlgmr.msra.gmra.mxu1 %vm1175_vm1, %v2704_v1 }
 0x8a7   : > { %v2705_v55 = vmul.f32 0.25, %v2674_v5  ;;  %6368 = vmatpush3.msra.mxu1 %v5500_v49 }
 0x8a8   : > { %v6247_v60 = vpop.f32.mrf.mxu0  ;;  %6369 = vmatprep.subr.mxu1 %v5499_v2 }
 0x8a9   : > { %6310 = vmatprep.mubr.msk.f32.mxu1 %vm1175_vm1, %v2705_v55  ;;  %6370 = vmatpush3.msra.mxu1 %v5499_v2  ;;  %v2708_v0 = vmul.f32 0.25, %v6247_v60 }
 0x8aa   : > { %v2684_v13 = vpop.f32.mrf.mxu0  ;;  %6311 = vmatmul.mubr.msk.f32.gmra.mxu1 %vm1175_vm1, %v2706_v9  ;;  %6371 = vmatprep.subr.mxu1 %v5498_v6 }
 0x8ab   : > { %v2707_v14 = vmul.f32 0.25, %v2684_v13  ;;  %6372 = vmatpush3.msra.mxu1 %v5498_v6  ;;  %v7698_v6 = vld [vmem:[%s8331_s1 + $0x38] sm:$0xff]  ;;  %v7705_v13 = vld [vmem:[%s8331_s1 + $0x30] sm:$0xff] }
 0x8ac   : > { %v6250_v16 = vpop.f32.mrf.mxu0  ;;  %6373 = vmatprep.subr.mxu1 %v5497_v10 }
 0x8ad   : > { %6313 = vmatprep.mubr.msk.f32.mxu1 %vm1175_vm1, %v2707_v14  ;;  %6374 = vmatpush3.msra.mxu1 %v5497_v10  ;;  %v2710_v8 = vmul.f32 0.25, %v6250_v16 }
 0x8ae   : > { %v2694_v4 = vpop.f32.mrf.mxu0  ;;  %6314 = vmatmul.mubr.msk.f32.gmra.mxu1 %vm1175_vm1, %v2708_v0 }
 0x8af   : > { %v2709_v36 = vmul.f32 0.25, %v2694_v4 }
 0x8b0   : > { %v6281_v18 = vpop.f32.mrf.mxu0 }
 0x8b1   : > { %6316 = vmatprep.mubr.msk.f32.mxu1 %vm1175_vm1, %v2709_v36 }
 0x8b2   : > { %v2892_v12 = vpop.f32.mrf.mxu0  ;;  %6317 = vmatmul.mubr.msk.f32.gmra.mxu1 %vm1175_vm1, %v2710_v8 }
 0x8b3   : > { %6375 = vmatprep.mubr.msk.f32.mxu1 %vm680_vm0, %v7387_v30 }
 0x8b4   : > { %v6284_v44 = vpop.f32.mrf.mxu0 }
 0x8b6   : > { %v2902_v45 = vpop.f32.mrf.mxu0  ;;  %6376 = vmatmul.mubr.msk.f32.vlgmr.msra.gmra.mxu1 %vm680_vm0, %v7394_v17 }
 0x8b7   : > { %6378 = vmatprep.mubr.msk.f32.mxu1 %vm680_vm0, %v7397_v40 }
 0x8b8   : > { %v6287_v48 = vpop.f32.mrf.mxu0 }
 0x8ba   : > { %v2912_v52 = vpop.f32.mrf.mxu0  ;;  %6379 = vmatmul.mubr.msk.f32.gmra.mxu1 %vm680_vm0, %v7404_v28 }
 0x8bb   : > { %6381 = vmatprep.mubr.msk.f32.mxu1 %vm680_vm0, %v7407_v21 }
 0x8bc   : > { %v6290_v19 = vpop.f32.mrf.mxu0 }
 0x8bd   : > { %6319 = vmatprep.subr.mxu0 %v6290_v19 }
 0x8be   : > { %v2922_v15 = vpop.f32.mrf.mxu0  ;;  %6320 = vmatpush3.msra.mxu0 %v6290_v19  ;;  %6382 = vmatmul.mubr.msk.f32.gmra.mxu1 %vm680_vm0, %v7414_v51 }
 0x8bf   : > { %6321 = vmatprep.subr.mxu0 %v2922_v15  ;;  %6384 = vmatprep.mubr.msk.f32.mxu1 %vm680_vm0, %v7416_v37 }
 0x8c0   : > { %6322 = vmatpush3.msra.mxu0 %v2922_v15 }
 0x8c1   : > { %6323 = vmatprep.subr.mxu0 %v6287_v48 }
 0x8c2   : > { %6324 = vmatpush3.msra.mxu0 %v6287_v48  ;;  %6385 = vmatmul.mubr.msk.f32.gmra.mxu1 %vm680_vm0, %v7422_v53 }
 0x8c3   : > { %6325 = vmatprep.subr.mxu0 %v2912_v52 }
 0x8c4   : > { %6326 = vmatpush3.msra.mxu0 %v2912_v52 }
 0x8c5   : > { %6327 = vmatprep.subr.mxu0 %v6284_v44 }
 0x8c6   : > { %6328 = vmatpush3.msra.mxu0 %v6284_v44 }
 0x8c7   : > { %6329 = vmatprep.subr.mxu0 %v2902_v45 }
 0x8c8   : > { %6330 = vmatpush3.msra.mxu0 %v2902_v45 }
 0x8c9   : > { %6331 = vmatprep.subr.mxu0 %v6281_v18 }
 0x8ca   : > { %6332 = vmatpush3.msra.mxu0 %v6281_v18 }
 0x8cb   : > { %6333 = vmatprep.subr.mxu0 %v2892_v12 }
 0x8cc   : > { %6334 = vmatpush3.msra.mxu0 %v2892_v12 }
 0x966   : > { %v6309_v22 = vpop.f32.mrf.mxu1 }
 0x967   : > { %v7655_v43 = vadd.f32 %v6309_v22, %v7647_v54 }
 0x968   : > { %v3045_v29 = vpop.f32.mrf.mxu1 }
 0x969   : > { %v7663_v24 = vadd.f32 %v3045_v29, %v7652_v58  ;;  %v3087_v38 = vsel %vm1329_vm2, %v7655_v43, -inf }
 0x96a   : > { %3088 = vmax.xlane.f32.xlu1 %v3087_v38  ;;  %v6312_v59 = vpop.f32.mrf.mxu1 }
 0x96b   : > { %v7673_v57 = vadd.f32 %v6312_v59, %v7660_v23  ;;  %v3084_v26 = vsel %vm1329_vm2, %v7663_v24, -inf }
 0x96c   : > { %3085 = vmax.xlane.f32.xlu0 %v3084_v26  ;;  %v3055_v49 = vpop.f32.mrf.mxu1 }
 0x96d   : > { %v7683_v61 = vadd.f32 %v3055_v49, %v7670_v25  ;;  %v3093_v62 = vsel %vm1329_vm2, %v7673_v57, -inf }
 0x96e   : > { %3094 = vmax.xlane.f32.xlu1 %v3093_v62  ;;  %v6315_v1 = vpop.f32.mrf.mxu1 }
 0x96f   : > { %v3071_v2 = vadd.f32 %v6315_v1, %v7680_v56  ;;  %v3090_v5 = vsel %vm1329_vm2, %v7683_v61, -inf }
 0x970   : > { %3091 = vmax.xlane.f32.xlu0 %v3090_v5  ;;  %v3065_v55 = vpop.f32.mrf.mxu1 }
 0x971   : > { %v3066_v9 = vadd.f32 %v3065_v55, %v7690_v47  ;;  %v3099_v60 = vsel %vm1329_vm2, %v3071_v2, -inf }
 0x972   : > { %3100 = vmax.xlane.f32.xlu1 %v3099_v60  ;;  %v6318_v10 = vpop.f32.mrf.mxu1 }
 0x973   : > { %v3081_v14 = vadd.f32 %v6318_v10, %v7698_v6  ;;  %v3096_v0 = vsel %vm1329_vm2, %v3066_v9, -inf }
 0x974   : > { %3097 = vmax.xlane.f32.xlu0 %v3096_v0  ;;  %v3075_v16 = vpop.f32.mrf.mxu1 }
 0x975   : > { %v3076_v4 = vadd.f32 %v3075_v16, %v7705_v13  ;;  %v3105_v36 = vsel %vm1329_vm2, %v3081_v14, -inf }
 0x976   : > { %3106 = vmax.xlane.f32.xlu1 %v3105_v36  ;;  %v6377_v8 = vpop.f32.mrf.mxu1 }
 0x977   : > { %v3102_v18 = vsel %vm1329_vm2, %v3076_v4, -inf }
 0x978   : > { %v3490_v12 = vpop.f32.mrf.mxu1  ;;  %3103 = vmax.xlane.f32.xlu0 %v3102_v18 }
 0x97a   : > { %v6380_v44 = vpop.f32.mrf.mxu1 }
 0x97c   : > { %v3500_v45 = vpop.f32.mrf.mxu1 }
 0x97e   : > { %v6383_v48 = vpop.f32.mrf.mxu1 }
 0x980   : > { %v3510_v52 = vpop.f32.mrf.mxu1 }
 0x982   : > { %v6386_v19 = vpop.f32.mrf.mxu1 }
 0x983   : > { %6407 = vmatprep.subr.msk.mxu1 %vm1175_vm1, %v6386_v19 }
 0x984   : > { %v3520_v15 = vpop.f32.mrf.mxu1  ;;  %6408 = vmatpush3.xpose.msk.msra.mxu1 %vm1175_vm1, %v6386_v19 }
 0x985   : > { %6409 = vmatprep.subr.msk.mxu1 %vm1175_vm1, %v3520_v15 }
 0x988   : > { %6410 = vmatpush3.xpose.msk.msra.mxu1 %vm1175_vm1, %v3520_v15 }
 0x989   : > { %6411 = vmatprep.subr.msk.mxu1 %vm1175_vm1, %v6383_v48 }
 0x98c   : > { %6412 = vmatpush3.xpose.msk.msra.mxu1 %vm1175_vm1, %v6383_v48 }
 0x98d   : > { %6413 = vmatprep.subr.msk.mxu1 %vm1175_vm1, %v3510_v52 }
 0x990   : > { %6414 = vmatpush3.xpose.msk.msra.mxu1 %vm1175_vm1, %v3510_v52 }
 0x991   : > { %6415 = vmatprep.subr.msk.mxu1 %vm1175_vm1, %v6380_v44 }
 0x994   : > { %6416 = vmatpush3.xpose.msk.msra.mxu1 %vm1175_vm1, %v6380_v44 }
 0x995   : > { %6417 = vmatprep.subr.msk.mxu1 %vm1175_vm1, %v3500_v45 }
 0x998   : > { %6418 = vmatpush3.xpose.msk.msra.mxu1 %vm1175_vm1, %v3500_v45 }
 0x999   : > { %6419 = vmatprep.subr.msk.mxu1 %vm1175_vm1, %v6377_v8 }
 0x99c   : > { %6420 = vmatpush3.xpose.msk.msra.mxu1 %vm1175_vm1, %v6377_v8 }
 0x99d   : > { %6421 = vmatprep.subr.msk.mxu1 %vm1175_vm1, %v3490_v12 }
 0x9a0   : > { %6422 = vmatpush3.xpose.msk.msra.mxu1 %vm1175_vm1, %v3490_v12 }
 0x9f3   : > { %v3089_v22 = vpop.xlane.xlu1 %3088 }
 0x9f4   : > { %v3109_v29 = vsub.f32 %v7655_v43, %v3089_v22 }
 0x9f5   : > { %v3086_v38 = vpop.xlane.xlu0 %3085 }
 0x9f6   : > { %v3118_v59 = vmul.f32 1.442695, %v3109_v29  ;;  %v3108_v26 = vsub.f32 %v7663_v24, %v3086_v38 }
 0x9f7   : > { %v3095_v49 = vpop.xlane.xlu1 %3094 }
 0x9f8   : > { %6671 = vpow2.f32 %v3118_v59  ;;  %v3116_v62 = vmul.f32 1.442695, %v3108_v26  ;;  %v3111_v1 = vsub.f32 %v7673_v57, %v3095_v49 }
 0x9f9   : > { %v3092_v5 = vpop.xlane.xlu0 %3091 }
 0x9fa   : > { %6673 = vpow2.f32 %v3116_v62  ;;  %v3122_v55 = vmul.f32 1.442695, %v3111_v1  ;;  %v3110_v60 = vsub.f32 %v7683_v61, %v3092_v5  ;;  %v5488_v5 = vld [vmem:[%s8305_s10 + $0x38] sm:$0xff] }
 0x9fb   : > { %v3101_v10 = vpop.xlane.xlu1 %3100  ;;  %6347 = vmatprep.subr.mxu0 %v5488_v5 }
 0x9fc   : > { %6675 = vpow2.f32 %v3122_v55  ;;  %v3120_v0 = vmul.f32 1.442695, %v3110_v60  ;;  %v3113_v16 = vsub.f32 %v3071_v2, %v3101_v10 }
 0x9fd   : > { %v3098_v36 = vpop.xlane.xlu0 %3097 }
 0x9fe   : > { %6677 = vpow2.f32 %v3120_v0  ;;  %v3126_v43 = vmul.f32 1.442695, %v3113_v16  ;;  %v3112_v8 = vsub.f32 %v3066_v9, %v3098_v36 }
 0x9ff   : > { %v3107_v18 = vpop.xlane.xlu1 %3106 }
 0xa00   : > { %6679 = vpow2.f32 %v3126_v43  ;;  %v3124_v24 = vmul.f32 1.442695, %v3112_v8  ;;  %v3115_v12 = vsub.f32 %v3081_v14, %v3107_v18 }
 0xa01   : > { %v3104_v44 = vpop.xlane.xlu0 %3103 }
 0xa02   : > { %6681 = vpow2.f32 %v3124_v24  ;;  %v3130_v57 = vmul.f32 1.442695, %v3115_v12  ;;  %v3114_v45 = vsub.f32 %v3076_v4, %v3104_v44 }
 0xa04   : > { %6683 = vpow2.f32 %v3130_v57  ;;  %v3128_v48 = vmul.f32 1.442695, %v3114_v45  ;;  %v5487_v45 = vld [vmem:[%s8305_s10 + $0x30] sm:$0xff] }
 0xa05   : > { %v6672_v52 = vpop.eup %6671 }
 0xa06   : > { %6685 = vpow2.f32 %v3128_v48  ;;  %v3135_v61 = vsel %vm1329_vm2, %v6672_v52, 0.0 }
 0xa07   : > { %v6674_v19 = vpop.eup %6673  ;;  %3136 = vadd.xlane.f32.xlu1 %v3135_v61 }
 0xa08   : > { %v3132_v2 = vsel %vm1329_vm2, %v6674_v19, 0.0 }
 0xa09   : > { %v6676_v15 = vpop.eup %6675  ;;  %3133 = vadd.xlane.f32.xlu0 %v3132_v2  ;;  %v5486_v2 = vld [vmem:[%s8305_s10 + $0x28] sm:$0xff] }
 0xa0a   : > { %v3141_v9 = vsel %vm1329_vm2, %v6676_v15, 0.0 }
 0xa0b   : > { %v6678_v22 = vpop.eup %6677  ;;  %3142 = vadd.xlane.f32.xlu1 %v3141_v9 }
 0xa0c   : > { %v3138_v14 = vsel %vm1329_vm2, %v6678_v22, 0.0 }
 0xa0d   : > { %v6680_v29 = vpop.eup %6679  ;;  %3139 = vadd.xlane.f32.xlu0 %v3138_v14 }
 0xa0e   : > { %v3147_v4 = vsel %vm1329_vm2, %v6680_v29, 0.0 }
 0xa0f   : > { %v6682_v38 = vpop.eup %6681  ;;  %3148 = vadd.xlane.f32.xlu1 %v3147_v4 }
 0xa10   : > { %v3144_v59 = vsel %vm1329_vm2, %v6682_v38, 0.0 }
 0xa11   : > { %v6684_v26 = vpop.eup %6683  ;;  %3145 = vadd.xlane.f32.xlu0 %v3144_v59 }
 0xa12   : > { %v3153_v49 = vsel %vm1329_vm2, %v6684_v26, 0.0 }
 0xa13   : > { %v6686_v62 = vpop.eup %6685  ;;  %3154 = vadd.xlane.f32.xlu1 %v3153_v49 }
 0xa14   : > { %v3150_v1 = vsel %vm1329_vm2, %v6686_v62, 0.0 }
 0xa15   : > { %3151 = vadd.xlane.f32.xlu0 %v3150_v1 }
 0xa90   : > { %v3137_v55 = vpop.xlane.xlu1 %3136 }
 0xa91   : > { %6687 = vrcp.f32 %v3137_v55 }
 0xa92   : > { %v3134_v60 = vpop.xlane.xlu0 %3133 }
 0xa93   : > { %6689 = vrcp.f32 %v3134_v60 }
 0xa94   : > { %v3143_v10 = vpop.xlane.xlu1 %3142 }
 0xa95   : > { %6691 = vrcp.f32 %v3143_v10 }
 0xa96   : > { %v3140_v0 = vpop.xlane.xlu0 %3139 }
 0xa97   : > { %6693 = vrcp.f32 %v3140_v0 }
 0xa98   : > { %v3149_v16 = vpop.xlane.xlu1 %3148 }
 0xa99   : > { %6695 = vrcp.f32 %v3149_v16 }
 0xa9a   : > { %v3146_v36 = vpop.xlane.xlu0 %3145 }
 0xa9b   : > { %6697 = vrcp.f32 %v3146_v36 }
 0xa9c   : > { %v3155_v43 = vpop.xlane.xlu1 %3154 }
 0xa9d   : > { %6699 = vrcp.f32 %v3155_v43 }
 0xa9e   : > { %v3152_v8 = vpop.xlane.xlu0 %3151  ;;  %v6688_v18 = vpop.eup %6687 }
 0xa9f   : > { %6701 = vrcp.f32 %v3152_v8  ;;  %v3165_v44 = vmul.f32 %v6688_v18, %v6672_v52  ;;  %v5485_v52 = vld [vmem:[%s8305_s10 + $0x20] sm:$0xff]  ;;  %v4284_v18 = vld [vmem:[%s8308_s13 + $0x18] sm:$0xff] }
 0xaa0   : > { %v6690_v24 = vpop.eup %6689 }
 0xaa1   : > { %v3164_v12 = vmul.f32 %v6690_v24, %v6674_v19 }
 0xaa2   : > { %v6692_v57 = vpop.eup %6691 }
 0xaa3   : > { %6335 = vmatprep.mubr.msk.f32.mxu0 %vm1329_vm2, %v3164_v12  ;;  %v3167_v9 = vmul.f32 %v6692_v57, %v6676_v15 }
 0xaa4   : > { %v6694_v48 = vpop.eup %6693  ;;  %6336 = vmatmul.mubr.msk.f32.vlgmr.msra.gmra.mxu0 %vm1329_vm2, %v3165_v44 }
 0xaa5   : > { %6348 = vmatpush3.msra.mxu0 %v5488_v5  ;;  %v3166_v61 = vmul.f32 %v6694_v48, %v6678_v22  ;;  %v5512_v22 = vld [vmem:[%s8305_s10 + $0xb8] sm:$0xff] }
 0xaa6   : > { %6349 = vmatprep.subr.mxu0 %v5487_v45  ;;  %v6696_v19 = vpop.eup %6695 }
 0xaa7   : > { %6338 = vmatprep.mubr.msk.f32.mxu0 %vm1329_vm2, %v3166_v61  ;;  %6350 = vmatpush3.msra.mxu0 %v5487_v45  ;;  %v3169_v59 = vmul.f32 %v6696_v19, %v6680_v29  ;;  %v5511_v29 = vld [vmem:[%s8305_s10 + $0xb0] sm:$0xff] }
 0xaa8   : > { %v6698_v14 = vpop.eup %6697  ;;  %6339 = vmatmul.mubr.msk.f32.gmra.mxu0 %vm1329_vm2, %v3167_v9  ;;  %6351 = vmatprep.subr.mxu0 %v5486_v2 }
 0xaa9   : > { %v3168_v4 = vmul.f32 %v6698_v14, %v6682_v38  ;;  %6352 = vmatpush3.msra.mxu0 %v5486_v2  ;;  %v5510_v38 = vld [vmem:[%s8305_s10 + $0xa8] sm:$0xff] }
 0xaaa   : > { %6353 = vmatprep.subr.mxu0 %v5485_v52  ;;  %v6700_v15 = vpop.eup %6699 }
 0xaab   : > { %6341 = vmatprep.mubr.msk.f32.mxu0 %vm1329_vm2, %v3168_v4  ;;  %6354 = vmatpush3.msra.mxu0 %v5485_v52  ;;  %v3171_v5 = vmul.f32 %v6700_v15, %v6684_v26  ;;  %v5509_v26 = vld [vmem:[%s8305_s10 + $0xa0] sm:$0xff]  ;;  %v4283_v4 = vld [vmem:[%s8308_s13 + $0x10] sm:$0xff] }
 0xaac   : > { %v6702_v49 = vpop.eup %6701  ;;  %6342 = vmatmul.mubr.msk.f32.gmra.mxu0 %vm1329_vm2, %v3169_v59  ;;  %6387 = vmatprep.subr.mxu0 %v5512_v22  ;;  %v4282_v59 = vld [vmem:[%s8308_s13 + $0x8] sm:$0xff] }
 0xaad   : > { %v3170_v1 = vmul.f32 %v6702_v49, %v6686_v62  ;;  %v4281_v49 = vld [vmem:[%s8308_s13] sm:$0xff] }
 0xaaf   : > { %6344 = vmatprep.mubr.msk.f32.mxu0 %vm1329_vm2, %v3170_v1 }
 0xab0   : > { %6345 = vmatmul.mubr.msk.f32.gmra.mxu0 %vm1329_vm2, %v3171_v5 }
 0xab1   : > { %6355 = vmatprep.mubr.msk.f32.mxu0 %vm680_vm0, %v7387_v30 }
 0xab4   : > { %6356 = vmatmul.mubr.msk.f32.vlgmr.msra.gmra.mxu0 %vm680_vm0, %v7394_v17 }
 0xab5   : > { %6358 = vmatprep.mubr.msk.f32.mxu0 %vm680_vm0, %v7397_v40  ;;  %6388 = vmatpush3.msra.mxu0 %v5512_v22 }
 0xab6   : > { %6389 = vmatprep.subr.mxu0 %v5511_v29 }
 0xab7   : > { %6390 = vmatpush3.msra.mxu0 %v5511_v29  ;;  %v2475_v29 = vadd.f32 %v7468_v34, %v7597_v27  ;;  %v2485_v34 = vadd.f32 %v7472_v35, %v7601_v3 }
 0xab8   : > { %6359 = vmatmul.mubr.msk.f32.gmra.mxu0 %vm680_vm0, %v7404_v28  ;;  %6391 = vmatprep.subr.mxu0 %v5510_v38 }
 0xab9   : > { %6361 = vmatprep.mubr.msk.f32.mxu0 %vm680_vm0, %v7407_v21  ;;  %6392 = vmatpush3.msra.mxu0 %v5510_v38 }
 0xaba   : > { %6393 = vmatprep.subr.mxu0 %v5509_v26 }
 0xabb   : > { %6394 = vmatpush3.msra.mxu0 %v5509_v26  ;;  %v5426_v26 = vld [vmem:[%s8302_s7] ss:$0 sm:$0xff] }
 0xabc   : > { %6362 = vmatmul.mubr.msk.f32.gmra.mxu0 %vm680_vm0, %v7414_v51 }
 0xabd   : > { %6364 = vmatprep.mubr.msk.f32.mxu0 %vm680_vm0, %v7416_v37 }
 0xac0   : > { %6365 = vmatmul.mubr.msk.f32.gmra.mxu0 %vm680_vm0, %v7422_v53 }
 0xac1   : > { %6395 = vmatprep.mubr.msk.f32.mxu0 %vm680_vm0, %v7387_v30  ;;  %v2530_v30 = vld [vmem:[%s8306_s11 + $0x8] sm:$0xff] }
 0xac2   : > { %6479 = vmatprep.subr.mxu1 %v2530_v30 }
 0xac4   : > { %6396 = vmatmul.mubr.msk.f32.vlgmr.msra.gmra.mxu0 %vm680_vm0, %v7394_v17 }
 0xac5   : > { %6398 = vmatprep.mubr.msk.f32.mxu0 %vm680_vm0, %v7397_v40 }
 0xac8   : > { %6399 = vmatmul.mubr.msk.f32.gmra.mxu0 %vm680_vm0, %v7404_v28 }
 0xac9   : > { %6401 = vmatprep.mubr.msk.f32.mxu0 %vm680_vm0, %v7407_v21 }
 0xacc   : > { %6402 = vmatmul.mubr.msk.f32.gmra.mxu0 %vm680_vm0, %v7414_v51 }
 0xacd   : > { %6404 = vmatprep.mubr.msk.f32.mxu0 %vm680_vm0, %v7416_v37 }
 0xad0   : > { %6405 = vmatmul.mubr.msk.f32.gmra.mxu0 %vm680_vm0, %v7422_v53  ;;  %v2529_v53 = vld [vmem:[%s8306_s11] sm:$0xff] }
 0xb64   : > { %v6337_v17 = vpop.f32.mrf.mxu0 }
 0xb66   : > { %v3262_v40 = vpop.f32.mrf.mxu0 }
 0xb68   : > { %v6340_v28 = vpop.f32.mrf.mxu0 }
 0xb6a   : > { %v3272_v62 = vpop.f32.mrf.mxu0 }
 0xb6c   : > { %v6343_v55 = vpop.f32.mrf.mxu0 }
 0xb6e   : > { %v3282_v21 = vpop.f32.mrf.mxu0 }
 0xb70   : > { %v7807_v60 = vpop.f32.mrf.mxu0 }
 0xb72   : > { %v3292_v51 = vpop.f32.mrf.mxu0 }
 0xb74   : > { %v6357_v10 = vpop.f32.mrf.mxu0 }
 0xb75   : > { %v3412_v16 = vmul.f32 0.25, %v6357_v10 }
 0xb76   : > { %v3372_v0 = vpop.f32.mrf.mxu0 }
 0xb77   : > { %v3411_v37 = vmul.f32 0.25, %v3372_v0 }
 0xb78   : > { %v6360_v36 = vpop.f32.mrf.mxu0 }
 0xb79   : > { %6423 = vmatprep.mubr.msk.f32.mxu1 %vm1175_vm1, %v3411_v37  ;;  %v3414_v24 = vmul.f32 0.25, %v6360_v36 }
 0xb7a   : > { %v3382_v43 = vpop.f32.mrf.mxu0  ;;  %6424 = vmatmul.mubr.msk.f32.vlgmr.msra.gmra.mxu1 %vm1175_vm1, %v3412_v16 }
 0xb7b   : > { %v3413_v8 = vmul.f32 0.25, %v3382_v43  ;;  %6480 = vmatpush3.msra.mxu1 %v2530_v30  ;;  %v2480_v30 = vadd.f32 %v7464_v32, %v7595_v63  ;;  %v2495_v32 = vadd.f32 %v7476_v11, %v7605_v46  ;;  %v2500_v63 = vadd.f32 %v7474_v20, %v7603_v33 }
 0xb7c   : > { %v6363_v12 = vpop.f32.mrf.mxu0  ;;  %6481 = vmatprep.subr.mxu1 %v2529_v53 }
 0xb7d   : > { %6426 = vmatprep.mubr.msk.f32.mxu1 %vm1175_vm1, %v3413_v8  ;;  %6482 = vmatpush3.msra.mxu1 %v2529_v53  ;;  %v3416_v45 = vmul.f32 0.25, %v6363_v12  ;;  %v2520_v27 = vadd.f32 %v5426_v26, %v2480_v30  ;;  %v2523_v3 = vadd.f32 %v5426_v26, %v2495_v32  ;;  %v2524_v11 = vadd.f32 %v5426_v26, %v2500_v63 }
 0xb7e   : > { %v3392_v44 = vpop.f32.mrf.mxu0  ;;  %6427 = vmatmul.mubr.msk.f32.gmra.mxu1 %vm1175_vm1, %v3414_v24  ;;  %6515 = vmatprep.subr.mxu1 %v4284_v18 }
 0xb7f   : > { %v3415_v57 = vmul.f32 0.25, %v3392_v44 }
 0xb80   : > { %v6366_v48 = vpop.f32.mrf.mxu0 }
 0xb81   : > { %6429 = vmatprep.mubr.msk.f32.mxu1 %vm1175_vm1, %v3415_v57  ;;  %v3418_v9 = vmul.f32 0.25, %v6366_v48 }
 0xb82   : > { %v3402_v61 = vpop.f32.mrf.mxu0  ;;  %6430 = vmatmul.mubr.msk.f32.gmra.mxu1 %vm1175_vm1, %v3416_v45 }
 0xb83   : > { %v3417_v2 = vmul.f32 0.25, %v3402_v61 }
 0xb84   : > { %v6397_v19 = vpop.f32.mrf.mxu0 }
 0xb85   : > { %6432 = vmatprep.mubr.msk.f32.mxu1 %vm1175_vm1, %v3417_v2 }
 0xb86   : > { %v3600_v52 = vpop.f32.mrf.mxu0  ;;  %6433 = vmatmul.mubr.msk.f32.gmra.mxu1 %vm1175_vm1, %v3418_v9 }
 0xb87   : > { %6483 = vmatprep.mubr.msk.f32.mxu1 %vm1175_vm1, %v3262_v40  ;;  %v2490_v40 = vadd.f32 %v7470_v7, %v7599_v31  ;;  %v2505_v7 = vadd.f32 %v7480_v42, %v7609_v39  ;;  %v2510_v31 = vadd.f32 %v7478_v41, %v7607_v50 }
 0xb88   : > { %v6400_v14 = vpop.f32.mrf.mxu0 }
 0xb89   : > { %v2522_v35 = vadd.f32 %v5426_v26, %v2490_v40  ;;  %v2525_v46 = vadd.f32 %v5426_v26, %v2505_v7  ;;  %v2526_v20 = vadd.f32 %v5426_v26, %v2510_v31 }
 0xb8a   : > { %v3610_v22 = vpop.f32.mrf.mxu0  ;;  %6484 = vmatmul.mubr.msk.f32.vlgmr.msra.gmra.mxu1 %vm1175_vm1, %v6337_v17  ;;  %v2519_v17 = vadd.f32 %v5426_v26, %v2475_v29 }
 0xb8b   : > { %6486 = vmatprep.mubr.msk.f32.mxu1 %vm1175_vm1, %v3272_v62  ;;  %6516 = vmatpush3.msra.mxu1 %v4284_v18 }
 0xb8c   : > { %v6403_v15 = vpop.f32.mrf.mxu0  ;;  %6517 = vmatprep.subr.mxu1 %v4283_v4 }
 0xb8d   : > { %6518 = vmatpush3.msra.mxu1 %v4283_v4 }
 0xb8e   : > { %v3620_v1 = vpop.f32.mrf.mxu0  ;;  %6487 = vmatmul.mubr.msk.f32.gmra.mxu1 %vm1175_vm1, %v6340_v28  ;;  %6519 = vmatprep.subr.mxu1 %v4282_v59  ;;  %v2521_v28 = vadd.f32 %v5426_v26, %v2485_v34 }
 0xb8f   : > { %6489 = vmatprep.mubr.msk.f32.mxu1 %vm1175_vm1, %v3282_v21  ;;  %6520 = vmatpush3.msra.mxu1 %v4282_v59 }
 0xb90   : > { %v6406_v5 = vpop.f32.mrf.mxu0  ;;  %6521 = vmatprep.subr.mxu1 %v4281_v49 }
 0xb91   : > { %6435 = vmatprep.subr.mxu0 %v6406_v5  ;;  %6522 = vmatpush3.msra.mxu1 %v4281_v49 }
 0xb92   : > { %v3630_v38 = vpop.f32.mrf.mxu0  ;;  %6436 = vmatpush3.msra.mxu0 %v6406_v5  ;;  %6490 = vmatmul.mubr.msk.f32.gmra.mxu1 %vm1175_vm1, %v6343_v55 }
 0xb93   : > { %6437 = vmatprep.subr.mxu0 %v3630_v38  ;;  %6492 = vmatprep.mubr.msk.f32.mxu1 %vm1175_vm1, %v3292_v51 }
 0xb94   : > { %6438 = vmatpush3.msra.mxu0 %v3630_v38 }
 0xb95   : > { %6439 = vmatprep.subr.mxu0 %v6403_v15 }
 0xb96   : > { %6440 = vmatpush3.msra.mxu0 %v6403_v15  ;;  %6493 = vmatmul.mubr.msk.f32.gmra.mxu1 %vm1175_vm1, %v7807_v60 }
 0xb97   : > { %6441 = vmatprep.subr.mxu0 %v3620_v1  ;;  %6523 = vmatprep.mubr.msk.f32.mxu1 %vm680_vm0, %v2519_v17 }
 0xb98   : > { %6442 = vmatpush3.msra.mxu0 %v3620_v1 }
 0xb99   : > { %6443 = vmatprep.subr.mxu0 %v6400_v14 }
 0xb9a   : > { %6444 = vmatpush3.msra.mxu0 %v6400_v14  ;;  %6524 = vmatmul.mubr.msk.f32.vlgmr.msra.gmra.mxu1 %vm680_vm0, %v2520_v27 }
 0xb9b   : > { %6445 = vmatprep.subr.mxu0 %v3610_v22  ;;  %6526 = vmatprep.mubr.msk.f32.mxu1 %vm680_vm0, %v2521_v28 }
 0xb9c   : > { %6446 = vmatpush3.msra.mxu0 %v3610_v22 }
 0xb9d   : > { %6447 = vmatprep.subr.mxu0 %v6397_v19 }
 0xb9e   : > { %6448 = vmatpush3.msra.mxu0 %v6397_v19  ;;  %6527 = vmatmul.mubr.msk.f32.gmra.mxu1 %vm680_vm0, %v2522_v35 }
 0xb9f   : > { %6449 = vmatprep.subr.mxu0 %v3600_v52  ;;  %6529 = vmatprep.mubr.msk.f32.mxu1 %vm680_vm0, %v2523_v3 }
 0xba0   : > { %6450 = vmatpush3.msra.mxu0 %v3600_v52 }
 0xba2   : > { %6530 = vmatmul.mubr.msk.f32.gmra.mxu1 %vm680_vm0, %v2524_v11 }
 0xba3   : > { %6532 = vmatprep.mubr.msk.f32.mxu1 %vm680_vm0, %v2525_v46 }
 0xba6   : > { %6533 = vmatmul.mubr.msk.f32.gmra.mxu1 %vm680_vm0, %v2526_v20 }
 0xc3a   : > { %v6425_v42 = vpop.f32.mrf.mxu1 }
 0xc3b   : > { %v3759_v33 = vadd.f32 %v6425_v42, %v7647_v54  ;;  %v2532_v42 = vld [vmem:[%s8306_s11 + $0x18] sm:$0xff] }
 0xc3c   : > { %v3753_v39 = vpop.f32.mrf.mxu1  ;;  %6463 = vmatprep.subr.mxu0 %v2532_v42 }
 0xc3d   : > { %v3754_v62 = vadd.f32 %v3753_v39, %v7652_v58  ;;  %v3795_v55 = vsel %vm1329_vm2, %v3759_v33, -inf }
 0xc3e   : > { %3796 = vmax.xlane.f32.xlu1 %v3795_v55  ;;  %v6428_v21 = vpop.f32.mrf.mxu1 }
 0xc3f   : > { %v3769_v41 = vadd.f32 %v6428_v21, %v7660_v23  ;;  %v3792_v50 = vsel %vm1329_vm2, %v3754_v62, -inf }
 0xc40   : > { %3793 = vmax.xlane.f32.xlu0 %v3792_v50  ;;  %v3763_v60 = vpop.f32.mrf.mxu1 }
 0xc41   : > { %v3764_v51 = vadd.f32 %v3763_v60, %v7670_v25  ;;  %v3801_v10 = vsel %vm1329_vm2, %v3769_v41, -inf }
 0xc42   : > { %3802 = vmax.xlane.f32.xlu1 %v3801_v10  ;;  %v6431_v0 = vpop.f32.mrf.mxu1 }
 0xc43   : > { %v3779_v54 = vadd.f32 %v6431_v0, %v7680_v56  ;;  %v3798_v58 = vsel %vm1329_vm2, %v3764_v51, -inf }
 0xc44   : > { %3799 = vmax.xlane.f32.xlu0 %v3798_v58  ;;  %v3773_v37 = vpop.f32.mrf.mxu1 }
 0xc45   : > { %v3774_v16 = vadd.f32 %v3773_v37, %v7690_v47  ;;  %v3807_v23 = vsel %vm1329_vm2, %v3779_v54, -inf  ;;  %v2531_v37 = vld [vmem:[%s8306_s11 + $0x10] sm:$0xff] }
 0xc46   : > { %3808 = vmax.xlane.f32.xlu1 %v3807_v23  ;;  %v6434_v36 = vpop.f32.mrf.mxu1 }
 0xc47   : > { %v3789_v53 = vadd.f32 %v6434_v36, %v7698_v6  ;;  %v3804_v25 = vsel %vm1329_vm2, %v3774_v16, -inf }
 0xc48   : > { %3805 = vmax.xlane.f32.xlu0 %v3804_v25  ;;  %v3783_v43 = vpop.f32.mrf.mxu1 }
 0xc49   : > { %v3784_v8 = vadd.f32 %v3783_v43, %v7705_v13  ;;  %v3813_v56 = vsel %vm1329_vm2, %v3789_v53, -inf }
 0xc4a   : > { %3814 = vmax.xlane.f32.xlu1 %v3813_v56 }
 0xc4b   : > { %v3810_v18 = vsel %vm1329_vm2, %v3784_v8, -inf }
 0xc4c   : > { %3811 = vmax.xlane.f32.xlu0 %v3810_v18 }
 0xcc7   : > { %v3797_v24 = vpop.xlane.xlu1 %3796 }
 0xcc8   : > { %v3817_v47 = vsub.f32 %v3759_v33, %v3797_v24 }
 0xcc9   : > { %v3794_v12 = vpop.xlane.xlu0 %3793 }
 0xcca   : > { %v3826_v44 = vmul.f32 1.442695, %v3817_v47  ;;  %v3816_v57 = vsub.f32 %v3754_v62, %v3794_v12  ;;  %v4288_v12 = vld [vmem:[%s8308_s13 + $0x38] sm:$0xff] }
 0xccb   : > { %v3803_v45 = vpop.xlane.xlu1 %3802 }
 0xccc   : > { %6703 = vpow2.f32 %v3826_v44  ;;  %v3824_v6 = vmul.f32 1.442695, %v3816_v57  ;;  %v3819_v48 = vsub.f32 %v3769_v41, %v3803_v45  ;;  %v4287_v45 = vld [vmem:[%s8308_s13 + $0x30] sm:$0xff] }
 0xccd   : > { %v3800_v61 = vpop.xlane.xlu0 %3799 }
 0xcce   : > { %6705 = vpow2.f32 %v3824_v6  ;;  %v3830_v2 = vmul.f32 1.442695, %v3819_v48  ;;  %v3818_v9 = vsub.f32 %v3764_v51, %v3800_v61  ;;  %v4286_v48 = vld [vmem:[%s8308_s13 + $0x28] sm:$0xff] }
 0xccf   : > { %v3809_v13 = vpop.xlane.xlu1 %3808 }
 0xcd0   : > { %6707 = vpow2.f32 %v3830_v2  ;;  %v3828_v19 = vmul.f32 1.442695, %v3818_v9  ;;  %v3821_v52 = vsub.f32 %v3779_v54, %v3809_v13 }
 0xcd1   : > { %v3806_v14 = vpop.xlane.xlu0 %3805 }
 0xcd2   : > { %6709 = vpow2.f32 %v3828_v19  ;;  %v3834_v4 = vmul.f32 1.442695, %v3821_v52  ;;  %v3820_v22 = vsub.f32 %v3774_v16, %v3806_v14  ;;  %v4285_v52 = vld [vmem:[%s8308_s13 + $0x20] sm:$0xff]  ;;  %v6485_v14 = vpop.f32.mrf.mxu1 }
 0xcd3   : > { %v3815_v59 = vpop.xlane.xlu1 %3814 }
 0xcd4   : > { %6711 = vpow2.f32 %v3834_v4  ;;  %v3832_v15 = vmul.f32 1.442695, %v3820_v22  ;;  %v3823_v49 = vsub.f32 %v3789_v53, %v3815_v59  ;;  %v4228_v4 = vpop.f32.mrf.mxu1 }
 0xcd5   : > { %v3812_v1 = vpop.xlane.xlu0 %3811 }
 0xcd6   : > { %6713 = vpow2.f32 %v3832_v15  ;;  %v3838_v5 = vmul.f32 1.442695, %v3823_v49  ;;  %v3822_v29 = vsub.f32 %v3784_v8, %v3812_v1  ;;  %v6488_v22 = vpop.f32.mrf.mxu1 }
 0xcd8   : > { %6715 = vpow2.f32 %v3838_v5  ;;  %v3836_v38 = vmul.f32 1.442695, %v3822_v29  ;;  %v4238_v59 = vpop.f32.mrf.mxu1  ;;  %v5561_v29 = vld [vmem:[%s8307_s12] ss:$0 sm:$0xff] }
 0xcd9   : > { %v6704_v26 = vpop.eup %6703 }
 0xcda   : > { %6717 = vpow2.f32 %v3836_v38  ;;  %v3843_v30 = vsel %vm1329_vm2, %v6704_v26, 0.0  ;;  %v6491_v49 = vpop.f32.mrf.mxu1 }
 0xcdb   : > { %v6706_v17 = vpop.eup %6705  ;;  %3844 = vadd.xlane.f32.xlu1 %v3843_v30 }
 0xcdc   : > { %v3840_v34 = vsel %vm1329_vm2, %v6706_v17, 0.0 }
 0xcdd   : > { %v6708_v27 = vpop.eup %6707  ;;  %3841 = vadd.xlane.f32.xlu0 %v3840_v34 }
 0xcde   : > { %v3849_v40 = vsel %vm1329_vm2, %v6708_v27, 0.0 }
 0xcdf   : > { %v6710_v28 = vpop.eup %6709  ;;  %3850 = vadd.xlane.f32.xlu1 %v3849_v40 }
 0xce0   : > { %v3846_v32 = vsel %vm1329_vm2, %v6710_v28, 0.0 }
 0xce1   : > { %v6712_v35 = vpop.eup %6711  ;;  %3847 = vadd.xlane.f32.xlu0 %v3846_v32 }
 0xce2   : > { %v3855_v63 = vsel %vm1329_vm2, %v6712_v35, 0.0 }
 0xce3   : > { %v6714_v3 = vpop.eup %6713  ;;  %3856 = vadd.xlane.f32.xlu1 %v3855_v63 }
 0xce4   : > { %v3852_v7 = vsel %vm1329_vm2, %v6714_v3, 0.0 }
 0xce5   : > { %v6716_v11 = vpop.eup %6715  ;;  %3853 = vadd.xlane.f32.xlu0 %v3852_v7 }
 0xce6   : > { %v3861_v31 = vsel %vm1329_vm2, %v6716_v11, 0.0 }
 0xce7   : > { %v6718_v46 = vpop.eup %6717  ;;  %3862 = vadd.xlane.f32.xlu1 %v3861_v31 }
 0xce8   : > { %v3858_v20 = vsel %vm1329_vm2, %v6718_v46, 0.0 }
 0xce9   : > { %3859 = vadd.xlane.f32.xlu0 %v3858_v20 }
 0xd64   : > { %v3845_v33 = vpop.xlane.xlu1 %3844 }
 0xd65   : > { %6719 = vrcp.f32 %v3845_v33 }
 0xd66   : > { %v3842_v39 = vpop.xlane.xlu0 %3841 }
 0xd67   : > { %6721 = vrcp.f32 %v3842_v39 }
 0xd68   : > { %v3851_v62 = vpop.xlane.xlu1 %3850 }
 0xd69   : > { %6723 = vrcp.f32 %v3851_v62 }
 0xd6a   : > { %v3848_v55 = vpop.xlane.xlu0 %3847 }
 0xd6b   : > { %6725 = vrcp.f32 %v3848_v55 }
 0xd6c   : > { %v3857_v21 = vpop.xlane.xlu1 %3856 }
 0xd6d   : > { %6727 = vrcp.f32 %v3857_v21 }
 0xd6e   : > { %v3854_v41 = vpop.xlane.xlu0 %3853 }
 0xd6f   : > { %6729 = vrcp.f32 %v3854_v41 }
 0xd70   : > { %v3863_v50 = vpop.xlane.xlu1 %3862 }
 0xd71   : > { %6731 = vrcp.f32 %v3863_v50 }
 0xd72   : > { %v3860_v60 = vpop.xlane.xlu0 %3859  ;;  %v6720_v51 = vpop.eup %6719 }
 0xd73   : > { %6733 = vrcp.f32 %v3860_v60  ;;  %v3873_v54 = vmul.f32 %v6720_v51, %v6704_v26 }
 0xd74   : > { %v6722_v10 = vpop.eup %6721 }
 0xd75   : > { %v3872_v0 = vmul.f32 %v6722_v10, %v6706_v17  ;;  %v4248_v17 = vpop.f32.mrf.mxu1 }
 0xd76   : > { %v6724_v58 = vpop.eup %6723 }
 0xd77   : > { %6451 = vmatprep.mubr.msk.f32.mxu0 %vm1329_vm2, %v3872_v0  ;;  %v3875_v36 = vmul.f32 %v6724_v58, %v6708_v27  ;;  %v6494_v63 = vpop.f32.mrf.mxu1 }
 0xd78   : > { %v6726_v16 = vpop.eup %6725  ;;  %6452 = vmatmul.mubr.msk.f32.vlgmr.msra.gmra.mxu0 %vm1329_vm2, %v3873_v54  ;;  %v5578_v54 = vld [vmem:[%s8309_s14] ss:$0 sm:$0xff] }
 0xd79   : > { %v3874_v23 = vmul.f32 %v6726_v16, %v6710_v28  ;;  %6464 = vmatpush3.msra.mxu0 %v2532_v42  ;;  %v4258_v42 = vpop.f32.mrf.mxu1 }
 0xd7a   : > { %6465 = vmatprep.subr.mxu0 %v2531_v37  ;;  %v6728_v53 = vpop.eup %6727 }
 0xd7b   : > { %6454 = vmatprep.mubr.msk.f32.mxu0 %vm1329_vm2, %v3874_v23  ;;  %6466 = vmatpush3.msra.mxu0 %v2531_v37  ;;  %v3877_v8 = vmul.f32 %v6728_v53, %v6712_v35  ;;  %v6525_v50 = vpop.f32.mrf.mxu1 }
 0xd7c   : > { %v6730_v25 = vpop.eup %6729  ;;  %6455 = vmatmul.mubr.msk.f32.gmra.mxu0 %vm1329_vm2, %v3875_v36  ;;  %6495 = vmatprep.subr.mxu0 %v4288_v12 }
 0xd7d   : > { %v3876_v43 = vmul.f32 %v6730_v25, %v6714_v3  ;;  %v4508_v60 = vpop.f32.mrf.mxu1  ;;  %v6783_v25 = vld [vmem:[%s6925_s29 + $0x8] sm:$0xff] }
 0xd7e   : > { %v6732_v56 = vpop.eup %6731 }
 0xd7f   : > { %6457 = vmatprep.mubr.msk.f32.mxu0 %vm1329_vm2, %v3876_v43  ;;  %v3879_v47 = vmul.f32 %v6732_v56, %v6716_v11  ;;  %v6528_v51 = vpop.f32.mrf.mxu1 }
 0xd80   : > { %v6734_v18 = vpop.eup %6733  ;;  %6458 = vmatmul.mubr.msk.f32.gmra.mxu0 %vm1329_vm2, %v3877_v8 }
 0xd81   : > { %v3878_v24 = vmul.f32 %v6734_v18, %v6718_v46  ;;  %v4518_v10 = vpop.f32.mrf.mxu1 }
 0xd83   : > { %6460 = vmatprep.mubr.msk.f32.mxu0 %vm1329_vm2, %v3878_v24  ;;  %v6531_v37 = vpop.f32.mrf.mxu1 }
 0xd84   : > { %6461 = vmatmul.mubr.msk.f32.gmra.mxu0 %vm1329_vm2, %v3879_v47  ;;  %v6784_v47 = vld [vmem:[%s6925_s29] sm:$0xff] }
 0xd85   : > { %v4528_v18 = vpop.f32.mrf.mxu1 }
 0xe38   : > { %v6453_v44 = vpop.f32.mrf.mxu0 }
 0xe3a   : > { %v3970_v57 = vpop.f32.mrf.mxu0 }
 0xe3b   : > { %6467 = vmatprep.mubr.msk.f32.mxu0 %vm1175_vm1, %v3970_v57 }
 0xe3c   : > { %v6456_v6 = vpop.f32.mrf.mxu0  ;;  %6468 = vmatmul.mubr.msk.f32.vlgmr.msra.gmra.mxu0 %vm1175_vm1, %v6453_v44 }
 0xe3d   : > { %6496 = vmatpush3.msra.mxu0 %v4288_v12 }
 0xe3e   : > { %v3980_v61 = vpop.f32.mrf.mxu0  ;;  %6497 = vmatprep.subr.mxu0 %v4287_v45 }
 0xe3f   : > { %6470 = vmatprep.mubr.msk.f32.mxu0 %vm1175_vm1, %v3980_v61  ;;  %6498 = vmatpush3.msra.mxu0 %v4287_v45 }
 0xe40   : > { %v6459_v2 = vpop.f32.mrf.mxu0  ;;  %6471 = vmatmul.mubr.msk.f32.gmra.mxu0 %vm1175_vm1, %v6456_v6  ;;  %6499 = vmatprep.subr.mxu0 %v4286_v48 }
 0xe41   : > { %6500 = vmatpush3.msra.mxu0 %v4286_v48  ;;  %v6785_v48 = vld [vmem:[%s6925_s29 + $0x18] sm:$0xff] }
 0xe42   : > { %v3990_v9 = vpop.f32.mrf.mxu0  ;;  %6501 = vmatprep.subr.mxu0 %v4285_v52 }
 0xe43   : > { %6473 = vmatprep.mubr.msk.f32.mxu0 %vm1175_vm1, %v3990_v9  ;;  %6502 = vmatpush3.msra.mxu0 %v4285_v52 }
 0xe44   : > { %v6462_v13 = vpop.f32.mrf.mxu0  ;;  %6474 = vmatmul.mubr.msk.f32.gmra.mxu0 %vm1175_vm1, %v6459_v2 }
 0xe46   : > { %v4000_v19 = vpop.f32.mrf.mxu0 }
 0xe47   : > { %6476 = vmatprep.mubr.msk.f32.mxu0 %vm1175_vm1, %v4000_v19  ;;  %v6534_v19 = vpop.f32.mrf.mxu1 }
 0xe48   : > { %6477 = vmatmul.mubr.msk.f32.gmra.mxu0 %vm1175_vm1, %v6462_v13 }
 0xefc   : > { %v6469_v15 = vpop.f32.mrf.mxu0 }
 0xefd   : > { %v4234_v1 = vadd.f32 %v6485_v14, %v6469_v15  ;;  %v6786_v14 = vld [vmem:[%s6925_s29 + $0x10] sm:$0xff] }
 0xefe   : > { %v4099_v5 = vpop.f32.mrf.mxu0 }
 0xeff   : > { %v4229_v38 = vadd.f32 %v4228_v4, %v4099_v5  ;;  %v4274_v34 = vadd.f32 %v5561_v29, %v4234_v1  ;;  %v6787_v1 = vld [vmem:[%s6925_s29 + $0x28] sm:$0xff] }
 0xf00   : > { %v6472_v26 = vpop.f32.mrf.mxu0 }
 0xf01   : > { %v4273_v30 = vadd.f32 %v5561_v29, %v4229_v38  ;;  %v4244_v27 = vadd.f32 %v6488_v22, %v6472_v26 }
 0xf02   : > { %v4109_v40 = vpop.f32.mrf.mxu0 }
 0xf03   : > { %v4239_v28 = vadd.f32 %v4238_v59, %v4109_v40  ;;  %6503 = vmatprep.mubr.msk.f32.mxu0 %vm680_vm0, %v4273_v30  ;;  %v4276_v3 = vadd.f32 %v5561_v29, %v4244_v27  ;;  %v4538_v30 = vpop.f32.mrf.mxu1 }
 0xf04   : > { %v6475_v32 = vpop.f32.mrf.mxu0  ;;  %6504 = vmatmul.mubr.msk.f32.vlgmr.msra.gmra.mxu0 %vm680_vm0, %v4274_v34  ;;  %v6788_v34 = vld [vmem:[%s6925_s29 + $0x20] sm:$0xff] }
 0xf05   : > { %v4275_v35 = vadd.f32 %v5561_v29, %v4239_v28  ;;  %v4254_v7 = vadd.f32 %v6491_v49, %v6475_v32 }
 0xf06   : > { %v4119_v11 = vpop.f32.mrf.mxu0 }
 0xf07   : > { %v4249_v31 = vadd.f32 %v4248_v17, %v4119_v11  ;;  %6506 = vmatprep.mubr.msk.f32.mxu0 %vm680_vm0, %v4275_v35  ;;  %v4278_v33 = vadd.f32 %v5561_v29, %v4254_v7  ;;  %v6789_v35 = vld [vmem:[%s6925_s29 + $0x38] sm:$0xff]  ;;  %v6790_v11 = vld [vmem:[%s6925_s29 + $0x30] sm:$0xff] }
 0xf08   : > { %v6478_v46 = vpop.f32.mrf.mxu0  ;;  %6507 = vmatmul.mubr.msk.f32.gmra.mxu0 %vm680_vm0, %v4276_v3 }
 0xf09   : > { %v4277_v20 = vadd.f32 %v5561_v29, %v4249_v31  ;;  %v4264_v39 = vadd.f32 %v6494_v63, %v6478_v46 }
 0xf0a   : > { %v4129_v62 = vpop.f32.mrf.mxu0 }
 0xf0b   : > { %v4259_v55 = vadd.f32 %v4258_v42, %v4129_v62  ;;  %6509 = vmatprep.mubr.msk.f32.mxu0 %vm680_vm0, %v4277_v20  ;;  %v4280_v41 = vadd.f32 %v5561_v29, %v4264_v39 }
 0xf0c   : > { %6510 = vmatmul.mubr.msk.f32.gmra.mxu0 %vm680_vm0, %v4278_v33 }
 0xf0d   : > { %v4279_v21 = vadd.f32 %v5561_v29, %v4259_v55 }
 0xf0f   : > { %6512 = vmatprep.mubr.msk.f32.mxu0 %vm680_vm0, %v4279_v21 }
 0xf10   : > { %6513 = vmatmul.mubr.msk.f32.gmra.mxu0 %vm680_vm0, %v4280_v41 }
 0xfc4   : > { %v6505_v0 = vpop.f32.mrf.mxu0 }
 0xfc5   : > { %v4514_v58 = vadd.f32 %v6525_v50, %v6505_v0 }
 0xfc6   : > { %v4379_v16 = vpop.f32.mrf.mxu0 }
 0xfc7   : > { %v4555_v23 = vadd.f32 %v5578_v54, %v4514_v58  ;;  %v4509_v36 = vadd.f32 %v4508_v60, %v4379_v16 }
 0xfc8   : > { %v6508_v53 = vpop.f32.mrf.mxu0 }
 0xfc9   : > { %v7941_v43 = vadd.f32 %v6783_v25, %v4555_v23  ;;  %v4554_v8 = vadd.f32 %v5578_v54, %v4509_v36  ;;  %v4524_v56 = vadd.f32 %v6528_v51, %v6508_v53 }
 0xfca   : > { %v4389_v24 = vpop.f32.mrf.mxu0 }
 0xfcb   : > { %v7944_v12 = vadd.f32 %v6784_v47, %v4554_v8  ;;  %v4557_v44 = vadd.f32 %v5578_v54, %v4524_v56  ;;  %v4519_v57 = vadd.f32 %v4518_v10, %v4389_v24  ;;  %v4575_v45 = vsel %vm680_vm0, %v7941_v43, 0.0 }
 0xfcc   : > { %4576 = vadd.xlane.f32.xlu1 %v4575_v45  ;;  %v6511_v6 = vpop.f32.mrf.mxu0 }
 0xfcd   : > { %v7949_v61 = vadd.f32 %v6785_v48, %v4557_v44  ;;  %v4556_v2 = vadd.f32 %v5578_v54, %v4519_v57  ;;  %v4534_v9 = vadd.f32 %v6531_v37, %v6511_v6  ;;  %v4572_v13 = vsel %vm680_vm0, %v7944_v12, 0.0 }
 0xfce   : > { %4573 = vadd.xlane.f32.xlu0 %v4572_v13  ;;  %v4399_v52 = vpop.f32.mrf.mxu0 }
 0xfcf   : > { %v7954_v4 = vadd.f32 %v6786_v14, %v4556_v2  ;;  %v4559_v22 = vadd.f32 %v5578_v54, %v4534_v9  ;;  %v4529_v59 = vadd.f32 %v4528_v18, %v4399_v52  ;;  %v4581_v15 = vsel %vm680_vm0, %v7949_v61, 0.0 }
 0xfd0   : > { %4582 = vadd.xlane.f32.xlu1 %v4581_v15  ;;  %v6514_v49 = vpop.f32.mrf.mxu0 }
 0xfd1   : > { %v7959_v5 = vadd.f32 %v6787_v1, %v4559_v22  ;;  %v4558_v29 = vadd.f32 %v5578_v54, %v4529_v59  ;;  %v4544_v38 = vadd.f32 %v6534_v19, %v6514_v49  ;;  %v4578_v26 = vsel %vm680_vm0, %v7954_v4, 0.0  ;;  %v4707_v1 = vld [vmem:[%s8312_s17 + $0x18] sm:$0xff] }
 0xfd2   : > { %4579 = vadd.xlane.f32.xlu0 %v4578_v26  ;;  %v4409_v17 = vpop.f32.mrf.mxu0  ;;  %6535 = vmatprep.subr.mxu0 %v4707_v1  ;;  %v4704_v26 = vld [vmem:[%s8312_s17] sm:$0xff] }
 0xfd3   : > { %v7964_v27 = vadd.f32 %v6788_v34, %v4558_v29  ;;  %v4561_v40 = vadd.f32 %v5578_v54, %v4544_v38  ;;  %v4539_v28 = vadd.f32 %v4538_v30, %v4409_v17  ;;  %v4587_v32 = vsel %vm680_vm0, %v7959_v5, 0.0  ;;  %6536 = vmatpush3.msra.mxu0 %v4707_v1  ;;  %v4706_v29 = vld [vmem:[%s8312_s17 + $0x10] sm:$0xff]  ;;  %v4705_v38 = vld [vmem:[%s8312_s17 + $0x8] sm:$0xff] }
 0xfd4   : > { %4588 = vadd.xlane.f32.xlu1 %v4587_v32  ;;  %6537 = vmatprep.subr.mxu0 %v4706_v29 }
 0xfd5   : > { %v7969_v63 = vadd.f32 %v6789_v35, %v4561_v40  ;;  %v4560_v3 = vadd.f32 %v5578_v54, %v4539_v28  ;;  %v4584_v7 = vsel %vm680_vm0, %v7964_v27, 0.0  ;;  %6538 = vmatpush3.msra.mxu0 %v4706_v29 }
 0xfd6   : > { %4585 = vadd.xlane.f32.xlu0 %v4584_v7  ;;  %6539 = vmatprep.subr.mxu0 %v4705_v38 }
 0xfd7   : > { %v7974_v31 = vadd.f32 %v6790_v11, %v4560_v3  ;;  %v4593_v46 = vsel %vm680_vm0, %v7969_v63, 0.0  ;;  %6540 = vmatpush3.msra.mxu0 %v4705_v38 }
 0xfd8   : > { %4594 = vadd.xlane.f32.xlu1 %v4593_v46  ;;  %6541 = vmatprep.subr.mxu0 %v4704_v26 }
 0xfd9   : > { %v4590_v20 = vsel %vm680_vm0, %v7974_v31, 0.0  ;;  %6542 = vmatpush3.msra.mxu0 %v4704_v26 }
 0xfda   : > { %4591 = vadd.xlane.f32.xlu0 %v4590_v20 }
0x1055   : > { %v4577_v42 = vpop.xlane.xlu1 %4576 }
0x1056   : > { %v4597_v33 = vmul.f32 0.03125, %v4577_v42 }
0x1057   : > { %v4574_v39 = vpop.xlane.xlu0 %4573 }
0x1058   : > { %v7981_v62 = vsub.f32 %v7941_v43, %v4597_v33  ;;  %v4596_v55 = vmul.f32 0.03125, %v4574_v39 }
0x1059   : > { %v4583_v21 = vpop.xlane.xlu1 %4582 }
0x105a   : > { %v7984_v41 = vsub.f32 %v7944_v12, %v4596_v55  ;;  %v4599_v50 = vmul.f32 0.03125, %v4583_v21  ;;  %v4613_v60 = vmul.f32 %v7981_v62, %v7981_v62 }
0x105b   : > { %v4580_v51 = vpop.xlane.xlu0 %4579 }
0x105c   : > { %v7989_v10 = vsub.f32 %v7949_v61, %v4599_v50  ;;  %v4598_v0 = vmul.f32 0.03125, %v4580_v51  ;;  %v4623_v54 = vsel %vm680_vm0, %v4613_v60, 0.0  ;;  %v4612_v58 = vmul.f32 %v7984_v41, %v7984_v41 }
0x105d   : > { %v4589_v37 = vpop.xlane.xlu1 %4588  ;;  %4624 = vadd.xlane.f32.xlu1 %v4623_v54 }
0x105e   : > { %v7995_v16 = vsub.f32 %v7954_v4, %v4598_v0  ;;  %v4601_v23 = vmul.f32 0.03125, %v4589_v37  ;;  %v4620_v36 = vsel %vm680_vm0, %v4612_v58, 0.0  ;;  %v4615_v53 = vmul.f32 %v7989_v10, %v7989_v10 }
0x105f   : > { %v4586_v25 = vpop.xlane.xlu0 %4585  ;;  %4621 = vadd.xlane.f32.xlu0 %v4620_v36  ;;  %v5579_v36 = vld [vmem:[%s8310_s15] ss:$0 sm:$0xff] }
0x1060   : > { %v8001_v8 = vsub.f32 %v7959_v5, %v4601_v23  ;;  %v4600_v56 = vmul.f32 0.03125, %v4586_v25  ;;  %v4629_v18 = vsel %vm680_vm0, %v4615_v53, 0.0  ;;  %v4614_v24 = vmul.f32 %v7995_v16, %v7995_v16 }
0x1061   : > { %4630 = vadd.xlane.f32.xlu1 %v4629_v18  ;;  %v4595_v47 = vpop.xlane.xlu1 %4594 }
0x1062   : > { %v8007_v44 = vsub.f32 %v7964_v27, %v4600_v56  ;;  %v4603_v57 = vmul.f32 0.03125, %v4595_v47  ;;  %v4626_v45 = vsel %vm680_vm0, %v4614_v24, 0.0  ;;  %v4617_v6 = vmul.f32 %v8001_v8, %v8001_v8  ;;  %v5580_v47 = vld [vmem:[%s8311_s16] ss:$0 sm:$0xff] }
0x1063   : > { %4627 = vadd.xlane.f32.xlu0 %v4626_v45  ;;  %v4592_v48 = vpop.xlane.xlu0 %4591 }
0x1064   : > { %v8013_v2 = vsub.f32 %v7969_v63, %v4603_v57  ;;  %v4602_v9 = vmul.f32 0.03125, %v4592_v48  ;;  %v4635_v13 = vsel %vm680_vm0, %v4617_v6, 0.0  ;;  %v4616_v19 = vmul.f32 %v8007_v44, %v8007_v44 }
0x1065   : > { %4636 = vadd.xlane.f32.xlu1 %v4635_v13 }
0x1066   : > { %v8019_v52 = vsub.f32 %v7974_v31, %v4602_v9  ;;  %v4632_v14 = vsel %vm680_vm0, %v4616_v19, 0.0  ;;  %v4619_v22 = vmul.f32 %v8013_v2, %v8013_v2 }
0x1067   : > { %4633 = vadd.xlane.f32.xlu0 %v4632_v14 }
0x1068   : > { %v4641_v59 = vsel %vm680_vm0, %v4619_v22, 0.0  ;;  %v4618_v15 = vmul.f32 %v8019_v52, %v8019_v52 }
0x1069   : > { %4642 = vadd.xlane.f32.xlu1 %v4641_v59 }
0x106a   : > { %v4638_v49 = vsel %vm680_vm0, %v4618_v15, 0.0 }
0x106b   : > { %4639 = vadd.xlane.f32.xlu0 %v4638_v49 }
0x10e6   : > { %v4625_v30 = vpop.xlane.xlu1 %4624 }
0x10e7   : > { %v4645_v17 = vmul.f32 0.03125, %v4625_v30 }
0x10e8   : > { %v4622_v34 = vpop.xlane.xlu0 %4621 }
0x10e9   : > { %v4653_v40 = vadd.f32 1e-05, %v4645_v17  ;;  %v4644_v28 = vmul.f32 0.03125, %v4622_v34 }
0x10ea   : > { %v4631_v32 = vpop.xlane.xlu1 %4630 }
0x10eb   : > { %6735 = vrsqrt.f32 %v4653_v40  ;;  %v4652_v35 = vadd.f32 1e-05, %v4644_v28  ;;  %v4647_v3 = vmul.f32 0.03125, %v4631_v32  ;;  %v5066_v40 = vld [vmem:[%s8314_s19 + $0x30] sm:$0xff]  ;;  %v5065_v28 = vld [vmem:[%s8314_s19 + $0x28] sm:$0xff]  ;;  %v5064_v32 = vld [vmem:[%s8314_s19 + $0x20] sm:$0xff] }
0x10ec   : > { %v4628_v7 = vpop.xlane.xlu0 %4627 }
0x10ed   : > { %6737 = vrsqrt.f32 %v4652_v35  ;;  %v4655_v11 = vadd.f32 1e-05, %v4647_v3  ;;  %v4646_v46 = vmul.f32 0.03125, %v4628_v7  ;;  %v5063_v35 = vld [vmem:[%s8314_s19 + $0x18] sm:$0xff]  ;;  %v5062_v3 = vld [vmem:[%s8314_s19 + $0x10] sm:$0xff]  ;;  %v5061_v7 = vld [vmem:[%s8314_s19 + $0x8] sm:$0xff] }
0x10ee   : > { %v4637_v20 = vpop.xlane.xlu1 %4636 }
0x10ef   : > { %6739 = vrsqrt.f32 %v4655_v11  ;;  %v4654_v42 = vadd.f32 1e-05, %v4646_v46  ;;  %v4649_v33 = vmul.f32 0.03125, %v4637_v20  ;;  %v5060_v11 = vld [vmem:[%s8314_s19] sm:$0xff] }
0x10f0   : > { %v4634_v39 = vpop.xlane.xlu0 %4633  ;;  %v5581_v46 = vld [vmem:[%s8313_s18] ss:$0 sm:$0xff] }
0x10f1   : > { %6741 = vrsqrt.f32 %v4654_v42  ;;  %v4657_v55 = vadd.f32 1e-05, %v4649_v33  ;;  %v4648_v21 = vmul.f32 0.03125, %v4634_v39 }
0x10f2   : > { %v4643_v50 = vpop.xlane.xlu1 %4642 }
0x10f3   : > { %6743 = vrsqrt.f32 %v4657_v55  ;;  %v4656_v60 = vadd.f32 1e-05, %v4648_v21  ;;  %v4651_v51 = vmul.f32 0.03125, %v4643_v50 }
0x10f4   : > { %v4640_v0 = vpop.xlane.xlu0 %4639 }
0x10f5   : > { %6745 = vrsqrt.f32 %v4656_v60  ;;  %v4659_v54 = vadd.f32 1e-05, %v4651_v51  ;;  %v4650_v58 = vmul.f32 0.03125, %v4640_v0 }
0x10f7   : > { %6747 = vrsqrt.f32 %v4659_v54  ;;  %v4658_v37 = vadd.f32 1e-05, %v4650_v58 }
0x10f8   : > { %v6736_v23 = vpop.eup %6735 }
0x10f9   : > { %v4669_v53 = vmul.f32 %v6736_v23, %v7981_v62  ;;  %6749 = vrsqrt.f32 %v4658_v37 }
0x10fa   : > { %v6738_v25 = vpop.eup %6737 }
0x10fb   : > { %v4668_v56 = vmul.f32 %v6738_v25, %v7984_v41  ;;  %v4683_v24 = vmul.f32 %v5579_v36, %v4669_v53 }
0x10fc   : > { %v6740_v18 = vpop.eup %6739 }
0x10fd   : > { %v4671_v57 = vmul.f32 %v6740_v18, %v7989_v10  ;;  %v4682_v45 = vmul.f32 %v5579_v36, %v4668_v56  ;;  %v8052_v62 = vadd.f32 %v5580_v47, %v4683_v24 }
0x10fe   : > { %v6742_v6 = vpop.eup %6741 }
0x10ff   : > { %v8049_v48 = vadd.f32 %v5580_v47, %v4682_v45  ;;  %v4670_v9 = vmul.f32 %v6742_v6, %v7995_v16  ;;  %v4685_v19 = vmul.f32 %v5579_v36, %v4671_v57 }
0x1100   : > { %v6744_v13 = vpop.eup %6743 }
0x1101   : > { %v4673_v41 = vmul.f32 %v6744_v13, %v8001_v8  ;;  %6543 = vmatprep.mubr.msk.f32.mxu0 %vm680_vm0, %v8049_v48  ;;  %v4684_v14 = vmul.f32 %v5579_v36, %v4670_v9  ;;  %v8062_v16 = vadd.f32 %v5580_v47, %v4685_v19 }
0x1102   : > { %v6746_v22 = vpop.eup %6745  ;;  %6544 = vmatmul.mubr.msk.f32.vlgmr.msra.gmra.mxu0 %vm680_vm0, %v8052_v62 }
0x1103   : > { %v8059_v10 = vadd.f32 %v5580_v47, %v4684_v14  ;;  %v4672_v59 = vmul.f32 %v6746_v22, %v8007_v44  ;;  %v4687_v49 = vmul.f32 %v5579_v36, %v4673_v41 }
0x1104   : > { %v6748_v15 = vpop.eup %6747 }
0x1105   : > { %v4675_v1 = vmul.f32 %v6748_v15, %v8013_v2  ;;  %6546 = vmatprep.mubr.msk.f32.mxu0 %vm680_vm0, %v8059_v10  ;;  %v4686_v8 = vmul.f32 %v5579_v36, %v4672_v59  ;;  %v8072_v30 = vadd.f32 %v5580_v47, %v4687_v49 }
0x1106   : > { %v6750_v29 = vpop.eup %6749  ;;  %6547 = vmatmul.mubr.msk.f32.gmra.mxu0 %vm680_vm0, %v8062_v16 }
0x1107   : > { %v8069_v38 = vadd.f32 %v5580_v47, %v4686_v8  ;;  %v4674_v26 = vmul.f32 %v6750_v29, %v8019_v52  ;;  %v4689_v44 = vmul.f32 %v5579_v36, %v4675_v1  ;;  %v5067_v52 = vld [vmem:[%s8314_s19 + $0x38] sm:$0xff] }
0x1108   : > { %6555 = vmatprep.subr.mxu1 %v5067_v52 }
0x1109   : > { %6549 = vmatprep.mubr.msk.f32.mxu0 %vm680_vm0, %v8069_v38  ;;  %v4688_v17 = vmul.f32 %v5579_v36, %v4674_v26  ;;  %v8080_v34 = vadd.f32 %v5580_v47, %v4689_v44  ;;  %6556 = vmatpush3.msra.mxu1 %v5067_v52 }
0x110a   : > { %6550 = vmatmul.mubr.msk.f32.gmra.mxu0 %vm680_vm0, %v8072_v30  ;;  %6557 = vmatprep.subr.mxu1 %v5066_v40 }
0x110b   : > { %v8078_v2 = vadd.f32 %v5580_v47, %v4688_v17  ;;  %6558 = vmatpush3.msra.mxu1 %v5066_v40 }
0x110c   : > { %6559 = vmatprep.subr.mxu1 %v5065_v28 }
0x110d   : > { %6552 = vmatprep.mubr.msk.f32.mxu0 %vm680_vm0, %v8078_v2  ;;  %6560 = vmatpush3.msra.mxu1 %v5065_v28 }
0x110e   : > { %6553 = vmatmul.mubr.msk.f32.gmra.mxu0 %vm680_vm0, %v8080_v34  ;;  %6561 = vmatprep.subr.mxu1 %v5064_v32 }
0x110f   : > { %6562 = vmatpush3.msra.mxu1 %v5064_v32 }
0x1110   : > { %6563 = vmatprep.subr.mxu1 %v5063_v35 }
0x1111   : > { %6564 = vmatpush3.msra.mxu1 %v5063_v35 }
0x1112   : > { %6565 = vmatprep.subr.mxu1 %v5062_v3 }
0x1113   : > { %6566 = vmatpush3.msra.mxu1 %v5062_v3 }
0x1114   : > { %6567 = vmatprep.subr.mxu1 %v5061_v7 }
0x1115   : > { %6568 = vmatpush3.msra.mxu1 %v5061_v7 }
0x1116   : > { %6569 = vmatprep.subr.mxu1 %v5060_v11 }
0x1117   : > { %6570 = vmatpush3.msra.mxu1 %v5060_v11 }
0x11c2   : > { %v6545_v20 = vpop.f32.mrf.mxu0 }
0x11c3   : > { %v8113_v42 = vadd.f32 %v6545_v20, %v5581_v46 }
0x11c4   : > { %v4805_v33 = vpop.f32.mrf.mxu0 }
0x11c5   : > { %v8116_v39 = vmul.f32 0.70710677, %v8113_v42  ;;  %v8118_v55 = vadd.f32 %v5581_v46, %v4805_v33 }
0x11c6   : > { %v6548_v21 = vpop.f32.mrf.mxu0 }
0x11c7   : > { %v4861_v50 = vand.u32 2147483647, %v8116_v39  ;;  %v8122_v60 = vmul.f32 0.70710677, %v8118_v55  ;;  %v8124_v51 = vadd.f32 %v6548_v21, %v5581_v46  ;;  %vm5021_vm3 = vcmp.ge.f32.partialorder %v8116_v39, 0.0 }
0x11c8   : > { %v4815_v0 = vpop.f32.mrf.mxu0 }
0x11c9   : > { %v4869_v54 = vmul.f32 0.3275911, %v4861_v50  ;;  %v4860_v58 = vand.u32 2147483647, %v8122_v60  ;;  %v8128_v37 = vmul.f32 0.70710677, %v8124_v51  ;;  %v8130_v23 = vadd.f32 %v5581_v46, %v4815_v0 }
0x11ca   : > { %v6551_v36 = vpop.f32.mrf.mxu0  ;;  %v4973_v19 = vsub.f32 0.0, %v4861_v50  ;;  %vm5020_vm4 = vcmp.ge.f32.partialorder %v8122_v60, 0.0 }
0x11cb   : > { %v4877_v53 = vadd.f32 1.0, %v4869_v54  ;;  %v4868_v25 = vmul.f32 0.3275911, %v4860_v58  ;;  %v4863_v56 = vand.u32 2147483647, %v8128_v37  ;;  %v8137_v9 = vadd.f32 %v6551_v36, %v5581_v46 }
0x11cc   : > { %v8134_v18 = vmul.f32 0.70710677, %v8130_v23  ;;  %v4825_v24 = vpop.f32.mrf.mxu0  ;;  %v4981_v8 = vmul.f32 %v4973_v19, %v4861_v50  ;;  %v4972_v26 = vsub.f32 0.0, %v4860_v58  ;;  %vm5023_vm5 = vcmp.ge.f32.partialorder %v8128_v37, 0.0 }
0x11cd   : > { %6751 = vrcp.f32 %v4877_v53  ;;  %v4876_v47 = vadd.f32 1.0, %v4868_v25  ;;  %v4871_v57 = vmul.f32 0.3275911, %v4863_v56  ;;  %v8139_v13 = vadd.f32 %v5581_v46, %v4825_v24 }
0x11ce   : > { %v4862_v45 = vand.u32 2147483647, %v8134_v18  ;;  %v6554_v6 = vpop.f32.mrf.mxu0  ;;  %v8142_v22 = vmul.f32 0.70710677, %v8137_v9  ;;  %v4975_v52 = vsub.f32 0.0, %v4863_v56  ;;  %v4980_v11 = vmul.f32 %v4972_v26, %v4860_v58 }
0x11cf   : > { %6753 = vrcp.f32 %v4876_v47  ;;  %v4879_v41 = vadd.f32 1.0, %v4871_v57  ;;  %v8146_v1 = vmul.f32 0.70710677, %v8139_v13  ;;  %v8148_v29 = vadd.f32 %v6554_v6, %v5581_v46 }
0x11d0   : > { %v4870_v14 = vmul.f32 0.3275911, %v4862_v45  ;;  %v4835_v15 = vpop.f32.mrf.mxu0  ;;  %v4865_v49 = vand.u32 2147483647, %v8142_v22  ;;  %v4990_v7 = vmul.f32 1.442695, %v4981_v8 }
0x11d1   : > { %6755 = vrcp.f32 %v4879_v41  ;;  %v8150_v17 = vadd.f32 %v5581_v46, %v4835_v15  ;;  %v4864_v40 = vand.u32 2147483647, %v8146_v1  ;;  %v8154_v28 = vmul.f32 0.70710677, %v8148_v29 }
0x11d2   : > { %v4878_v59 = vadd.f32 1.0, %v4870_v14  ;;  %v4873_v44 = vmul.f32 0.3275911, %v4865_v49  ;;  %v4983_v46 = vmul.f32 %v4975_v52, %v4863_v56  ;;  %v4974_v21 = vsub.f32 0.0, %v4862_v45 }
0x11d3   : > { %v4872_v35 = vmul.f32 0.3275911, %v4864_v40  ;;  %v4867_v3 = vand.u32 2147483647, %v8154_v28  ;;  %v8158_v20 = vmul.f32 0.70710677, %v8150_v17 }
0x11d4   : > { %6757 = vrcp.f32 %v4878_v59  ;;  %v4881_v32 = vadd.f32 1.0, %v4873_v44  ;;  %v4977_v58 = vsub.f32 0.0, %v4865_v49  ;;  %v4988_v6 = vmul.f32 1.442695, %v4980_v11 }
0x11d5   : > { %v4880_v50 = vadd.f32 1.0, %v4872_v35  ;;  %v4875_v0 = vmul.f32 0.3275911, %v4867_v3  ;;  %v4866_v36 = vand.u32 2147483647, %v8158_v20  ;;  %v4982_v56 = vmul.f32 %v4974_v21, %v4862_v45 }
0x11d6   : > { %6759 = vrcp.f32 %v4881_v32  ;;  %v4994_v19 = vmul.f32 1.442695, %v4983_v46  ;;  %v4976_v59 = vsub.f32 0.0, %v4864_v40  ;;  %v4979_v44 = vsub.f32 0.0, %v4867_v3 }
0x11d7   : > { %6761 = vrcp.f32 %v4880_v50  ;;  %v4883_v53 = vadd.f32 1.0, %v4875_v0  ;;  %v4874_v47 = vmul.f32 0.3275911, %v4866_v36  ;;  %v4985_v32 = vmul.f32 %v4977_v58, %v4865_v49 }
0x11d8   : > { %6763 = vpow2.f32 %v4990_v7  ;;  %v4992_v11 = vmul.f32 1.442695, %v4982_v56  ;;  %v4984_v50 = vmul.f32 %v4976_v59, %v4864_v40  ;;  %v4978_v56 = vsub.f32 0.0, %v4866_v36 }
0x11d9   : > { %6765 = vrcp.f32 %v4883_v53  ;;  %v4882_v15 = vadd.f32 1.0, %v4874_v47  ;;  %v4987_v53 = vmul.f32 %v4979_v44, %v4867_v3  ;;  %v4998_v58 = vmul.f32 1.442695, %v4985_v32 }
0x11da   : > { %v8160_v33 = vpop.eup %6751  ;;  %v4996_v59 = vmul.f32 1.442695, %v4984_v50  ;;  %vm5022_vm6 = vcmp.ge.f32.partialorder %v8134_v18, 0.0  ;;  %v4846_v37 = vmul.f32 0.5, %v8130_v23  ;;  %vm5025_vm7 = vcmp.ge.f32.partialorder %v8142_v22, 0.0 }
0x11db   : > { %v4901_v54 = vmul.f32 1.0614054, %v8160_v33  ;;  %6767 = vrcp.f32 %v4882_v15  ;;  %vm5024_vm8 = vcmp.ge.f32.partialorder %v8146_v1, 0.0  ;;  %vm5027_vm9 = vcmp.ge.f32.partialorder %v8154_v28, 0.0  ;;  %v5590_v28 = vld [vmem:[%s8315_s20] ss:$0 sm:$0xff] }
0x11dc   : > { %v8164_v25 = vpop.eup %6753  ;;  %6769 = vpow2.f32 %v4988_v6  ;;  %vm5026_vm10 = vcmp.ge.f32.partialorder %v8158_v20, 0.0 }
0x11dd   : > { %v4909_v24 = vadd.f32 -1.4531521, %v4901_v54  ;;  %v4900_v57 = vmul.f32 1.0614054, %v8164_v25  ;;  %6771 = vpow2.f32 %v4994_v19  ;;  %v8184_v19 = vmul.f32 0.5, %v8118_v55 }
0x11de   : > { %v8167_v41 = vpop.eup %6755  ;;  %6773 = vpow2.f32 %v4992_v11  ;;  %v4986_v55 = vmul.f32 %v4978_v56, %v4866_v36 }
0x11df   : > { %v4917_v14 = vmul.f32 %v8160_v33, %v4909_v24  ;;  %v4908_v8 = vadd.f32 -1.4531521, %v4900_v57  ;;  %v4903_v26 = vmul.f32 1.0614054, %v8167_v41  ;;  %6775 = vpow2.f32 %v4998_v58 }
0x11e0   : > { %6777 = vpow2.f32 %v4996_v59  ;;  %v5000_v59 = vmul.f32 1.442695, %v4986_v55 }
0x11e1   : > { %v4925_v52 = vadd.f32 1.4214138, %v4917_v14  ;;  %v8171_v35 = vpop.eup %6757  ;;  %v4916_v7 = vmul.f32 %v8164_v25, %v4908_v8  ;;  %v4911_v45 = vadd.f32 -1.4531521, %v4903_v26  ;;  %v5002_v26 = vmul.f32 1.442695, %v4987_v53 }
0x11e2   : > { %v4902_v21 = vmul.f32 1.0614054, %v8171_v35 }
0x11e3   : > { %v4933_v46 = vmul.f32 %v8160_v33, %v4925_v52  ;;  %v4924_v0 = vadd.f32 1.4214138, %v4916_v7  ;;  %v4919_v54 = vmul.f32 %v8167_v41, %v4911_v45  ;;  %v8177_v47 = vpop.eup %6759  ;;  %6779 = vpow2.f32 %v5002_v26 }
0x11e4   : > { %v4910_v49 = vadd.f32 -1.4531521, %v4902_v21  ;;  %v4905_v40 = vmul.f32 1.0614054, %v8177_v47  ;;  %v8187_v44 = vpop.eup %6761  ;;  %6781 = vpow2.f32 %v5000_v59 }
0x11e5   : > { %v4941_v24 = vadd.f32 -0.28449672, %v4933_v46  ;;  %v4932_v57 = vmul.f32 %v8164_v25, %v4924_v0  ;;  %v4927_v6 = vadd.f32 1.4214138, %v4919_v54  ;;  %v6764_v45 = vpop.eup %6763  ;;  %v4904_v21 = vmul.f32 1.0614054, %v8187_v44 }
0x11e6   : > { %v4918_v15 = vmul.f32 %v8171_v35, %v4910_v49  ;;  %v4913_v7 = vadd.f32 -1.4531521, %v4905_v40  ;;  %v8195_v53 = vpop.eup %6765 }
0x11e7   : > { %v4949_v14 = vmul.f32 %v8160_v33, %v4941_v24  ;;  %v4940_v3 = vadd.f32 -0.28449672, %v4932_v57  ;;  %v4935_v8 = vmul.f32 %v8167_v41, %v4927_v6  ;;  %v4912_v58 = vadd.f32 -1.4531521, %v4904_v21 }
0x11e8   : > { %v4926_v32 = vadd.f32 1.4214138, %v4918_v15  ;;  %v4921_v54 = vmul.f32 %v8177_v47, %v4913_v7  ;;  %v4907_v36 = vmul.f32 1.0614054, %v8195_v53 }
0x11e9   : > { %v4957_v52 = vadd.f32 0.2548296, %v4949_v14  ;;  %v4948_v11 = vmul.f32 %v8164_v25, %v4940_v3  ;;  %v4943_v46 = vadd.f32 -0.28449672, %v4935_v8  ;;  %v4920_v40 = vmul.f32 %v8187_v44, %v4912_v58 }
0x11ea   : > { %v4934_v0 = vmul.f32 %v8171_v35, %v4926_v32  ;;  %v4929_v14 = vadd.f32 1.4214138, %v4921_v54  ;;  %v4915_v32 = vadd.f32 -1.4531521, %v4907_v36 }
0x11eb   : > { %v4965_v50 = vmul.f32 %v8160_v33, %v4957_v52  ;;  %v4956_v24 = vadd.f32 0.2548296, %v4948_v11  ;;  %v4951_v49 = vmul.f32 %v8167_v41, %v4943_v46  ;;  %v8200_v33 = vpop.eup %6767  ;;  %v4928_v11 = vadd.f32 1.4214138, %v4920_v40 }
0x11ec   : > { %v4942_v6 = vadd.f32 -0.28449672, %v4934_v0  ;;  %v6770_v3 = vpop.eup %6769  ;;  %v4937_v52 = vmul.f32 %v8177_v47, %v4929_v14  ;;  %v4906_v46 = vmul.f32 1.0614054, %v8200_v33  ;;  %v4923_v55 = vmul.f32 %v8195_v53, %v4915_v32 }
0x11ed   : > { %v5005_v57 = vmul.f32 %v6764_v45, %v4965_v50  ;;  %v4964_v56 = vmul.f32 %v8164_v25, %v4956_v24  ;;  %v4959_v15 = vadd.f32 0.2548296, %v4951_v49  ;;  %v6772_v25 = vpop.eup %6771  ;;  %v4936_v49 = vmul.f32 %v8187_v44, %v4928_v11 }
0x11ee   : > { %v4950_v26 = vmul.f32 %v8171_v35, %v4942_v6  ;;  %v4945_v0 = vadd.f32 -0.28449672, %v4937_v52  ;;  %v4914_v58 = vadd.f32 -1.4531521, %v4906_v46  ;;  %v4931_v36 = vadd.f32 1.4214138, %v4923_v55 }
0x11ef   : > { %v5013_v8 = vsub.f32 1.0, %v5005_v57  ;;  %v5004_v7 = vmul.f32 %v6770_v3, %v4964_v56  ;;  %v4967_v45 = vmul.f32 %v8167_v41, %v4959_v15  ;;  %v6774_v57 = vpop.eup %6773  ;;  %v4944_v40 = vadd.f32 -0.28449672, %v4936_v49 }
0x11f0   : > { %v4958_v50 = vadd.f32 0.2548296, %v4950_v26  ;;  %v4953_v14 = vmul.f32 %v8177_v47, %v4945_v0  ;;  %v4939_v52 = vmul.f32 %v8195_v53, %v4931_v36  ;;  %v4922_v32 = vmul.f32 %v8200_v33, %v4914_v58 }
0x11f1   : > { %v5029_v21 = vsub.f32 0.0, %v5013_v8  ;;  %v5012_v54 = vsub.f32 1.0, %v5004_v7  ;;  %v5007_v24 = vmul.f32 %v6772_v25, %v4967_v45  ;;  %v6776_v7 = vpop.eup %6775 }
0x11f2   : > { %v4966_v41 = vmul.f32 %v8171_v35, %v4958_v50  ;;  %v4961_v26 = vadd.f32 0.2548296, %v4953_v14  ;;  %v4952_v35 = vmul.f32 %v8187_v44, %v4944_v40  ;;  %v6778_v59 = vpop.eup %6777  ;;  %v4845_v50 = vmul.f32 0.5, %v8113_v42 }
0x11f3   : > { %v5037_v6 = vsel %vm5021_vm3, %v5013_v8, %v5029_v21  ;;  %v5028_v56 = vsub.f32 0.0, %v5012_v54  ;;  %v5015_v15 = vsub.f32 1.0, %v5007_v24  ;;  %v4947_v21 = vadd.f32 -0.28449672, %v4939_v52  ;;  %v6780_v49 = vpop.eup %6779 }
0x11f4   : > { %v5006_v3 = vmul.f32 %v6774_v57, %v4966_v41  ;;  %v5045_v45 = vadd.f32 1.0, %v5037_v6  ;;  %v4969_v25 = vmul.f32 %v8177_v47, %v4961_v26  ;;  %v4960_v55 = vadd.f32 0.2548296, %v4952_v35  ;;  %v6782_v35 = vpop.eup %6781 }
0x11f5   : > { %v5036_v39 = vsel %vm5020_vm4, %v5012_v54, %v5028_v56  ;;  %v5031_v8 = vsub.f32 0.0, %v5015_v15  ;;  %v4930_v24 = vadd.f32 1.4214138, %v4922_v32  ;;  %v4955_v47 = vmul.f32 %v8195_v53, %v4947_v21 }
0x11f6   : > { %v5044_v11 = vadd.f32 1.0, %v5036_v39  ;;  %v5014_v46 = vsub.f32 1.0, %v5006_v3  ;;  %v5009_v58 = vmul.f32 %v6776_v7, %v4969_v25  ;;  %v5053_v57 = vmul.f32 %v5045_v45, %v4845_v50 }
0x11f7   : > { %v5039_v0 = vsel %vm5023_vm5, %v5015_v15, %v5031_v8  ;;  %v4968_v6 = vmul.f32 %v8187_v44, %v4960_v55  ;;  %v4938_v41 = vmul.f32 %v8200_v33, %v4930_v24  ;;  %v4963_v15 = vadd.f32 0.2548296, %v4955_v47 }
0x11f8   : > { %v5052_v60 = vmul.f32 %v5044_v11, %v8184_v19  ;;  %v5030_v54 = vsub.f32 0.0, %v5014_v46  ;;  %v5047_v42 = vadd.f32 1.0, %v5039_v0  ;;  %v5017_v36 = vsub.f32 1.0, %v5009_v58 }
0x11f9   : > { %v5008_v19 = vmul.f32 %v6778_v59, %v4968_v6  ;;  %v4946_v18 = vadd.f32 -0.28449672, %v4938_v41  ;;  %v4847_v40 = vmul.f32 0.5, %v8124_v51  ;;  %v4971_v52 = vmul.f32 %v8195_v53, %v4963_v15 }
0x11fa   : > { %v5038_v14 = vsel %vm5022_vm6, %v5014_v46, %v5030_v54  ;;  %6571 = vmatprep.mubr.msk.f32.mxu1 %vm1329_vm2, %v5052_v60  ;;  %v5033_v44 = vsub.f32 0.0, %v5017_v36  ;;  %v4848_v53 = vmul.f32 0.5, %v8139_v13  ;;  %v4849_v21 = vmul.f32 0.5, %v8137_v9 }
0x11fb   : > { %v5046_v56 = vadd.f32 1.0, %v5038_v14  ;;  %6572 = vmatmul.mubr.msk.f32.vlgmr.msra.gmra.mxu1 %vm1329_vm2, %v5053_v57  ;;  %v5016_v26 = vsub.f32 1.0, %v5008_v19  ;;  %v4954_v23 = vmul.f32 %v8200_v33, %v4946_v18  ;;  %v5055_v32 = vmul.f32 %v5047_v42, %v4847_v40 }
0x11fc   : > { %v5041_v7 = vsel %vm5025_vm7, %v5017_v36, %v5033_v44  ;;  %v5011_v39 = vmul.f32 %v6780_v49, %v4971_v52  ;;  %v4850_v9 = vmul.f32 0.5, %v8150_v17  ;;  %v4851_v54 = vmul.f32 0.5, %v8148_v29 }
0x11fd   : > { %v5054_v3 = vmul.f32 %v5046_v56, %v4846_v37  ;;  %v5032_v45 = vsub.f32 0.0, %v5016_v26  ;;  %v4962_v8 = vadd.f32 0.2548296, %v4954_v23  ;;  %v5049_v51 = vadd.f32 1.0, %v5041_v7 }
0x11fe   : > { %v5019_v11 = vsub.f32 1.0, %v5011_v39 }
0x11ff   : > { %6574 = vmatprep.mubr.msk.f32.mxu1 %vm1329_vm2, %v5054_v3  ;;  %v5040_v22 = vsel %vm5024_vm8, %v5016_v26, %v5032_v45  ;;  %v4970_v46 = vmul.f32 %v8200_v33, %v4962_v8  ;;  %v5057_v55 = vmul.f32 %v5049_v51, %v4849_v21 }
0x1200   : > { %6575 = vmatmul.mubr.msk.f32.gmra.mxu1 %vm1329_vm2, %v5055_v32  ;;  %v5048_v25 = vadd.f32 1.0, %v5040_v22  ;;  %v5035_v59 = vsub.f32 0.0, %v5019_v11 }
0x1201   : > { %v5010_v50 = vmul.f32 %v6782_v35, %v4970_v46 }
0x1202   : > { %v5056_v0 = vmul.f32 %v5048_v25, %v4848_v53  ;;  %v5043_v1 = vsel %vm5027_vm9, %v5019_v11, %v5035_v59 }
0x1203   : > { %v5018_v24 = vsub.f32 1.0, %v5010_v50  ;;  %v5051_v13 = vadd.f32 1.0, %v5043_v1 }
0x1204   : > { %6577 = vmatprep.mubr.msk.f32.mxu1 %vm1329_vm2, %v5056_v0 }
0x1205   : > { %v5034_v49 = vsub.f32 0.0, %v5018_v24  ;;  %6578 = vmatmul.mubr.msk.f32.gmra.mxu1 %vm1329_vm2, %v5057_v55  ;;  %v5059_v57 = vmul.f32 %v5051_v13, %v4851_v54 }
0x1207   : > { %v5042_v33 = vsel %vm5026_vm10, %v5018_v24, %v5034_v49 }
0x1208   : > { %v5050_v60 = vadd.f32 1.0, %v5042_v33 }
0x120a   : > { %v5058_v58 = vmul.f32 %v5050_v60, %v4850_v9 }
0x120c   : > { %6580 = vmatprep.mubr.msk.f32.mxu1 %vm1329_vm2, %v5058_v58 }
0x120d   : > { %6581 = vmatmul.mubr.msk.f32.gmra.mxu1 %vm1329_vm2, %v5059_v57 }
0x12bb   : > { %v6573_v6 = vpop.f32.mrf.mxu1 }
0x12bc   : > { %v5171_v20 = vadd.f32 %v6573_v6, %v5590_v28 }
0x12bd   : > { %v5165_v47 = vpop.f32.mrf.mxu1 }
0x12be   : > { %v5205_v41 = vadd.f32 %v5171_v20, %v8052_v62  ;;  %v5166_v42 = vadd.f32 %v5590_v28, %v5165_v47 }
0x12c0   : > { %v5213_v29 = vadd.f32 %v5205_v41, %v7941_v43  ;;  %v5204_v17 = vadd.f32 %v5166_v42, %v8049_v48  ;;  %v6576_v37 = vpop.f32.mrf.mxu1 }
0x12c1   : > { %v5181_v14 = vadd.f32 %v6576_v37, %v5590_v28 }
0x12c2   : > { %5221 = vst.msk [vmem:[%s8259_s3 + $0x8] sm:$0xff] %vm680_vm0, %v5213_v29  ;;  %v5212_v62 = vadd.f32 %v5204_v17, %v7944_v12  ;;  %v5175_v36 = vpop.f32.mrf.mxu1 }
0x12c3   : > { %v5207_v56 = vadd.f32 %v5181_v14, %v8062_v16  ;;  %v5176_v19 = vadd.f32 %v5590_v28, %v5175_v36 }
0x12c4   : > { %5220 = vst.msk [vmem:[%s8259_s3] sm:$0xff] %vm680_vm0, %v5212_v62 }
0x12c5   : > { %v5215_v15 = vadd.f32 %v5207_v56, %v7949_v61  ;;  %v5206_v43 = vadd.f32 %v5176_v19, %v8059_v10  ;;  %v6579_v18 = vpop.f32.mrf.mxu1 }
0x12c6   : > { %v5191_v40 = vadd.f32 %v6579_v18, %v5590_v28 }
0x12c7   : > { %5223 = vst.msk [vmem:[%s8259_s3 + $0x18] sm:$0xff] %vm680_vm0, %v5215_v15  ;;  %v5214_v48 = vadd.f32 %v5206_v43, %v7954_v4  ;;  %v5185_v12 = vpop.f32.mrf.mxu1 }
0x12c8   : > { %v5209_v16 = vadd.f32 %v5191_v40, %v8072_v30  ;;  %v5186_v44 = vadd.f32 %v5590_v28, %v5185_v12 }
0x12c9   : > { %5222 = vst.msk [vmem:[%s8259_s3 + $0x10] sm:$0xff] %vm680_vm0, %v5214_v48 }
0x12ca   : > { %v5217_v3 = vadd.f32 %v5209_v16, %v7959_v5  ;;  %v5208_v61 = vadd.f32 %v5186_v44, %v8069_v38 }
0x12cc   : > { %5225 = vst.msk [vmem:[%s8259_s3 + $0x28] sm:$0xff] %vm680_vm0, %v5217_v3  ;;  %v5216_v10 = vadd.f32 %v5208_v61, %v7964_v27 }
0x12cd   : > { %v6582_v26 = vpop.f32.mrf.mxu1 }
0x12ce   : > { %5224 = vst.msk [vmem:[%s8259_s3 + $0x20] sm:$0xff] %vm680_vm0, %v5216_v10  ;;  %v5201_v4 = vadd.f32 %v6582_v26, %v5590_v28 }
0x12cf   : > { %v5195_v52 = vpop.f32.mrf.mxu1 }
0x12d0   : > { %v5211_v23 = vadd.f32 %v5201_v4, %v8080_v34  ;;  %v5196_v32 = vadd.f32 %v5590_v28, %v5195_v52 }
0x12d2   : > { %v5219_v30 = vadd.f32 %v5211_v23, %v7969_v63  ;;  %v5210_v7 = vadd.f32 %v5196_v32, %v8078_v2 }
0x12d4   : > { %5227 = vst.msk [vmem:[%s8259_s3 + $0x38] sm:$0xff] %vm680_vm0, %v5219_v30  ;;  %v5218_v5 = vadd.f32 %v5210_v7, %v7974_v31 }
0x12d6   : > { %5226 = vst.msk [vmem:[%s8259_s3 + $0x30] sm:$0xff] %vm680_vm0, %v5218_v5 }
0x12d7 PF: > { %s31_s2 = sadd.s32 1, %s6797_s2  }
0x12d8   : > { %p28_p4 = scmp.ge.s32.totalorder %s31_s2, 4  }
0x12da   :  { %30 = sbr.rel (!%p28_p4) target bundleno = 7 (0x7), region = 144 }

</bundles_post_ra>
